<compile_context>
chip_gen: v6e
topology: v6e:2x2x1
jax: 0.10.0
libtpu: 0.0.40
codegen_flags: <defaults>
</compile_context>

<pallas_src>
import jax
import jax.numpy as jnp
from jax.experimental import pallas as pl
from jax.experimental.pallas import tpu as pltpu

_BN_EPS = 1e-5


# ---------------------------------------------------------------------------
# Parameter preparation (trace-time: fold BN, pre-transpose, fuse, pad)
# ---------------------------------------------------------------------------
def _fold_bn(w, gamma, beta, mean, var, eps=_BN_EPS):
    """Fold 1x1-conv weight (oc, ic) + eval-mode BN into y = x @ W + b (W pre-T)."""
    scale = gamma * jax.lax.rsqrt(var + eps)               # (oc,)
    w_t = (w * scale[:, None]).T                            # (ic, oc)
    b = (beta - mean * scale)[None, :]                      # (1, oc)
    return w_t.astype(jnp.float32), b.astype(jnp.float32)


def _prepare_params(params, compute_dtype, icp):
    """Fold BN, pre-transpose; fuse [shortcut|smlp_1] for blocks 2/3; pad block 1."""
    (p_h1, p_o1, p_s1), blk2, blk3 = params
    cd = compute_dtype

    # ---- Block 1 (cin = 3): kept UNFUSED so every matmul result starts at
    # lane 0 (a fused 64|8 split would not be 128-lane aligned).  The tiny
    # contraction dims are zero-padded to icp (= 8); padded rows/cols and the
    # zero-padded hidden bias contribute exactly 0, so this is exact.
    w1, b1 = _fold_bn(*p_h1)          # (3, 3)   smlp_1
    w2, b2 = _fold_bn(*p_o1)          # (3, 64)  smlp_2
    ws, bs = _fold_bn(*p_s1)          # (3, 64)  shortcut
    cin = w1.shape[0]
    pad = icp - cin
    w1 = jnp.pad(w1, ((0, pad), (0, pad)))     # (8, 8)
    b1 = jnp.pad(b1, ((0, 0), (0, pad)))       # (1, 8)
    w2 = jnp.pad(w2, ((0, pad), (0, 0)))       # (8, 64)
    ws = jnp.pad(ws, ((0, pad), (0, 0)))       # (8, 64)
    flat = [ws.astype(cd), bs, w1.astype(cd), b1, w2.astype(cd), b2]

    # ---- Blocks 2 & 3: fuse the two matmuls that share the same input
    # (shortcut | smlp_1).  Split points land at lanes 128 / 256 -> aligned.
    for p_h, p_o, p_s in (blk2, blk3):
        w1, b1 = _fold_bn(*p_h)                  # (cin, cin)
        w2, b2 = _fold_bn(*p_o)                  # (cin, cout)
        ws, bs = _fold_bn(*p_s)                  # (cin, cout)
        wc = jnp.concatenate([ws, w1], axis=1)   # (cin, cout + cin)
        bc = jnp.concatenate([bs, b1], axis=1)   # (1,  cout + cin)
        flat.extend([wc.astype(cd), bc, w2.astype(cd), b2])
    return flat


# ---------------------------------------------------------------------------
# Kernel
# ---------------------------------------------------------------------------
def _res_block_fused(x, wc_ref, bc_ref, w2_ref, b2_ref):
    """ResSMLP block with fused [shortcut | smlp_1] weight (blocks 2 / 3)."""
    cout = w2_ref.shape[1]
    sh = jnp.dot(x.astype(wc_ref.dtype), wc_ref[...],
                 preferred_element_type=jnp.float32) + bc_ref[...]
    s = sh[:, :cout]                       # shortcut(x)       (128-lane aligned)
    h = jnp.maximum(sh[:, cout:], 0.0)     # relu(smlp_1(x))   f32 elementwise
    y = jnp.dot(h.astype(w2_ref.dtype), w2_ref[...],
                preferred_element_type=jnp.float32) + b2_ref[...]
    return jnp.maximum(s + y, 0.0)         # relu(shortcut + smlp_2)   f32


def _make_kernel(n_valid, tn, steps_per_split, need_mask):
    def kernel(pts_ref,
               ws1, bs1, w11, b11, w21, b21,
               wc2, bc2, w22, b22,
               wc3, bc3, w23, b23,
               ftr_ref, cdw_ref, max_sc):
        c = pl.program_id(1)               # row-split index (v7x core parallelism)
        n = pl.program_id(2)               # row-tile index inside the split

        x = pts_ref[0]                     # (tn, 8) compute dtype, channels 3..7 = 0

        # ---- Block 1 (unfused; tiny K, all outputs start at lane 0) ----
        s = jnp.dot(x, ws1[...], preferred_element_type=jnp.float32) + bs1[...]
        h = jnp.maximum(
            jnp.dot(x, w11[...], preferred_element_type=jnp.float32) + b11[...],
            0.0)
        y = jnp.dot(h.astype(w21.dtype), w21[...],
                    preferred_element_type=jnp.float32) + b21[...]
        f = jnp.maximum(s + y, 0.0)                      # (tn, 64)  f32

        # ---- Blocks 2 & 3 (fused shortcut | smlp_1) ----
        f = _res_block_fused(f, wc2, bc2, w22, b22)      # (tn, 128) f32
        f = _res_block_fused(f, wc3, bc3, w23, b23)      # (tn, ebd) f32

        ftr_ref[0] = f.astype(ftr_ref.dtype)             # bf16 writeback by default

        # ---- Running codeword max ----
        if need_mask:   # static flag: only compiled in when N was padded up
            row0 = (c * steps_per_split + n) * tn
            rid = jax.lax.broadcasted_iota(jnp.int32, f.shape, 0) + row0
            f = jnp.where(rid < n_valid, f, -jnp.inf)

        @pl.when(n == 0)
        def _init():
            max_sc[...] = jnp.full(max_sc.shape, -jnp.inf, max_sc.dtype)

        # Pure VALU max across vreg-rows each step; (tn, ebd) -> (8, ebd).
        ebd = f.shape[-1]
        max_sc[...] = jnp.maximum(max_sc[...],
                                  jnp.max(f.reshape(tn // 8, 8, ebd), axis=0))

        @pl.when(n == steps_per_split - 1)
        def _store():
            # Single cross-sublane reduce per (batch, split), not per tile.
            cdw_ref[0] = jnp.max(max_sc[...], axis=0,
                                 keepdims=True).astype(cdw_ref.dtype)
    return kernel


# ---------------------------------------------------------------------------
# Generation-aware tiling helpers
# ---------------------------------------------------------------------------
def _tpu_budgets():
    """(vmem_limit_bytes, default_row_tile) from the local TPU generation."""
    cap = 64 << 20                                   # conservative fallback
    try:
        info = pltpu.get_tpu_info()
        cap = int(getattr(info, "vmem_capacity_bytes", cap) or cap)
    except Exception:
        pass
    if cap <= (64 << 20):                            # v7x-class (64 MiB VMEM)
        return 44 << 20, 512
    return 96 << 20, 1024                            # v5e / v6e (128 MiB VMEM)


def _pick_row_tile(n, target):
    """Largest multiple-of-16 divisor of n <= target; otherwise pad n up."""
    target = max(16, (int(target) // 16) * 16)
    best = 0
    t = 16
    while t <= min(n, target):
        if n % t == 0:
            best = t
        t += 16
    if best:
        return best, 0
    tn = min(target, ((n + 15) // 16) * 16)
    n_padded = ((n + tn - 1) // tn) * tn
    return tn, n_padded - n


# ---------------------------------------------------------------------------
# Wrapper
# ---------------------------------------------------------------------------
def cdw_extractor_s_v2(pts, params, *, compute_dtype=jnp.bfloat16,
                       ftr_dtype=None, row_tile=None, row_splits=2,
                       vmem_limit_bytes=None):
    """Pallas forward of CdwExtractorS_V2.

    pts    : (B, N, 3) float32 point cloud.
    params : list of 3 blocks, each (smlp_1, smlp_2, shortcut) where each SMLP
             is (conv_w (oc, ic), gamma, beta, running_mean, running_var).
    Returns (cdw (B, ebd) float32, ftr (B, N, ebd) in `ftr_dtype`
             [defaults to compute_dtype, i.e. bfloat16]).
    """
    B, N, C = pts.shape
    ftr_dtype = compute_dtype if ftr_dtype is None else ftr_dtype

    vmem_default, tile_default = _tpu_budgets()
    vmem_limit_bytes = vmem_default if vmem_limit_bytes is None else vmem_limit_bytes
    row_tile = tile_default if row_tile is None else row_tile

    icp = 8                                   # sublane-aligned input channels
    kparams = _prepare_params(params, compute_dtype, icp)
    ebd = kparams[-2].shape[1]                # embedding dim of the last block

    tn, pad_n = _pick_row_tile(N, row_tile)
    n_total = N + pad_n
    steps_total = n_total // tn
    splits = row_splits if (row_splits > 1 and steps_total % row_splits == 0) else 1
    steps = steps_total // splits

    # Channel pad (3 -> 8) + optional row pad + bf16 cast fused into one tiny
    # XLA pass over the raw points (12 B/point); padded entries are zeros.
    pts_p = jnp.pad(pts, ((0, 0), (0, pad_n), (0, icp - C))).astype(compute_dtype)

    kernel = _make_kernel(N, tn, steps, pad_n > 0)

    in_specs = [pl.BlockSpec((1, tn, icp), lambda b, c, n: (b, c * steps + n, 0))]
    # Weights / biases: constant index_map -> resident in VMEM, no per-step DMA.
    in_specs += [pl.BlockSpec(p.shape, lambda b, c, n: (0, 0)) for p in kparams]
    out_specs = (
        pl.BlockSpec((1, tn, ebd), lambda b, c, n: (b, c * steps + n, 0)),  # ftr
        pl.BlockSpec((1, 1, ebd), lambda b, c, n: (b * splits + c, 0, 0)),  # cdw part
    )
    out_shape = (
        jax.ShapeDtypeStruct((B, n_total, ebd), ftr_dtype),
        jax.ShapeDtypeStruct((B * splits, 1, ebd), jnp.float32),
    )

    ftr, cdw_parts = pl.pallas_call(
        kernel,
        out_shape=out_shape,
        grid_spec=pltpu.PrefetchScalarGridSpec(
            num_scalar_prefetch=0,
            grid=(B, splits, steps),
            in_specs=in_specs,
            out_specs=out_specs,
            scratch_shapes=[pltpu.VMEM((8, ebd), jnp.float32)],
        ),
        compiler_params=pltpu.CompilerParams(
            dimension_semantics=("parallel", "parallel", "arbitrary"),
            vmem_limit_bytes=int(vmem_limit_bytes),
        ),
    )(pts_p, *kparams)

    cdw = jnp.max(cdw_parts.reshape(B, splits, ebd), axis=1)   # (B, ebd) f32
    if pad_n:
        ftr = ftr[:, :N, :]
    return cdw, ftr


# ---------------------------------------------------------------------------
# Pure-JAX reference (eval-mode BN, matches the PyTorch forward)
# ---------------------------------------------------------------------------
def _smlp_ref(x, w, gamma, beta, mean, var, eps=_BN_EPS):
    y = jnp.einsum("bnc,oc->bno", x, w, precision=jax.lax.Precision.HIGHEST)
    return (y - mean) * (gamma * jax.lax.rsqrt(var + eps)) + beta


def cdw_extractor_ref(pts, params):
    f = pts
    for p_hidden, p_out, p_short in params:
        h = jax.nn.relu(_smlp_ref(f, *p_hidden))
        y = _smlp_ref(h, *p_out)
        s = _smlp_ref(f, *p_short)
        f = jax.nn.relu(s + y)
    return jnp.max(f, axis=1), f


# ---------------------------------------------------------------------------
# Test
# ---------------------------------------------------------------------------
if __name__ == "__main__":
    B, N, ebd = 2, 256, 256
    dims = [3, 64, 128, ebd]

    def make_smlp_params(key, ic, oc):
        kw, kg, kb, km, kv = jax.random.split(key, 5)
        w = jax.random.normal(kw, (oc, ic), jnp.float32) * 0.1   # conv weight
        gamma = jax.random.uniform(kg, (oc,), jnp.float32, 0.5, 1.5)
        beta = jax.random.normal(kb, (oc,), jnp.float32) * 0.1
        mean = jax.random.normal(km, (oc,), jnp.float32) * 0.1
        var = jax.random.uniform(kv, (oc,), jnp.float32, 0.5, 1.5)
        return (w, gamma, beta, mean, var)

    key = jax.random.PRNGKey(0)
    params = []
    for i in range(3):
        key, k1, k2, ks = jax.random.split(key, 4)
        cin, cout = dims[i], dims[i + 1]
        params.append((make_smlp_params(k1, cin, cin),    # smlp_1
                       make_smlp_params(k2, cin, cout),   # smlp_2
                       make_smlp_params(ks, cin, cout)))  # shortcut

    key, kp = jax.random.split(key)
    pts = jax.random.normal(kp, (B, N, 3), jnp.float32)

    cdw, ftr = cdw_extractor_s_v2(pts, params)            # bf16 MXU, bf16 ftr
    cdw = jax.block_until_ready(cdw)
    ftr = jax.block_until_ready(ftr)

    cdw_ref, ftr_ref = cdw_extractor_ref(pts, params)
    assert cdw.shape == (B, ebd) and ftr.shape == (B, N, ebd)
    # bf16 MXU operands + bf16 ftr output -> compare at bf16-level tolerance.
    assert jnp.allclose(ftr.astype(jnp.float32), ftr_ref,
                        atol=5e-2, rtol=5e-2), "ftr mismatch vs reference"
    assert jnp.allclose(cdw, cdw_ref,
                        atol=5e-2, rtol=5e-2), "cdw mismatch vs reference"

    print("KERNEL_OK")
</pallas_src>

<mosaic_0001>
module attributes {stable_mosaic.version = 11 : i64} {
  func.func @kernel(%arg0: i32, %arg1: i32, %arg2: i32, %arg3: memref<1x256x8xbf16, #tpu.memory_space<vmem>>, %arg4: memref<8x64xbf16, #tpu.memory_space<vmem>>, %arg5: memref<1x64xf32, #tpu.memory_space<vmem>>, %arg6: memref<8x8xbf16, #tpu.memory_space<vmem>>, %arg7: memref<1x8xf32, #tpu.memory_space<vmem>>, %arg8: memref<8x64xbf16, #tpu.memory_space<vmem>>, %arg9: memref<1x64xf32, #tpu.memory_space<vmem>>, %arg10: memref<64x192xbf16, #tpu.memory_space<vmem>>, %arg11: memref<1x192xf32, #tpu.memory_space<vmem>>, %arg12: memref<64x128xbf16, #tpu.memory_space<vmem>>, %arg13: memref<1x128xf32, #tpu.memory_space<vmem>>, %arg14: memref<128x384xbf16, #tpu.memory_space<vmem>>, %arg15: memref<1x384xf32, #tpu.memory_space<vmem>>, %arg16: memref<128x256xbf16, #tpu.memory_space<vmem>>, %arg17: memref<1x256xf32, #tpu.memory_space<vmem>>, %arg18: memref<1x256x256xbf16, #tpu.memory_space<vmem>>, %arg19: memref<1x1x256xf32, #tpu.memory_space<vmem>>, %arg20: memref<8x256xf32, #tpu.memory_space<vmem>>) attributes {dimension_semantics = [#tpu.dimension_semantics<parallel>, #tpu.dimension_semantics<parallel>, #tpu.dimension_semantics<arbitrary>], iteration_bounds = array<i64: 2, 1, 1>, scalar_prefetch = 0 : i64, scratch_operands = 1 : i64, tpu.core_type = #tpu.core_type<tc>, window_params = [{transform_indices = @transform_0, window_bounds = array<i64: 1, 256, 8>}, {pipeline_mode = #tpu.pipeline_mode<synchronous>, transform_indices = @transform_1, window_bounds = array<i64: 8, 64>}, {pipeline_mode = #tpu.pipeline_mode<synchronous>, transform_indices = @transform_2, window_bounds = array<i64: 1, 64>}, {pipeline_mode = #tpu.pipeline_mode<synchronous>, transform_indices = @transform_3, window_bounds = array<i64: 8, 8>}, {pipeline_mode = #tpu.pipeline_mode<synchronous>, transform_indices = @transform_4, window_bounds = array<i64: 1, 8>}, {pipeline_mode = #tpu.pipeline_mode<synchronous>, transform_indices = @transform_5, window_bounds = array<i64: 8, 64>}, {pipeline_mode = #tpu.pipeline_mode<synchronous>, transform_indices = @transform_6, window_bounds = array<i64: 1, 64>}, {pipeline_mode = #tpu.pipeline_mode<synchronous>, transform_indices = @transform_7, window_bounds = array<i64: 64, 192>}, {pipeline_mode = #tpu.pipeline_mode<synchronous>, transform_indices = @transform_8, window_bounds = array<i64: 1, 192>}, {pipeline_mode = #tpu.pipeline_mode<synchronous>, transform_indices = @transform_9, window_bounds = array<i64: 64, 128>}, {pipeline_mode = #tpu.pipeline_mode<synchronous>, transform_indices = @transform_10, window_bounds = array<i64: 1, 128>}, {pipeline_mode = #tpu.pipeline_mode<synchronous>, transform_indices = @transform_11, window_bounds = array<i64: 128, 384>}, {pipeline_mode = #tpu.pipeline_mode<synchronous>, transform_indices = @transform_12, window_bounds = array<i64: 1, 384>}, {pipeline_mode = #tpu.pipeline_mode<synchronous>, transform_indices = @transform_13, window_bounds = array<i64: 128, 256>}, {pipeline_mode = #tpu.pipeline_mode<synchronous>, transform_indices = @transform_14, window_bounds = array<i64: 1, 256>}, {transform_indices = @transform_15, window_bounds = array<i64: 1, 256, 256>}, {transform_indices = @transform_16, window_bounds = array<i64: 1, 1, 256>}]} {
    %c0 = arith.constant 0 : index
    %c0_0 = arith.constant 0 : index
    %c0_1 = arith.constant 0 : index
    %0 = vector.load %arg3[%c0, %c0_0, %c0_1] : memref<1x256x8xbf16, #tpu.memory_space<vmem>>, vector<1x256x8xbf16>
    %1 = vector.shape_cast %0 : vector<1x256x8xbf16> to vector<256x8xbf16>
    %c0_2 = arith.constant 0 : index
    %c0_3 = arith.constant 0 : index
    %2 = vector.load %arg4[%c0_2, %c0_3] : memref<8x64xbf16, #tpu.memory_space<vmem>>, vector<8x64xbf16>
    %cst = arith.constant dense<0.000000e+00> : vector<256x64xf32>
    %3 = tpu.matmul %1, %2, %cst {dimension_numbers = #tpu.dot_dimension_numbers<[1], [0], [0], [1], [0, 0, 1, 1], [], []>} : vector<256x8xbf16>, vector<8x64xbf16>, vector<256x64xf32> -> vector<256x64xf32>
    %c0_4 = arith.constant 0 : index
    %c0_5 = arith.constant 0 : index
    %4 = vector.load %arg5[%c0_4, %c0_5] : memref<1x64xf32, #tpu.memory_space<vmem>>, vector<1x64xf32>
    %5 = vector.broadcast %4 : vector<1x64xf32> to vector<256x64xf32>
    %6 = arith.addf %3, %5 : vector<256x64xf32>
    %c0_6 = arith.constant 0 : index
    %c0_7 = arith.constant 0 : index
    %7 = vector.load %arg6[%c0_6, %c0_7] : memref<8x8xbf16, #tpu.memory_space<vmem>>, vector<8x8xbf16>
    %cst_8 = arith.constant dense<0.000000e+00> : vector<256x8xf32>
    %8 = tpu.matmul %1, %7, %cst_8 {dimension_numbers = #tpu.dot_dimension_numbers<[1], [0], [0], [1], [0, 0, 1, 1], [], []>} : vector<256x8xbf16>, vector<8x8xbf16>, vector<256x8xf32> -> vector<256x8xf32>
    %c0_9 = arith.constant 0 : index
    %c0_10 = arith.constant 0 : index
    %9 = vector.load %arg7[%c0_9, %c0_10] : memref<1x8xf32, #tpu.memory_space<vmem>>, vector<1x8xf32>
    %10 = vector.broadcast %9 : vector<1x8xf32> to vector<256x8xf32>
    %11 = arith.addf %8, %10 : vector<256x8xf32>
    %cst_11 = arith.constant 0.000000e+00 : f32
    %12 = vector.broadcast %cst_11 : f32 to vector<256x8xf32>
    %13 = arith.maximumf %11, %12 : vector<256x8xf32>
    %14 = arith.truncf %13 : vector<256x8xf32> to vector<256x8xbf16>
    %c0_12 = arith.constant 0 : index
    %c0_13 = arith.constant 0 : index
    %15 = vector.load %arg8[%c0_12, %c0_13] : memref<8x64xbf16, #tpu.memory_space<vmem>>, vector<8x64xbf16>
    %cst_14 = arith.constant dense<0.000000e+00> : vector<256x64xf32>
    %16 = tpu.matmul %14, %15, %cst_14 {dimension_numbers = #tpu.dot_dimension_numbers<[1], [0], [0], [1], [0, 0, 1, 1], [], []>} : vector<256x8xbf16>, vector<8x64xbf16>, vector<256x64xf32> -> vector<256x64xf32>
    %c0_15 = arith.constant 0 : index
    %c0_16 = arith.constant 0 : index
    %17 = vector.load %arg9[%c0_15, %c0_16] : memref<1x64xf32, #tpu.memory_space<vmem>>, vector<1x64xf32>
    %18 = vector.broadcast %17 : vector<1x64xf32> to vector<256x64xf32>
    %19 = arith.addf %16, %18 : vector<256x64xf32>
    %20 = arith.addf %6, %19 : vector<256x64xf32>
    %cst_17 = arith.constant 0.000000e+00 : f32
    %21 = vector.broadcast %cst_17 : f32 to vector<256x64xf32>
    %22 = arith.maximumf %20, %21 : vector<256x64xf32>
    %23 = arith.truncf %22 : vector<256x64xf32> to vector<256x64xbf16>
    %c0_18 = arith.constant 0 : index
    %c0_19 = arith.constant 0 : index
    %24 = vector.load %arg10[%c0_18, %c0_19] : memref<64x192xbf16, #tpu.memory_space<vmem>>, vector<64x192xbf16>
    %cst_20 = arith.constant dense<0.000000e+00> : vector<256x192xf32>
    %25 = tpu.matmul %23, %24, %cst_20 {dimension_numbers = #tpu.dot_dimension_numbers<[1], [0], [0], [1], [0, 0, 1, 1], [], []>} : vector<256x64xbf16>, vector<64x192xbf16>, vector<256x192xf32> -> vector<256x192xf32>
    %c0_21 = arith.constant 0 : index
    %c0_22 = arith.constant 0 : index
    %26 = vector.load %arg11[%c0_21, %c0_22] : memref<1x192xf32, #tpu.memory_space<vmem>>, vector<1x192xf32>
    %27 = vector.broadcast %26 : vector<1x192xf32> to vector<256x192xf32>
    %28 = arith.addf %25, %27 : vector<256x192xf32>
    %29 = vector.extract_strided_slice %28 {offsets = [0, 0], sizes = [256, 128], strides = [1, 1]} : vector<256x192xf32> to vector<256x128xf32>
    %30 = vector.extract_strided_slice %28 {offsets = [0, 128], sizes = [256, 64], strides = [1, 1]} : vector<256x192xf32> to vector<256x64xf32>
    %cst_23 = arith.constant 0.000000e+00 : f32
    %31 = vector.broadcast %cst_23 : f32 to vector<256x64xf32>
    %32 = arith.maximumf %30, %31 : vector<256x64xf32>
    %33 = arith.truncf %32 : vector<256x64xf32> to vector<256x64xbf16>
    %c0_24 = arith.constant 0 : index
    %c0_25 = arith.constant 0 : index
    %34 = vector.load %arg12[%c0_24, %c0_25] : memref<64x128xbf16, #tpu.memory_space<vmem>>, vector<64x128xbf16>
    %cst_26 = arith.constant dense<0.000000e+00> : vector<256x128xf32>
    %35 = tpu.matmul %33, %34, %cst_26 {dimension_numbers = #tpu.dot_dimension_numbers<[1], [0], [0], [1], [0, 0, 1, 1], [], []>} : vector<256x64xbf16>, vector<64x128xbf16>, vector<256x128xf32> -> vector<256x128xf32>
    %c0_27 = arith.constant 0 : index
    %c0_28 = arith.constant 0 : index
    %36 = vector.load %arg13[%c0_27, %c0_28] : memref<1x128xf32, #tpu.memory_space<vmem>>, vector<1x128xf32>
    %37 = vector.broadcast %36 : vector<1x128xf32> to vector<256x128xf32>
    %38 = arith.addf %35, %37 : vector<256x128xf32>
    %39 = arith.addf %29, %38 : vector<256x128xf32>
    %cst_29 = arith.constant 0.000000e+00 : f32
    %40 = vector.broadcast %cst_29 : f32 to vector<256x128xf32>
    %41 = arith.maximumf %39, %40 : vector<256x128xf32>
    %42 = arith.truncf %41 : vector<256x128xf32> to vector<256x128xbf16>
    %c0_30 = arith.constant 0 : index
    %c0_31 = arith.constant 0 : index
    %43 = vector.load %arg14[%c0_30, %c0_31] : memref<128x384xbf16, #tpu.memory_space<vmem>>, vector<128x384xbf16>
    %cst_32 = arith.constant dense<0.000000e+00> : vector<256x384xf32>
    %44 = tpu.matmul %42, %43, %cst_32 {dimension_numbers = #tpu.dot_dimension_numbers<[1], [0], [0], [1], [0, 0, 1, 1], [], []>} : vector<256x128xbf16>, vector<128x384xbf16>, vector<256x384xf32> -> vector<256x384xf32>
    %c0_33 = arith.constant 0 : index
    %c0_34 = arith.constant 0 : index
    %45 = vector.load %arg15[%c0_33, %c0_34] : memref<1x384xf32, #tpu.memory_space<vmem>>, vector<1x384xf32>
    %46 = vector.broadcast %45 : vector<1x384xf32> to vector<256x384xf32>
    %47 = arith.addf %44, %46 : vector<256x384xf32>
    %48 = vector.extract_strided_slice %47 {offsets = [0, 0], sizes = [256, 256], strides = [1, 1]} : vector<256x384xf32> to vector<256x256xf32>
    %49 = vector.extract_strided_slice %47 {offsets = [0, 256], sizes = [256, 128], strides = [1, 1]} : vector<256x384xf32> to vector<256x128xf32>
    %cst_35 = arith.constant 0.000000e+00 : f32
    %50 = vector.broadcast %cst_35 : f32 to vector<256x128xf32>
    %51 = arith.maximumf %49, %50 : vector<256x128xf32>
    %52 = arith.truncf %51 : vector<256x128xf32> to vector<256x128xbf16>
    %c0_36 = arith.constant 0 : index
    %c0_37 = arith.constant 0 : index
    %53 = vector.load %arg16[%c0_36, %c0_37] : memref<128x256xbf16, #tpu.memory_space<vmem>>, vector<128x256xbf16>
    %cst_38 = arith.constant dense<0.000000e+00> : vector<256x256xf32>
    %54 = tpu.matmul %52, %53, %cst_38 {dimension_numbers = #tpu.dot_dimension_numbers<[1], [0], [0], [1], [0, 0, 1, 1], [], []>} : vector<256x128xbf16>, vector<128x256xbf16>, vector<256x256xf32> -> vector<256x256xf32>
    %c0_39 = arith.constant 0 : index
    %c0_40 = arith.constant 0 : index
    %55 = vector.load %arg17[%c0_39, %c0_40] : memref<1x256xf32, #tpu.memory_space<vmem>>, vector<1x256xf32>
    %56 = vector.broadcast %55 : vector<1x256xf32> to vector<256x256xf32>
    %57 = arith.addf %54, %56 : vector<256x256xf32>
    %58 = arith.addf %48, %57 : vector<256x256xf32>
    %cst_41 = arith.constant 0.000000e+00 : f32
    %59 = vector.broadcast %cst_41 : f32 to vector<256x256xf32>
    %60 = arith.maximumf %58, %59 : vector<256x256xf32>
    %61 = arith.truncf %60 : vector<256x256xf32> to vector<256x256xbf16>
    %c0_42 = arith.constant 0 : index
    %c0_43 = arith.constant 0 : index
    %c0_44 = arith.constant 0 : index
    %62 = vector.load %arg18[%c0_42, %c0_43, %c0_44] : memref<1x256x256xbf16, #tpu.memory_space<vmem>>, vector<1x256x256xbf16>
    %63 = vector.shape_cast %62 : vector<1x256x256xbf16> to vector<256x256xbf16>
    %64 = vector.shape_cast %61 : vector<256x256xbf16> to vector<1x256x256xbf16>
    tpu.vector_store %arg18[%c0_42, %c0_43, %c0_44], %64 {strides = array<i32>} : memref<1x256x256xbf16, #tpu.memory_space<vmem>>, vector<1x256x256xbf16>,
    %c0_i32 = arith.constant 0 : i32
    %65 = arith.cmpi eq, %arg2, %c0_i32 : i32
    %66 = arith.extui %65 : i1 to i32
    %c0_i32_45 = arith.constant 0 : i32
    %67 = arith.cmpi ne, %66, %c0_i32_45 : i32
    scf.if %67 {
      %cst_53 = arith.constant 0xFF800000 : f32
      %76 = vector.broadcast %cst_53 : f32 to vector<8x256xf32>
      %c0_54 = arith.constant 0 : index
      %c0_55 = arith.constant 0 : index
      %77 = vector.load %arg20[%c0_54, %c0_55] : memref<8x256xf32, #tpu.memory_space<vmem>>, vector<8x256xf32>
      tpu.vector_store %arg20[%c0_54, %c0_55], %76 {strides = array<i32>} : memref<8x256xf32, #tpu.memory_space<vmem>>, vector<8x256xf32>,
    } else {
    }
    %c0_46 = arith.constant 0 : index
    %c0_47 = arith.constant 0 : index
    %68 = vector.load %arg20[%c0_46, %c0_47] : memref<8x256xf32, #tpu.memory_space<vmem>>, vector<8x256xf32>
    %69 = vector.shape_cast %60 : vector<256x256xf32> to vector<32x8x256xf32>
    %cst_48 = arith.constant dense<0xFF800000> : vector<8x256xf32>
    %70 = vector.multi_reduction <maximumf>, %69, %cst_48 [0] : vector<32x8x256xf32> to vector<8x256xf32>
    %71 = arith.maximumf %68, %70 : vector<8x256xf32>
    %c0_49 = arith.constant 0 : index
    %c0_50 = arith.constant 0 : index
    %72 = vector.load %arg20[%c0_49, %c0_50] : memref<8x256xf32, #tpu.memory_space<vmem>>, vector<8x256xf32>
    tpu.vector_store %arg20[%c0_49, %c0_50], %71 {strides = array<i32>} : memref<8x256xf32, #tpu.memory_space<vmem>>, vector<8x256xf32>,
    %c0_i32_51 = arith.constant 0 : i32
    %73 = arith.cmpi eq, %arg2, %c0_i32_51 : i32
    %74 = arith.extui %73 : i1 to i32
    %c0_i32_52 = arith.constant 0 : i32
    %75 = arith.cmpi ne, %74, %c0_i32_52 : i32
    scf.if %75 {
      %c0_53 = arith.constant 0 : index
      %c0_54 = arith.constant 0 : index
      %76 = vector.load %arg20[%c0_53, %c0_54] : memref<8x256xf32, #tpu.memory_space<vmem>>, vector<8x256xf32>
      %cst_55 = arith.constant dense<0xFF800000> : vector<256xf32>
      %77 = vector.multi_reduction <maximumf>, %76, %cst_55 [0] : vector<8x256xf32> to vector<256xf32>
      %78 = vector.shape_cast %77 : vector<256xf32> to vector<1x256xf32>
      %c0_56 = arith.constant 0 : index
      %c0_57 = arith.constant 0 : index
      %c0_58 = arith.constant 0 : index
      %79 = vector.load %arg19[%c0_56, %c0_57, %c0_58] : memref<1x1x256xf32, #tpu.memory_space<vmem>>, vector<1x1x256xf32>
      %80 = vector.shape_cast %79 : vector<1x1x256xf32> to vector<1x256xf32>
      %81 = vector.shape_cast %78 : vector<1x256xf32> to vector<1x1x256xf32>
      tpu.vector_store %arg19[%c0_56, %c0_57, %c0_58], %81 {strides = array<i32>} : memref<1x1x256xf32, #tpu.memory_space<vmem>>, vector<1x1x256xf32>,
    } else {
    }
    return
  }
  func.func @transform_0(%arg0: i32, %arg1: i32, %arg2: i32) -> (i32, i32, i32) {
    %c1_i32 = arith.constant 1 : i32
    %0 = arith.muli %arg1, %c1_i32 : i32
    %1 = arith.addi %0, %arg2 : i32
    %c0_i32 = arith.constant 0 : i32
    %c0_i32_0 = arith.constant 0 : i32
    return %arg0, %1, %c0_i32 : i32, i32, i32
  }
  func.func @transform_1(%arg0: i32, %arg1: i32, %arg2: i32) -> (i32, i32) {
    %c0_i32 = arith.constant 0 : i32
    %c0_i32_0 = arith.constant 0 : i32
    %c0_i32_1 = arith.constant 0 : i32
    return %c0_i32, %c0_i32_0 : i32, i32
  }
  func.func @transform_2(%arg0: i32, %arg1: i32, %arg2: i32) -> (i32, i32) {
    %c0_i32 = arith.constant 0 : i32
    %c0_i32_0 = arith.constant 0 : i32
    %c0_i32_1 = arith.constant 0 : i32
    return %c0_i32, %c0_i32_0 : i32, i32
  }
  func.func @transform_3(%arg0: i32, %arg1: i32, %arg2: i32) -> (i32, i32) {
    %c0_i32 = arith.constant 0 : i32
    %c0_i32_0 = arith.constant 0 : i32
    %c0_i32_1 = arith.constant 0 : i32
    return %c0_i32, %c0_i32_0 : i32, i32
  }
  func.func @transform_4(%arg0: i32, %arg1: i32, %arg2: i32) -> (i32, i32) {
    %c0_i32 = arith.constant 0 : i32
    %c0_i32_0 = arith.constant 0 : i32
    %c0_i32_1 = arith.constant 0 : i32
    return %c0_i32, %c0_i32_0 : i32, i32
  }
  func.func @transform_5(%arg0: i32, %arg1: i32, %arg2: i32) -> (i32, i32) {
    %c0_i32 = arith.constant 0 : i32
    %c0_i32_0 = arith.constant 0 : i32
    %c0_i32_1 = arith.constant 0 : i32
    return %c0_i32, %c0_i32_0 : i32, i32
  }
  func.func @transform_6(%arg0: i32, %arg1: i32, %arg2: i32) -> (i32, i32) {
    %c0_i32 = arith.constant 0 : i32
    %c0_i32_0 = arith.constant 0 : i32
    %c0_i32_1 = arith.constant 0 : i32
    return %c0_i32, %c0_i32_0 : i32, i32
  }
  func.func @transform_7(%arg0: i32, %arg1: i32, %arg2: i32) -> (i32, i32) {
    %c0_i32 = arith.constant 0 : i32
    %c0_i32_0 = arith.constant 0 : i32
    %c0_i32_1 = arith.constant 0 : i32
    return %c0_i32, %c0_i32_0 : i32, i32
  }
  func.func @transform_8(%arg0: i32, %arg1: i32, %arg2: i32) -> (i32, i32) {
    %c0_i32 = arith.constant 0 : i32
    %c0_i32_0 = arith.constant 0 : i32
    %c0_i32_1 = arith.constant 0 : i32
    return %c0_i32, %c0_i32_0 : i32, i32
  }
  func.func @transform_9(%arg0: i32, %arg1: i32, %arg2: i32) -> (i32, i32) {
    %c0_i32 = arith.constant 0 : i32
    %c0_i32_0 = arith.constant 0 : i32
    %c0_i32_1 = arith.constant 0 : i32
    return %c0_i32, %c0_i32_0 : i32, i32
  }
  func.func @transform_10(%arg0: i32, %arg1: i32, %arg2: i32) -> (i32, i32) {
    %c0_i32 = arith.constant 0 : i32
    %c0_i32_0 = arith.constant 0 : i32
    %c0_i32_1 = arith.constant 0 : i32
    return %c0_i32, %c0_i32_0 : i32, i32
  }
  func.func @transform_11(%arg0: i32, %arg1: i32, %arg2: i32) -> (i32, i32) {
    %c0_i32 = arith.constant 0 : i32
    %c0_i32_0 = arith.constant 0 : i32
    %c0_i32_1 = arith.constant 0 : i32
    return %c0_i32, %c0_i32_0 : i32, i32
  }
  func.func @transform_12(%arg0: i32, %arg1: i32, %arg2: i32) -> (i32, i32) {
    %c0_i32 = arith.constant 0 : i32
    %c0_i32_0 = arith.constant 0 : i32
    %c0_i32_1 = arith.constant 0 : i32
    return %c0_i32, %c0_i32_0 : i32, i32
  }
  func.func @transform_13(%arg0: i32, %arg1: i32, %arg2: i32) -> (i32, i32) {
    %c0_i32 = arith.constant 0 : i32
    %c0_i32_0 = arith.constant 0 : i32
    %c0_i32_1 = arith.constant 0 : i32
    return %c0_i32, %c0_i32_0 : i32, i32
  }
  func.func @transform_14(%arg0: i32, %arg1: i32, %arg2: i32) -> (i32, i32) {
    %c0_i32 = arith.constant 0 : i32
    %c0_i32_0 = arith.constant 0 : i32
    %c0_i32_1 = arith.constant 0 : i32
    return %c0_i32, %c0_i32_0 : i32, i32
  }
  func.func @transform_15(%arg0: i32, %arg1: i32, %arg2: i32) -> (i32, i32, i32) {
    %c1_i32 = arith.constant 1 : i32
    %0 = arith.muli %arg1, %c1_i32 : i32
    %1 = arith.addi %0, %arg2 : i32
    %c0_i32 = arith.constant 0 : i32
    %c0_i32_0 = arith.constant 0 : i32
    return %arg0, %1, %c0_i32 : i32, i32, i32
  }
  func.func @transform_16(%arg0: i32, %arg1: i32, %arg2: i32) -> (i32, i32, i32) {
    %c1_i32 = arith.constant 1 : i32
    %0 = arith.muli %arg0, %c1_i32 : i32
    %1 = arith.addi %0, %arg1 : i32
    %c0_i32 = arith.constant 0 : i32
    %c0_i32_0 = arith.constant 0 : i32
    %c0_i32_1 = arith.constant 0 : i32
    return %1, %c0_i32, %c0_i32_0 : i32, i32, i32
  }
}

</mosaic_0001>

<bundles_post_ra>
// kernel: tpu_custom_call.1
= control target key start
LH: loop header
LB: loop body
LE: loop exit
PB: predicated region body
PF: predicated region fallthrough
CT: control target
= control target key end

     0   :  { %s6655_s0 = inlined_call_operand.vmem [shape: bf16[2,256,8], index: 0, kind: input, shape index: {}]   ;;  %s6656_s1 = inlined_call_operand.vmem [shape: bf16[8,64], index: 1, kind: input, shape index: {}]   ;;  %s6657_s2 = inlined_call_operand.hbm [shape: f32[1,64], index: 2, kind: input, shape index: {}]   ;;  %s6658_s3 = inlined_call_operand.hbm [shape: bf16[8,8], index: 3, kind: input, shape index: {}]   ;;  %s6659_s4 = inlined_call_operand.hbm [shape: f32[1,8], index: 4, kind: input, shape index: {}]   ;;  %s6660_s5 = inlined_call_operand.hbm [shape: bf16[8,64], index: 5, kind: input, shape index: {}]   ;;  %s6661_s6 = inlined_call_operand.hbm [shape: f32[1,64], index: 6, kind: input, shape index: {}]   ;;  %s6662_s7 = inlined_call_operand.vmem [shape: bf16[64,192], index: 7, kind: input, shape index: {}]   ;;  %s6663_s8 = inlined_call_operand.hbm [shape: f32[1,192], index: 8, kind: input, shape index: {}]   ;;  %s6664_s9 = inlined_call_operand.vmem [shape: bf16[64,128], index: 9, kind: input, shape index: {}]   ;;  %s6665_s10 = inlined_call_operand.hbm [shape: f32[1,128], index: 10, kind: input, shape index: {}]   ;;  %s6666_s11 = inlined_call_operand.vmem [shape: bf16[128,384], index: 11, kind: input, shape index: {}]   ;;  %s6667_s12 = inlined_call_operand.hbm [shape: f32[1,384], index: 12, kind: input, shape index: {}]   ;;  %s6668_s13 = inlined_call_operand.hbm [shape: bf16[128,256], index: 13, kind: input, shape index: {}]   ;;  %s6669_s14 = inlined_call_operand.vmem [shape: f32[1,256], index: 14, kind: input, shape index: {}]   ;;  %s6670_s15 = inlined_call_operand.hbm [shape: bf16[2,256,256], index: 15, kind: output, shape index: {0}]   ;;  %s6671_s16 = inlined_call_operand.hbm [shape: f32[2,1,256], index: 16, kind: output, shape index: {1}]  }
   0x1   :  { %6708 = sst [smem:[#allocation35_spill]] %s6655_s0 }
   0x2   :  { %6709 = sst [smem:[#allocation36_spill]] %s6658_s3 }
   0x3   :  { %6710 = sst [smem:[#allocation37_spill]] %s6660_s5 }
   0x4   :  { %22 = vsyncpa [#allocation4], 0 }
   0x5   :  { %23 = vsyncpa [#allocation7], 0 }
   0x6   :  { %24 = vsyncpa [#allocation10], 0 }
   0x7   :  { %25 = vsyncpa [#allocation13], 0 }
   0x8   :  { %26 = vsyncpa [#allocation16], 0 }
   0x9   :  { %27 = vsyncpa [#allocation5], 0 }
   0xa   :  { %29 = vsyncpa [#allocation5 + $0x1], 0 }
   0xb   :  { %30 = vsyncpa [#allocation20], 0 }
   0xc   :  { %32 = vsyncpa [#allocation20 + $0x1], 0  ;;  %s5072_s21 = smov 0   ;;  %s5074_s22 = smov 0  }
   0xd   :  { %s5076_s23 = smov 0   ;;  %s5078_s24 = smov 0  }
   0xe   :  { %s5080_s25 = smov 0   ;;  %s5082_s26 = smov 0  }
   0xf LB: > { %6711 = sst [smem:[#allocation28_spill]] %s4948_s21  ;;  %s3818_s27 = sadd.s32 4294967295, %s4968_s26   ;;  %s4968_s26 = sphi %s5082_s26, %s38_s26   ;;  %s4964_s25 = sphi %s5080_s25, %s6762_s25   ;;  %s4960_s24 = sphi %s5078_s24, %s6761_s24   ;;  %s4956_s23 = sphi %s5076_s23, %s6760_s23   ;;  %s4952_s22 = sphi %s5074_s22, %s6764_s22   ;;  %s4948_s21 = sphi %s5072_s21, %s6763_s21  }
  0x10   : > { %6712 = sst [smem:[#allocation29_spill]] %s4956_s23  ;;  %s3819_s28 = sadd.s32 4294967294, %s4968_s26  }
  0x11   : > { %6713 = sst [smem:[#allocation30_spill]] %s4964_s25  ;;  %s57_s29 = sadd.s32 1, %s4964_s25 }
  0x12   : > { %6714 = sst [smem:[#allocation31_spill]] %s4968_s26  ;;  %s392_s30 = sadd.s32 1, %s4956_s23 }
  0x13   : > { %p59_p0 = scmp.ge.s32.totalorder %s57_s29, 2  ;;  %p402_p1 = scmp.ne.s32.totalorder %s4956_s23, %s4952_s22 }
  0x14   : > { %p403_p2 = scmp.eq.s32.totalorder %s3818_s27, 1  ;;  %p408_p3 = scmp.ne.s32.totalorder %s4952_s22, %s4948_s21 }
  0x15   : > { %s6766_s29 = smov (%p59_p0, %s57_s29), 0  ;;  %p409_p5 = scmp.eq.s32.totalorder %s3819_s28, 1 }
  0x16   : > { %6715 = sst [smem:[#allocation32_spill]] %s6766_s29  ;;  %p5112_p4 = por %p403_p2, %p402_p1 }
  0x17   : > { %s387_s17 = ssub.s32 %s4964_s25, %s6766_s29  ;;  %p3820_p6 = scmp.ge.s32.totalorder %s4968_s26, 1 }
  0x18   : > { %s6716_s0 = scalar_select %p5112_p4, 1, 0 }
  0x19   : > { %p390_p7 = scmp.eq.s32.totalorder %s387_s17, 0  ;;  %p5119_p8 = por %p409_p5, %p408_p3 }
  0x1a   : > { %p444_p9 = scmp.lt.s32.totalorder %s4968_s26, 3  ;;  %p5131_p11 = scmp.eq.s32.totalorder %s3818_s27, 0 }
  0x1b   : > { %s6717_s18 = scalar_select %p5119_p8, 1, 0 }
  0x1c   : > { %s5125_s19 = scalar_select %p390_p7, %s4956_s23, %s392_s30  }
  0x1d   : > { %6718 = sst [smem:[#allocation33_spill]] %s6717_s18  ;;  %p5127_p10 = pnand %p3820_p6, %p444_p9 }
  0x1e   : > { %6719 = sst [smem:[#allocation34_spill]] %s5125_s19  ;;  %s4970_s28 = smov [#allocation6]  }
  0x1f   : > { %s6720_s20 = scalar_select %p5127_p10, 1, 0 }
  0x20   : > { %s6721_s21 = scalar_select %p5131_p11, 1, 0 }
  0x21   : > { %p4403_p12 = pneg %p5127_p10  ;;  %s471_s17 = sshll.u32 %s4970_s28, 4  ;;  %s472_s17 = int_to_ptr.vmem [resolvable:$true] %s471_s17 }
  0x22   : > { %s4971_s29 = smov [#allocation9]   ;;  %s4972_s19 = smov [#allocation12]  }
  0x23   : > { %s493_s25 = sshll.u32 %s4971_s29, 4  ;;  %p5139_p13 = pnand %p5131_p11, %p4403_p12  ;;  %s494_s25 = int_to_ptr.vmem [resolvable:$true] %s493_s25 }
  0x24   : > { %s518_s27 = sshll.u32 %s4972_s19, 4  ;;  %s4619_s18 = scalar_lea.vmem %s472_s17, 64  ;;  %s519_s27 = int_to_ptr.vmem [resolvable:$true] %s518_s27 }
  0x25   : > { %p5145_p0 = pneg %p5139_p13  ;;  %p4620_p1 = scmp.ne.s32.totalorder %s472_s17, %s4619_s18 }
  0x26   : > { %p4627_p5 = scmp.lt.s32.totalorder %s472_s17, %s472_s17  ;;  %p4628_p6 = scmp.lt.s32.totalorder %s4619_s18, %s4619_s18 }
  0x27   : > { %p4622_p2 = pnand %p4620_p1, %p5145_p0 }
  0x28   : > { %p4629_p7 = por %p4628_p6, %p4627_p5 }
  0x29   : > { %p4623_p3 = pneg %p4622_p2 }
  0x2b   : > { %p4630_p9 = pnand %p4629_p7, %p4623_p3 }
  0x2d   : > { %4633 = shalt.err (!%p4630_p9)
}
  0x2e   : > { %s6724_s3 = sld [smem:[#allocation36_spill]]  ;;  %s4645_s28 = scalar_lea.vmem %s494_s25, 64 }
  0x2f   : > { %p4646_p12 = scmp.ne.s32.totalorder %s494_s25, %s4645_s28  ;;  %p4653_p11 = scmp.lt.s32.totalorder %s494_s25, %s494_s25 }
  0x30   : > { %p4654_p1 = scmp.lt.s32.totalorder %s4645_s28, %s4645_s28 }
  0x31   : > { %p4648_p8 = pnand %p4646_p12, %p5145_p0 }
  0x32   : > { %p4655_p2 = por %p4654_p1, %p4653_p11 }
  0x33   : > { %p4649_p4 = pneg %p4648_p8 }
  0x34   : > { %4409 = dma.hbm_to_vmem [thread:$0]  (!%p5139_p13), %s6724_s3, 64, %s472_s17, [#allocation7]  }
  0x35   : > { %p4656_p10 = pnand %p4655_p2, %p4649_p4 }
  0x37   : > { %4659 = shalt.err (!%p4656_p10)
}
  0x38   : > { %s6725_s5 = sld [smem:[#allocation37_spill]]  ;;  %s4973_s29 = smov [#allocation15]  }
  0x39   : > { %s546_s17 = sshll.u32 %s4973_s29, 4  ;;  %s4671_s19 = scalar_lea.vmem %s519_s27, 32  ;;  %s547_s17 = int_to_ptr.vmem [resolvable:$true] %s546_s17 }
  0x3a   : > { %p4672_p3 = scmp.ne.s32.totalorder %s519_s27, %s4671_s19  ;;  %p4679_p6 = scmp.lt.s32.totalorder %s519_s27, %s519_s27 }
  0x3b   : > { %p4680_p7 = scmp.lt.s32.totalorder %s4671_s19, %s4671_s19 }
  0x3c   : > { %p4674_p5 = pnand %p4672_p3, %p5145_p0 }
  0x3d   : > { %p4681_p11 = por %p4680_p7, %p4679_p6 }
  0x3e   : > { %4415 = dma.hbm_to_vmem [thread:$0]  (!%p5139_p13), %s6725_s5, 64, %s494_s25, [#allocation10]  }
  0x3f   : > { %p4675_p8 = pneg %p4674_p5 }
  0x41   : > { %p4682_p4 = pnand %p4681_p11, %p4675_p8 }
  0x43   : > { %4685 = shalt.err (!%p4682_p4)
}
  0x44   : > { %4421 = dma.hbm_to_vmem [thread:$0]  (!%p5139_p13), %s6663_s8, 32, %s519_s27, [#allocation13]  }
  0x45   : > { %s4697_s25 = scalar_lea.vmem %s547_s17, 48  ;;  %s4704_s26 = scalar_lea.vmem %s547_s17, 64 }
  0x46   : > { %p4698_p10 = scmp.ne.s32.totalorder %s547_s17, %s4697_s25  ;;  %p4705_p1 = scmp.lt.s32.totalorder %s547_s17, %s547_s17 }
  0x47   : > { %p4706_p2 = scmp.lt.s32.totalorder %s4704_s26, %s4697_s25 }
  0x48   : > { %p4700_p9 = pnand %p4698_p10, %p5145_p0 }
  0x49   : > { %p4707_p3 = por %p4706_p2, %p4705_p1 }
  0x4a   : > { %p4701_p12 = pneg %p4700_p9 }
  0x4c   : > { %p4708_p5 = pnand %p4707_p3, %p4701_p12 }
  0x4e   : > { %4711 = shalt.err (!%p4708_p5)
}
  0x4f   : > { %4427 = dma.hbm_to_vmem [thread:$0]  (!%p5139_p13), %s6667_s12, 48, %s547_s17, [#allocation16]  }
  0x50   : > { %s4974_s3 = smov [#allocation3]   ;;  %s4975_s19 = smov [#allocation8]  }
  0x51   : > { %s460_s27 = sshll.u32 %s4974_s3, 4  ;;  %s482_s28 = sshll.u32 %s4975_s19, 4  ;;  %s461_s27 = int_to_ptr.vmem [resolvable:$true] %s460_s27  ;;  %s483_s28 = int_to_ptr.vmem [resolvable:$true] %s482_s28 }
  0x52   : > { %s4723_s5 = scalar_lea.vmem %s461_s27, 16  ;;  %s4730_s25 = scalar_lea.vmem %s461_s27, 32 }
  0x53   : > { %p4724_p8 = scmp.ne.s32.totalorder %s461_s27, %s4723_s5  ;;  %p4731_p11 = scmp.lt.s32.totalorder %s461_s27, %s461_s27 }
  0x54   : > { %p4732_p4 = scmp.lt.s32.totalorder %s4730_s25, %s4723_s5 }
  0x55   : > { %p4726_p6 = pnand %p4724_p8, %p5145_p0 }
  0x56   : > { %p4733_p10 = por %p4732_p4, %p4731_p11 }
  0x57   : > { %p4727_p7 = pneg %p4726_p6 }
  0x59   : > { %p4734_p9 = pnand %p4733_p10, %p4727_p7 }
  0x5b   : > { %4737 = shalt.err (!%p4734_p9)
}
  0x5c   : > { %4406 = dma.hbm_to_vmem [thread:$0]  (!%p5139_p13), %s6657_s2, 16, %s461_s27, [#allocation4]  }
  0x5d   : > { %s4749_s18 = scalar_lea.vmem %s483_s28, 16  ;;  %s4756_s29 = scalar_lea.vmem %s483_s28, 32 }
  0x5e   : > { %p4750_p12 = scmp.ne.s32.totalorder %s483_s28, %s4749_s18  ;;  %p4757_p3 = scmp.lt.s32.totalorder %s483_s28, %s483_s28 }
  0x5f   : > { %p4758_p5 = scmp.lt.s32.totalorder %s4756_s29, %s4749_s18 }
  0x60   : > { %p4752_p1 = pnand %p4750_p12, %p5145_p0 }
  0x61   : > { %p4759_p8 = por %p4758_p5, %p4757_p3 }
  0x62   : > { %p4753_p2 = pneg %p4752_p1 }
  0x64   : > { %p4760_p6 = pnand %p4759_p8, %p4753_p2 }
  0x66   : > { %4763 = shalt.err (!%p4760_p6)
}
  0x67   : > { %4412 = dma.hbm_to_vmem [thread:$0]  (!%p5139_p13), %s6659_s4, 16, %s483_s28, [#allocation7]  }
  0x68   : > { %s4976_s27 = smov [#allocation11]   ;;  %s4977_s25 = smov [#allocation14]  }
  0x69   : > { %s504_s19 = sshll.u32 %s4976_s27, 4  ;;  %s532_s26 = sshll.u32 %s4977_s25, 4  ;;  %s505_s19 = int_to_ptr.vmem [resolvable:$true] %s504_s19  ;;  %s533_s26 = int_to_ptr.vmem [resolvable:$true] %s532_s26 }
  0x6a   : > { %s4775_s17 = scalar_lea.vmem %s505_s19, 16  ;;  %s4782_s18 = scalar_lea.vmem %s505_s19, 32 }
  0x6b   : > { %p4776_p7 = scmp.ne.s32.totalorder %s505_s19, %s4775_s17  ;;  %p4783_p10 = scmp.lt.s32.totalorder %s505_s19, %s505_s19 }
  0x6c   : > { %p4784_p9 = scmp.lt.s32.totalorder %s4782_s18, %s4775_s17 }
  0x6d   : > { %p4778_p11 = pnand %p4776_p7, %p5145_p0 }
  0x6e   : > { %p4785_p12 = por %p4784_p9, %p4783_p10 }
  0x6f   : > { %p4779_p4 = pneg %p4778_p11 }
  0x71   : > { %p4786_p1 = pnand %p4785_p12, %p4779_p4 }
  0x73   : > { %4789 = shalt.err (!%p4786_p1)
}
  0x74   : > { %4418 = dma.hbm_to_vmem [thread:$0]  (!%p5139_p13), %s6661_s6, 16, %s505_s19, [#allocation10]  }
  0x75   : > { %s4801_s5 = scalar_lea.vmem %s533_s26, 16  ;;  %s4808_s3 = scalar_lea.vmem %s533_s26, 32 }
  0x76   : > { %p4802_p2 = scmp.ne.s32.totalorder %s533_s26, %s4801_s5  ;;  %p4809_p8 = scmp.lt.s32.totalorder %s533_s26, %s533_s26 }
  0x77   : > { %p4810_p6 = scmp.lt.s32.totalorder %s4808_s3, %s4801_s5 }
  0x78   : > { %p4804_p3 = pnand %p4802_p2, %p5145_p0 }
  0x79   : > { %p4811_p7 = por %p4810_p6, %p4809_p8 }
  0x7a   : > { %p4805_p5 = pneg %p4804_p3 }
  0x7c   : > { %p4812_p11 = pnand %p4811_p7, %p4805_p5 }
  0x7e   : > { %4815 = shalt.err (!%p4812_p11)
}
  0x7f   : > { %4424 = dma.hbm_to_vmem [thread:$0]  (!%p5139_p13), %s6665_s10, 16, %s533_s26, [#allocation13]  }
  0x80   : > { %s4978_s19 = smov [#allocation17]  }
  0x81   : > { %s556_s17 = sshll.u32 %s4978_s19, 4  ;;  %s557_s17 = int_to_ptr.vmem [resolvable:$true] %s556_s17 }
  0x82   : > { %s4827_s18 = scalar_lea.vmem %s557_s17, 2048  ;;  %p4835_p12 = scmp.lt.s32.totalorder %s557_s17, %s557_s17 }
  0x83   : > { %p4828_p4 = scmp.ne.s32.totalorder %s557_s17, %s4827_s18  ;;  %p4836_p1 = scmp.lt.s32.totalorder %s4827_s18, %s4827_s18 }
  0x85   : > { %p4830_p10 = pnand %p4828_p4, %p5145_p0  ;;  %p4837_p2 = por %p4836_p1, %p4835_p12 }
  0x87   : > { %p4831_p9 = pneg %p4830_p10 }
  0x89   : > { %p4838_p3 = pnand %p4837_p2, %p4831_p9 }
  0x8b   : > { %4841 = shalt.err (!%p4838_p3)
}
  0x8c   : > { %s4979_s29 = smov 128   ;;  %s4980_s28 = smov 8  }
  0x8d   : > { %4430 = dma.hbm_to_vmem [thread:$0]  (!%p5139_p13), %s6668_s13, 2048, %s557_s17, [#allocation16], %s4979_s29, %s4979_s29, %s4980_s28  }
  0x8e   : > { %p6726_p5 = scmp.ne.s32.totalorder %s6720_s20, 0 }
  0x8f   : > { %p6727_p8 = scmp.ne.s32.totalorder (!%p6726_p5), %s6721_s21, 0 }
  0x90   : > { %590 = sbr.rel (%p6726_p5) target bundleno = 1643 (0x66b), region = 80 }
  0x95   : > { %4919 = dma.done.wait (%p6727_p8), [#allocation4], 16  }
  0x96   : > { %4921 = vsyncadd (%p6727_p8), [#allocation4], 4294967280 }
  0x97   : > { %4923 = dma.done.wait (%p6727_p8), [#allocation7], 80  }
  0x98   : > { %4925 = vsyncadd (%p6727_p8), [#allocation7], 4294967216 }
  0x99   : > { %4927 = dma.done.wait (%p6727_p8), [#allocation10], 80  }
  0x9a   : > { %4929 = vsyncadd (%p6727_p8), [#allocation10], 4294967216 }
  0x9b   : > { %4931 = dma.done.wait (%p6727_p8), [#allocation13], 48  }
  0x9c   : > { %4933 = vsyncadd (%p6727_p8), [#allocation13], 4294967248 }
  0x9d   : > { %4935 = dma.done.wait (%p6727_p8), [#allocation16], 2096  }
  0x9e   : > { %4937 = vsyncadd (%p6727_p8), [#allocation16], 4294965200  ;;  %p684_p13 = scmp.lt.s32.totalorder %s4960_s24, 1  ;;  %vm867_vm0 = vcmask 1043456   ;;  %s6728_s27 = sld [smem:[#allocation35_spill]]  ;;  %vm818_vm1 = vcmask 64512  }
  0x9f   : > { %v730_v0 = vld [vmem:[%s6656_s1] sm:$0xf]  ;;  %v1252_v20 = vld [vmem:[#allocation9] sm:$0xf]  ;;  %v4536_v26 = vld [vmem:[%s6662_s7 + $0x30] ss:$8 sps:$4 sm:$0xff]  }
  0xa0   : > { %s685_s23 = scalar_select %p684_p13, %s4960_s24, 1  ;;  %4359 = vmatprep.subr.msk.bf16.mxu0 %vm867_vm0, %v730_v0  ;;  %v869_v1 = vsel %vm867_vm0, %v730_v0, 0  ;;  %v1032_v4 = vld [vmem:[#allocation6] sm:$0xf]  ;;  %v1309_v21 = vsel %vm867_vm0, %v1252_v20, 0  ;;  %vm1612_vm2 = vcmask 523264  }
  0xa1   : > { %4168 = vmatpush3.bf16.msra.mxu0 %v869_v1  ;;  %v1041_v5 = vsel %vm867_vm0, %v1032_v4, 0  ;;  %4361 = vmatprep.subr.msk.bf16.mxu1 %vm867_vm0, %v1032_v4  ;;  %v4538_v27 = vld [vmem:[%s6662_s7 + $0x34] ss:$8 sps:$4 sm:$0xff]   ;;  %v4541_v28 = vld [vmem:[%s6662_s7 + $0x24] ss:$8 sps:$4 sm:$0xff]   ;;  %s6077_s5 = sand.u32 1, %s4952_s22  }
  0xa2   : > { %s4037_s20 = sshll.u32 %s685_s23, 7  ;;  %4360 = vmatprep.subr.msk.bf16.mxu0 %vm867_vm0, %v1032_v4  ;;  %4358 = vmatpush3.bf16.msra.mxu1 %v1041_v5  ;;  %v4539_v30 = vld [vmem:[%s6662_s7 + $0x20] ss:$8 sps:$4 sm:$0xff]   ;;  %v4544_v32 = vld [vmem:[%s6662_s7 + $0x14] ss:$8 sps:$4 sm:$0xff]   ;;  %s3841_s3 = sshll.u32 %s6077_s5, 8 }
  0xa3   : > { %1669 = vmatprep.subr.bf16.mxu1 %v4538_v27  ;;  %v4542_v34 = vld [vmem:[%s6662_s7 + $0x10] ss:$8 sps:$4 sm:$0xff]   ;;  %v5349_v44 = vld [vmem:[#allocation3] ss:$0 sm:$0xff]  ;;  %s6098_s23 = scalar_lea.vmem [#allocation18], %s3841_s3  ;;  %s3577_s19 = scalar_lea.sflag [#allocation5], %s6077_s5 }
  0xa4   : > { %s5239_s25 = scalar_lea.vmem %s6728_s27, %s4037_s20  ;;  %s4070_s20 = sshll.u32 %s4960_s24, 12 }
  0xa5   : > { %v4520_v2 = vld [vmem:[%s5239_s25] sm:$0xff]   ;;  %v4521_v3 = vld [vmem:[%s5239_s25 + $0x8] sm:$0xff]   ;;  %v4522_v6 = vld [vmem:[%s5239_s25 + $0x10] sm:$0xff]   ;;  %s3599_s30 = sshll.u32 %s6098_s23, 4  ;;  %p6753_p6 = scmp.ne.s32.totalorder %s6716_s0, 0  ;;  %s6587_s30 = int_to_ptr.vmem [resolvable:$true] %s3599_s30 }
  0xa6   : > { %4169 = vmatprep.mubr.msk.bf16.mxu0 %vm818_vm1, %v4520_v2  ;;  %v4523_v7 = vld [vmem:[%s5239_s25 + $0x18] sm:$0xff]   ;;  %v4524_v8 = vld [vmem:[%s5239_s25 + $0x20] sm:$0xff]   ;;  %v4529_v10 = vld [vmem:[%s5239_s25 + $0x48] sm:$0xff]   ;;  %s4842_s17 = scalar_lea.vmem %s6587_s30, 4096  ;;  %s4982_s21 = smov [#allocation18]  }
  0xa7   : > { %4170 = vmatmul.mubr.msk.bf16.vlgmr.msra.gmra.mxu0 %vm818_vm1, %v4521_v3  ;;  %v4528_v9 = vld [vmem:[%s5239_s25 + $0x40] sm:$0xff]   ;;  %v4530_v11 = vld [vmem:[%s5239_s25 + $0x50] sm:$0xff]   ;;  %v4525_v12 = vld [vmem:[%s5239_s25 + $0x28] sm:$0xff]   ;;  %p4843_p0 = scmp.ne.s32.totalorder %s6587_s30, %s4842_s17  ;;  %s4846_s18 = sshll.u32 %s4982_s21, 4  ;;  %s4847_s18 = int_to_ptr.vmem [resolvable:$false] %s4846_s18 }
  0xa8   : > { %4202 = vmatpush3.bf16.msra.mxu0 %v1041_v5  ;;  %4173 = vmatprep.mubr.msk.bf16.mxu0 %vm818_vm1, %v4522_v6  ;;  %v4526_v13 = vld [vmem:[%s5239_s25 + $0x30] sm:$0xff]   ;;  %v4531_v14 = vld [vmem:[%s5239_s25 + $0x58] sm:$0xff]   ;;  %v4532_v15 = vld [vmem:[%s5239_s25 + $0x60] sm:$0xff]   ;;  %s4848_s29 = scalar_lea.vmem %s4847_s18, 8192  ;;  %p4849_p4 = scmp.lt.s32.totalorder %s6587_s30, %s4847_s18 }
  0xa9   : > { %4219 = vmatprep.mubr.msk.bf16.mxu1 %vm818_vm1, %v4528_v9  ;;  %v4527_v16 = vld [vmem:[%s5239_s25 + $0x38] sm:$0xff]   ;;  %v4533_v17 = vld [vmem:[%s5239_s25 + $0x68] sm:$0xff]   ;;  %v4534_v18 = vld [vmem:[%s5239_s25 + $0x70] sm:$0xff]   ;;  %4362 = vmatprep.subr.msk.bf16.mxu0 %vm867_vm0, %v1252_v20  ;;  %p4844_p7 = pnand %p4843_p0, %p6753_p6  ;;  %p4850_p10 = scmp.lt.s32.totalorder %s4848_s29, %s4842_s17 }
  0xaa   : > { %4220 = vmatmul.mubr.msk.bf16.vlgmr.msra.gmra.mxu1 %vm818_vm1, %v4529_v10  ;;  %v4535_v19 = vld [vmem:[%s5239_s25 + $0x78] sm:$0xff]   ;;  %s6585_s25 = scalar_lea.hbm %s6670_s15, %s4070_s20 }
  0xab   : > { %4223 = vmatprep.mubr.msk.bf16.mxu1 %vm818_vm1, %v4530_v11  ;;  %1670 = vmatpush1.bf16.msra.mxu1 %v4536_v26  ;;  %p4845_p11 = pneg %p4844_p7  ;;  %p4851_p9 = por %p4850_p10, %p4849_p4 }
  0xac   : > { %1671 = vmatprep.subr.bf16.mxu1 %v4541_v28 }
  0xad   : > { %p4852_p12 = pnand %p4851_p9, %p4845_p11 }
  0xaf   : > { %4174 = vmatmul.mubr.msk.bf16.gmra.mxu0 %vm818_vm1, %v4523_v7  ;;  %1672 = vmatpush1.bf16.msra.mxu1 %v4539_v30 }
  0xb0   : > { %4177 = vmatprep.mubr.msk.bf16.mxu0 %vm818_vm1, %v4524_v8  ;;  %1673 = vmatprep.subr.bf16.mxu1 %v4544_v32 }
  0xb2   : > { %4224 = vmatmul.mubr.msk.bf16.gmra.mxu1 %vm818_vm1, %v4531_v14 }
  0xb3   : > { %4227 = vmatprep.mubr.msk.bf16.mxu1 %vm818_vm1, %v4532_v15  ;;  %1674 = vmatpush1.bf16.msra.mxu1 %v4542_v34 }
  0xb7   : > { %4178 = vmatmul.mubr.msk.bf16.gmra.mxu0 %vm818_vm1, %v4525_v12 }
  0xb8   : > { %4181 = vmatprep.mubr.msk.bf16.mxu0 %vm818_vm1, %v4526_v13 }
  0xba   : > { %4228 = vmatmul.mubr.msk.bf16.gmra.mxu1 %vm818_vm1, %v4533_v17 }
  0xbb   : > { %4231 = vmatprep.mubr.msk.bf16.mxu1 %vm818_vm1, %v4534_v18 }
  0xbf   : > { %4182 = vmatmul.mubr.msk.bf16.gmra.mxu0 %vm818_vm1, %v4527_v16 }
  0xc0   : > { %4185 = vmatprep.mubr.msk.bf16.mxu0 %vm818_vm1, %v4528_v9 }
  0xc2   : > { %4232 = vmatmul.mubr.msk.bf16.gmra.mxu1 %vm818_vm1, %v4535_v19 }
  0xc7   : > { %4186 = vmatmul.mubr.msk.bf16.gmra.mxu0 %vm818_vm1, %v4529_v10 }
  0xc8   : > { %4189 = vmatprep.mubr.msk.bf16.mxu0 %vm818_vm1, %v4530_v11 }
  0xcf   : > { %4190 = vmatmul.mubr.msk.bf16.gmra.mxu0 %vm818_vm1, %v4531_v14 }
  0xd0   : > { %4193 = vmatprep.mubr.msk.bf16.mxu0 %vm818_vm1, %v4532_v15  ;;  %v5401_v15 = vld [vmem:[#allocation8] ss:$0 sm:$0xff] }
  0xd7   : > { %4194 = vmatmul.mubr.msk.bf16.gmra.mxu0 %vm818_vm1, %v4533_v17 }
  0xd8   : > { %4197 = vmatprep.mubr.msk.bf16.mxu0 %vm818_vm1, %v4534_v18 }
  0xdf   : > { %4198 = vmatmul.mubr.msk.bf16.gmra.mxu0 %vm818_vm1, %v4535_v19 }
  0xe0   : > { %4203 = vmatprep.mubr.msk.bf16.mxu0 %vm818_vm1, %v4520_v2 }
  0xe7   : > { %4204 = vmatmul.mubr.msk.bf16.vlgmr.msra.gmra.mxu0 %vm818_vm1, %v4521_v3 }
  0xe8   : > { %4207 = vmatprep.mubr.msk.bf16.mxu0 %vm818_vm1, %v4522_v6  ;;  %4236 = vmatpush3.bf16.msra.mxu0 %v1309_v21 }
  0xef   : > { %4208 = vmatmul.mubr.msk.bf16.gmra.mxu0 %vm818_vm1, %v4523_v7 }
  0xf0   : > { %4211 = vmatprep.mubr.msk.bf16.mxu0 %vm818_vm1, %v4524_v8 }
  0xf7   : > { %4212 = vmatmul.mubr.msk.bf16.gmra.mxu0 %vm818_vm1, %v4525_v12 }
  0xf8   : > { %4215 = vmatprep.mubr.msk.bf16.mxu0 %vm818_vm1, %v4526_v13 }
  0xff   : > { %4216 = vmatmul.mubr.msk.bf16.gmra.mxu0 %vm818_vm1, %v4527_v16 }
 0x167   : > { %v5299_v22 = vpop.f32.mrf.mxu0 }
 0x169   : > { %v5301_v23 = vpop.f32.mrf.mxu0 }
 0x16a   : > { %v5379_v0 = vpop.f32.mrf.mxu1 }
 0x16b   : > { %v5303_v24 = vpop.f32.mrf.mxu0 }
 0x16c   : > { %v5386_v4 = vpop.f32.mrf.mxu1 }
 0x16d   : > { %v5305_v25 = vpop.f32.mrf.mxu0 }
 0x16e   : > { %v5394_v9 = vpop.f32.mrf.mxu1 }
 0x16f   : > { %v5316_v29 = vpop.f32.mrf.mxu0 }
 0x170   : > { %v1144_v13 = vpop.f32.mrf.mxu1 }
 0x171   : > { %v5321_v31 = vpop.f32.mrf.mxu0 }
 0x172   : > { %v5403_v17 = vpop.f32.mrf.mxu1 }
 0x173   : > { %v5326_v33 = vpop.f32.mrf.mxu0 }
 0x174   : > { %v5409_v30 = vpop.f32.mrf.mxu1 }
 0x175   : > { %v5331_v35 = vpop.f32.mrf.mxu0 }
 0x177   : > { %v5333_v36 = vpop.f32.mrf.mxu0 }
 0x179   : > { %v5335_v37 = vpop.f32.mrf.mxu0 }
 0x17b   : > { %v5337_v38 = vpop.f32.mrf.mxu0 }
 0x17d   : > { %v5339_v39 = vpop.f32.mrf.mxu0 }
 0x17f   : > { %v5341_v40 = vpop.f32.mrf.mxu0 }
 0x181   : > { %v5343_v41 = vpop.f32.mrf.mxu0 }
 0x183   : > { %v5345_v42 = vpop.f32.mrf.mxu0 }
 0x185   : > { %v5347_v43 = vpop.f32.mrf.mxu0 }
 0x187   : > { %v4187_v45 = vpop.f32.mrf.mxu0 }
 0x188   : > { %v5352_v46 = vadd.f32 %v4187_v45, %v5349_v44 }
 0x189   : > { %v969_v47 = vpop.f32.mrf.mxu0 }
 0x18a   : > { %v5355_v48 = vadd.f32 %v5349_v44, %v969_v47 }
 0x18b   : > { %v4188_v49 = vpop.f32.mrf.mxu0 }
 0x18c   : > { %v5358_v50 = vadd.f32 %v4188_v49, %v5349_v44 }
 0x18d   : > { %v5360_v51 = vpop.f32.mrf.mxu0 }
 0x18f   : > { %v4191_v52 = vpop.f32.mrf.mxu0 }
 0x190   : > { %v5363_v53 = vadd.f32 %v4191_v52, %v5349_v44 }
 0x191   : > { %v985_v54 = vpop.f32.mrf.mxu0 }
 0x192   : > { %v5366_v55 = vadd.f32 %v5349_v44, %v985_v54 }
 0x193   : > { %v4192_v56 = vpop.f32.mrf.mxu0 }
 0x194   : > { %v5369_v57 = vadd.f32 %v4192_v56, %v5349_v44 }
 0x195   : > { %v5371_v58 = vpop.f32.mrf.mxu0 }
 0x197   : > { %v4195_v59 = vpop.f32.mrf.mxu0 }
 0x198   : > { %v5374_v60 = vadd.f32 %v4195_v59, %v5349_v44 }
 0x199   : > { %v1001_v61 = vpop.f32.mrf.mxu0 }
 0x19a   : > { %v5377_v62 = vadd.f32 %v5349_v44, %v1001_v61  ;;  %v5413_v61 = vpop.f32.mrf.mxu1 }
 0x19b   : > { %v4196_v63 = vpop.f32.mrf.mxu0 }
 0x19c   : > { %v5382_v1 = vadd.f32 %v4196_v63, %v5349_v44 }
 0x19d   : > { %v5384_v2 = vpop.f32.mrf.mxu0 }
 0x19f   : > { %v4199_v3 = vpop.f32.mrf.mxu0 }
 0x1a0   : > { %v5389_v5 = vadd.f32 %v4199_v3, %v5349_v44 }
 0x1a1   : > { %v1017_v6 = vpop.f32.mrf.mxu0 }
 0x1a2   : > { %v5392_v7 = vadd.f32 %v5349_v44, %v1017_v6 }
 0x1a3   : > { %v4200_v8 = vpop.f32.mrf.mxu0 }
 0x1a4   : > { %v5397_v10 = vadd.f32 %v4200_v8, %v5349_v44 }
 0x1a5   : > { %v5399_v11 = vpop.f32.mrf.mxu0 }
 0x1a7   : > { %v4205_v12 = vpop.f32.mrf.mxu0 }
 0x1a8   : > { %v1086_v20 = vadd.f32 %v4205_v12, %v5401_v15 }
 0x1a9   : > { %v1077_v14 = vpop.f32.mrf.mxu0 }
 0x1aa   : > { %v1078_v18 = vadd.f32 %v5401_v15, %v1077_v14  ;;  %v1206_v45 = vmax.f32 %v1086_v20, 0.0 }
 0x1ab   : > { %v4206_v16 = vpop.f32.mrf.mxu0 }
 0x1ac   : > { %v1089_v19 = vadd.f32 %v4206_v16, %v5401_v15  ;;  %v1204_v32 = vmax.f32 %v1078_v18, 0.0  ;;  %v1160_v18 = vpop.f32.mrf.mxu1 }
 0x1ad   : > { %v1080_v21 = vpop.f32.mrf.mxu0 }
 0x1ae   : > { %v1081_v26 = vadd.f32 %v5401_v15, %v1080_v21  ;;  %v1207_v27 = vmax.f32 %v1089_v19, 0.0 }
 0x1af   : > { %v4209_v28 = vpop.f32.mrf.mxu0 }
 0x1b0   : > { %v1205_v34 = vmax.f32 %v1081_v26, 0.0  ;;  %v1102_v47 = vadd.f32 %v4209_v28, %v5401_v15  ;;  %v1237_v56 = vpack.c.bf16 %v1207_v27, %v1206_v45 }
 0x1b1   : > { %v1093_v49 = vpop.f32.mrf.mxu0 }
 0x1b2   : > { %v1236_v52 = vpack.c.bf16 %v1205_v34, %v1204_v32  ;;  %v1094_v54 = vadd.f32 %v5401_v15, %v1093_v49  ;;  %v1210_v3 = vmax.f32 %v1102_v47, 0.0  ;;  %v5421_v34 = vpop.f32.mrf.mxu1 }
 0x1b3   : > { %v4210_v59 = vpop.f32.mrf.mxu0 }
 0x1b4   : > { %v1105_v63 = vadd.f32 %v4210_v59, %v5401_v15  ;;  %4237 = vmatprep.mubr.msk.bf16.mxu0 %vm818_vm1, %v1236_v52  ;;  %v1208_v8 = vmax.f32 %v1094_v54, 0.0 }
 0x1b5   : > { %v1096_v6 = vpop.f32.mrf.mxu0  ;;  %4238 = vmatmul.mubr.msk.bf16.vlgmr.msra.gmra.mxu0 %vm818_vm1, %v1237_v56 }
 0x1b6   : > { %v1211_v12 = vmax.f32 %v1105_v63, 0.0  ;;  %v1097_v14 = vadd.f32 %v5401_v15, %v1096_v6  ;;  %v1173_v63 = vpop.f32.mrf.mxu1 }
 0x1b7   : > { %v4213_v16 = vpop.f32.mrf.mxu0 }
 0x1b8   : > { %v1209_v19 = vmax.f32 %v1097_v14, 0.0  ;;  %v1239_v20 = vpack.c.bf16 %v1211_v12, %v1210_v3  ;;  %v1118_v21 = vadd.f32 %v4213_v16, %v5401_v15  ;;  %v1142_v14 = vadd.f32 %v5401_v15, %v5386_v4 }
 0x1b9   : > { %v1109_v26 = vpop.f32.mrf.mxu0 }
 0x1ba   : > { %v1238_v27 = vpack.c.bf16 %v1209_v19, %v1208_v8  ;;  %v1110_v28 = vadd.f32 %v5401_v15, %v1109_v26  ;;  %v1214_v47 = vmax.f32 %v1118_v21, 0.0  ;;  %v1145_v21 = vadd.f32 %v5401_v15, %v1144_v13  ;;  %v4230_v26 = vpop.f32.mrf.mxu1 }
 0x1bb   : > { %v4214_v32 = vpop.f32.mrf.mxu0  ;;  %v1150_v13 = vadd.f32 %v5379_v0, %v5401_v15 }
 0x1bc   : > { %v1121_v45 = vadd.f32 %v4214_v32, %v5401_v15  ;;  %4241 = vmatprep.mubr.msk.bf16.mxu0 %vm818_vm1, %v1238_v27  ;;  %v1212_v52 = vmax.f32 %v1110_v28, 0.0 }
 0x1bd   : > { %v1112_v49 = vpop.f32.mrf.mxu0  ;;  %4242 = vmatmul.mubr.msk.bf16.gmra.mxu0 %vm818_vm1, %v1239_v20 }
 0x1be   : > { %v1215_v54 = vmax.f32 %v1121_v45, 0.0  ;;  %v1113_v56 = vadd.f32 %v5401_v15, %v1112_v49  ;;  %v1220_v45 = vmax.f32 %v1142_v14, 0.0  ;;  %v1161_v14 = vadd.f32 %v5401_v15, %v1160_v18 }
 0x1bf   : > { %v4217_v59 = vpop.f32.mrf.mxu0 }
 0x1c0   : > { %v1213_v3 = vmax.f32 %v1113_v56, 0.0  ;;  %v1241_v6 = vpack.c.bf16 %v1215_v54, %v1214_v47  ;;  %v1134_v8 = vadd.f32 %v4217_v59, %v5401_v15  ;;  %v1176_v54 = vpop.f32.mrf.mxu1  ;;  %v1225_v0 = vmax.f32 %v1161_v14, 0.0 }
 0x1c1   : > { %v1125_v12 = vpop.f32.mrf.mxu0 }
 0x1c2   : > { %v1240_v16 = vpack.c.bf16 %v1213_v3, %v1212_v52  ;;  %v1126_v19 = vadd.f32 %v5401_v15, %v1125_v12  ;;  %v1218_v28 = vmax.f32 %v1134_v8, 0.0  ;;  %v1221_v52 = vmax.f32 %v1145_v21, 0.0 }
 0x1c3   : > { %v4218_v20 = vpop.f32.mrf.mxu0  ;;  %v1153_v3 = vadd.f32 %v5394_v9, %v5401_v15 }
 0x1c4   : > { %v1137_v27 = vadd.f32 %v4218_v20, %v5401_v15  ;;  %4245 = vmatprep.mubr.msk.bf16.mxu0 %vm818_vm1, %v1240_v16  ;;  %v1216_v47 = vmax.f32 %v1126_v19, 0.0  ;;  %v1244_v8 = vpack.c.bf16 %v1221_v52, %v1220_v45  ;;  %v4233_v16 = vpop.f32.mrf.mxu1  ;;  %v1222_v19 = vmax.f32 %v1150_v13, 0.0 }
 0x1c5   : > { %v1128_v32 = vpop.f32.mrf.mxu0  ;;  %4246 = vmatmul.mubr.msk.bf16.gmra.mxu0 %vm818_vm1, %v1241_v6  ;;  %v1158_v6 = vadd.f32 %v5401_v15, %v5409_v30  ;;  %v1223_v21 = vmax.f32 %v1153_v3, 0.0  ;;  %v1169_v30 = vadd.f32 %v5413_v61, %v5401_v15  ;;  %v1177_v45 = vadd.f32 %v5401_v15, %v1176_v54 }
 0x1c6   : > { %v1219_v49 = vmax.f32 %v1137_v27, 0.0  ;;  %v1129_v4 = vadd.f32 %v5401_v15, %v1128_v32  ;;  %v1189_v27 = vpop.f32.mrf.mxu1  ;;  %v1174_v32 = vadd.f32 %v5401_v15, %v1173_v63  ;;  %v1185_v61 = vadd.f32 %v4230_v26, %v5401_v15 }
 0x1c7   : > { %v1224_v20 = vmax.f32 %v1158_v6, 0.0  ;;  %v1245_v9 = vpack.c.bf16 %v1223_v21, %v1222_v19  ;;  %v1190_v63 = vadd.f32 %v5401_v15, %v1189_v27  ;;  %v1198_v21 = vadd.f32 %v4233_v16, %v5401_v15  ;;  %v4545_v16 = vld [vmem:[%s6662_s7] ss:$8 sps:$4 sm:$0xff]  }
 0x1c8   : > { %v1217_v56 = vmax.f32 %v1129_v4, 0.0  ;;  %v1243_v59 = vpack.c.bf16 %v1219_v49, %v1218_v28  ;;  %v1166_v28 = vadd.f32 %v5403_v17, %v5401_v15  ;;  %v1227_v4 = vmax.f32 %v1169_v30, 0.0 }
 0x1c9   : > { %v1246_v18 = vpack.c.bf16 %v1225_v0, %v1224_v20  ;;  %v1228_v52 = vmax.f32 %v1174_v32, 0.0  ;;  %v1182_v17 = vadd.f32 %v5421_v34, %v5401_v15  ;;  %v1232_v6 = vmax.f32 %v1190_v63, 0.0  ;;  %v4548_v63 = vld [vmem:[%s6664_s9 + $0x18] sm:$0xff]  }
 0x1ca   : > { %v1242_v12 = vpack.c.bf16 %v1217_v56, %v1216_v47  ;;  %v4234_v47 = vpop.f32.mrf.mxu1  ;;  %v1226_v49 = vmax.f32 %v1166_v28, 0.0  ;;  %v1229_v56 = vmax.f32 %v1177_v45, 0.0  ;;  %v1234_v26 = vmax.f32 %v1198_v21, 0.0  ;;  %v5473_v28 = vld [vmem:[#allocation11] ss:$0 sm:$0xff]  ;;  %4269 = vmatprep.subr.bf16.mxu0 %v4548_v63 }
 0x1cb   : > { %v1201_v34 = vadd.f32 %v4234_v47, %v5401_v15  ;;  %v914_v45 = vadd.f32 %v5299_v22, %v5349_v44  ;;  %4270 = vmatpush3.bf16.msra.mxu0 %v4548_v63 }
 0x1cc   : > { %4249 = vmatprep.mubr.msk.bf16.mxu0 %vm818_vm1, %v1242_v12  ;;  %v1247_v13 = vpack.c.bf16 %v1227_v4, %v1226_v49  ;;  %v1248_v3 = vpack.c.bf16 %v1229_v56, %v1228_v52  ;;  %v1230_v12 = vmax.f32 %v1182_v17, 0.0  ;;  %v906_v4 = vadd.f32 %v5349_v44, %v5301_v23  ;;  %v4549_v23 = vld [vmem:[%s6664_s9 + $0x10] sm:$0xff]  }
 0x1cd   : > { %4250 = vmatmul.mubr.msk.bf16.gmra.mxu0 %vm818_vm1, %v1243_v59  ;;  %v1192_v59 = vpop.f32.mrf.mxu1  ;;  %v1235_v0 = vmax.f32 %v1201_v34, 0.0  ;;  %v917_v52 = vadd.f32 %v5303_v24, %v5349_v44  ;;  %v909_v17 = vadd.f32 %v5349_v44, %v5305_v25  ;;  %4271 = vmatprep.subr.bf16.mxu0 %v4549_v23 }
 0x1ce   : > { %4253 = vmatprep.mubr.msk.bf16.mxu0 %vm818_vm1, %v1244_v8  ;;  %v1193_v54 = vadd.f32 %v5401_v15, %v1192_v59  ;;  %v1231_v8 = vmax.f32 %v1185_v61, 0.0  ;;  %v4981_v15 = vmov 0  }
 0x1cf   : > { %v1251_v27 = vpack.c.bf16 %v1235_v0, %v1234_v26  ;;  %1693 = vmatprep.mubr.bf16.mxu1 %v4981_v15  ;;  %v933_v0 = vadd.f32 %v5326_v33, %v5349_v44  ;;  %4272 = vmatpush3.bf16.msra.mxu0 %v4549_v23 }
 0x1d0   : > { %v1233_v14 = vmax.f32 %v1193_v54, 0.0  ;;  %v1249_v19 = vpack.c.bf16 %v1231_v8, %v1230_v12 }
 0x1d2   : > { %v1250_v20 = vpack.c.bf16 %v1233_v14, %v1232_v6  ;;  %v930_v14 = vadd.f32 %v5316_v29, %v5349_v44 }
 0x1d5   : > { %4254 = vmatmul.mubr.msk.bf16.gmra.mxu0 %vm818_vm1, %v1245_v9  ;;  %v4547_v9 = vld [vmem:[%s6662_s7 + $0x4] ss:$8 sps:$4 sm:$0xff]  }
 0x1d6   : > { %4257 = vmatprep.mubr.msk.bf16.mxu0 %vm818_vm1, %v1246_v18  ;;  %1675 = vmatprep.subr.bf16.mxu1 %v4547_v9 }
 0x1d7   : > { %1676 = vmatpush1.bf16.msra.mxu1 %v4545_v16 }
 0x1dd   : > { %4258 = vmatmul.mubr.msk.bf16.gmra.mxu0 %vm818_vm1, %v1247_v13 }
 0x1de   : > { %4261 = vmatprep.mubr.msk.bf16.mxu0 %vm818_vm1, %v1248_v3 }
 0x1e5   : > { %4262 = vmatmul.mubr.msk.bf16.gmra.mxu0 %vm818_vm1, %v1249_v19 }
 0x1e6   : > { %4265 = vmatprep.mubr.msk.bf16.mxu0 %vm818_vm1, %v1250_v20  ;;  %v4550_v20 = vld [vmem:[%s6664_s9 + $0x8] sm:$0xff]  }
 0x1e7   : > { %4273 = vmatprep.subr.bf16.mxu0 %v4550_v20 }
 0x1e8   : > { %4274 = vmatpush3.bf16.msra.mxu0 %v4550_v20 }
 0x1ed   : > { %4266 = vmatmul.mubr.msk.bf16.gmra.mxu0 %vm818_vm1, %v1251_v27 }
 0x275   : > { %v4239_v30 = vpop.f32.mrf.mxu0 }
 0x276   : > { %v1354_v18 = vadd.f32 %v4239_v30, %v5473_v28 }
 0x277   : > { %v1345_v32 = vpop.f32.mrf.mxu0 }
 0x278   : > { %v1346_v47 = vadd.f32 %v5473_v28, %v1345_v32  ;;  %v1474_v56 = vadd.f32 %v1354_v18, %v914_v45 }
 0x279   : > { %v4240_v49 = vpop.f32.mrf.mxu0 }
 0x27a   : > { %v1357_v59 = vadd.f32 %v4240_v49, %v5473_v28  ;;  %v1472_v61 = vadd.f32 %v1346_v47, %v906_v4  ;;  %v1506_v54 = vmax.f32 %v1474_v56, 0.0  ;;  %v925_v4 = vadd.f32 %v5349_v44, %v5331_v35 }
 0x27b   : > { %v1348_v13 = vpop.f32.mrf.mxu0 }
 0x27c   : > { %v1475_v3 = vadd.f32 %v1357_v59, %v917_v52  ;;  %v1349_v22 = vadd.f32 %v5473_v28, %v1348_v13  ;;  %v1504_v19 = vmax.f32 %v1472_v61, 0.0  ;;  %v946_v52 = vadd.f32 %v5333_v36, %v5349_v44 }
 0x27d   : > { %v4243_v24 = vpop.f32.mrf.mxu0  ;;  %v922_v13 = vadd.f32 %v5349_v44, %v5321_v31  ;;  %v949_v61 = vadd.f32 %v5337_v38, %v5349_v44  ;;  %v962_v38 = vadd.f32 %v5341_v40, %v5349_v44 }
 0x27e   : > { %v1507_v12 = vmax.f32 %v1475_v3, 0.0  ;;  %v1473_v8 = vadd.f32 %v1349_v22, %v909_v17  ;;  %v1370_v6 = vadd.f32 %v4243_v24, %v5473_v28 }
 0x27f   : > { %v1361_v25 = vpop.f32.mrf.mxu0 }
 0x280   : > { %v1537_v21 = vpack.c.bf16 %v1507_v12, %v1506_v54  ;;  %v1505_v34 = vmax.f32 %v1473_v8, 0.0  ;;  %v1478_v9 = vadd.f32 %v1370_v6, %v930_v14  ;;  %v1362_v56 = vadd.f32 %v5473_v28, %v1361_v25 }
 0x281   : > { %v4244_v26 = vpop.f32.mrf.mxu0 }
 0x282   : > { %v1536_v27 = vpack.c.bf16 %v1505_v34, %v1504_v19  ;;  %v1373_v16 = vadd.f32 %v4244_v26, %v5473_v28  ;;  %v1510_v32 = vmax.f32 %v1478_v9, 0.0  ;;  %v1476_v24 = vadd.f32 %v1362_v56, %v922_v13 }
 0x283   : > { %v1364_v30 = vpop.f32.mrf.mxu0 }
 0x284   : > { %v1479_v29 = vadd.f32 %v1373_v16, %v933_v0  ;;  %3920 = vmatmul.mubr.msk.bf16.vlgmr.msra.gmra.mxu1 %vm1612_vm2, %v1536_v27  ;;  %v1365_v47 = vadd.f32 %v5473_v28, %v1364_v30  ;;  %v1508_v25 = vmax.f32 %v1476_v24, 0.0 }
 0x285   : > { %v4247_v18 = vpop.f32.mrf.mxu0  ;;  %1703 = vmatprep.mubr.bf16.mxu1 %v4981_v15 }
 0x286   : > { %v1511_v45 = vmax.f32 %v1479_v29, 0.0  ;;  %v1386_v49 = vadd.f32 %v4247_v18, %v5473_v28  ;;  %v1477_v3 = vadd.f32 %v1365_v47, %v925_v4  ;;  %v938_v4 = vadd.f32 %v5349_v44, %v5335_v37 }
 0x287   : > { %v1377_v33 = vpop.f32.mrf.mxu0 }
 0x288   : > { %v1539_v59 = vpack.c.bf16 %v1511_v45, %v1510_v32  ;;  %v1482_v22 = vadd.f32 %v1386_v49, %v946_v52  ;;  %v1509_v54 = vmax.f32 %v1477_v3, 0.0  ;;  %v1378_v18 = vadd.f32 %v5473_v28, %v1377_v33 }
 0x289   : > { %v4248_v17 = vpop.f32.mrf.mxu0  ;;  %v973_v33 = vadd.f32 %v5349_v44, %v5360_v51 }
 0x28a   : > { %v1389_v63 = vadd.f32 %v4248_v17, %v5473_v28  ;;  %v1514_v12 = vmax.f32 %v1482_v22, 0.0  ;;  %v1538_v34 = vpack.c.bf16 %v1509_v54, %v1508_v25 }
 0x28b   : > { %v1380_v23 = vpop.f32.mrf.mxu0 }
 0x28c   : > { %v1483_v35 = vadd.f32 %v1389_v63, %v949_v61  ;;  %3921 = vmatmul.mubr.msk.bf16.gmra.mxu1 %vm1612_vm2, %v1537_v21  ;;  %v965_v21 = vadd.f32 %v5345_v42, %v5349_v44  ;;  %v1381_v9 = vadd.f32 %v5473_v28, %v1380_v23  ;;  %v941_v42 = vadd.f32 %v5349_v44, %v5339_v39 }
 0x28d   : > { %v4251_v36 = vpop.f32.mrf.mxu0  ;;  %1713 = vmatprep.mubr.bf16.mxu1 %v4981_v15  ;;  %v1480_v61 = vadd.f32 %v1378_v18, %v938_v4 }
 0x28e   : > { %v1515_v8 = vmax.f32 %v1483_v35, 0.0  ;;  %v1402_v31 = vadd.f32 %v4251_v36, %v5473_v28  ;;  %v1481_v52 = vadd.f32 %v1381_v9, %v941_v42 }
 0x28f   : > { %v5519_v6 = vpop.f32.mrf.mxu0  ;;  %v1512_v35 = vmax.f32 %v1480_v61, 0.0 }
 0x290   : > { %v5523_v14 = vpack.c.bf16 %v1515_v8, %v1514_v12  ;;  %v1486_v20 = vadd.f32 %v1402_v31, %v962_v38  ;;  %v1513_v22 = vmax.f32 %v1481_v52, 0.0 }
 0x291   : > { %v4252_v19 = vpop.f32.mrf.mxu0 }
 0x292   : > { %v1405_v26 = vadd.f32 %v4252_v19, %v5473_v28  ;;  %v1518_v40 = vmax.f32 %v1486_v20, 0.0  ;;  %v1540_v31 = vpack.c.bf16 %v1513_v22, %v1512_v35 }
 0x293   : > { %v1396_v0 = vpop.f32.mrf.mxu0 }
 0x294   : > { %v1487_v27 = vadd.f32 %v1405_v26, %v965_v21  ;;  %3922 = vmatmul.mubr.msk.bf16.gmra.mxu1 %vm1612_vm2, %v1538_v34  ;;  %v989_v34 = vadd.f32 %v5349_v44, %v5371_v58 }
 0x295   : > { %v4255_v16 = vpop.f32.mrf.mxu0  ;;  %1723 = vmatprep.mubr.bf16.mxu1 %v4981_v15 }
 0x296   : > { %v1519_v30 = vmax.f32 %v1487_v27, 0.0  ;;  %v1418_v29 = vadd.f32 %v4255_v16, %v5473_v28 }
 0x297   : > { %v1409_v32 = vpop.f32.mrf.mxu0 }
 0x298   : > { %v5535_v45 = vpack.c.bf16 %v1519_v30, %v1518_v40  ;;  %v1490_v47 = vadd.f32 %v1418_v29, %v5352_v46  ;;  %v1410_v49 = vadd.f32 %v5473_v28, %v1409_v32  ;;  %v957_v30 = vadd.f32 %v5349_v44, %v5347_v43 }
 0x299   : > { %v4256_v56 = vpop.f32.mrf.mxu0 }
 0x29a   : > { %v1488_v13 = vadd.f32 %v1410_v49, %v5355_v48  ;;  %v1421_v17 = vadd.f32 %v4256_v56, %v5473_v28  ;;  %v1522_v37 = vmax.f32 %v1490_v47, 0.0  ;;  %v954_v47 = vadd.f32 %v5349_v44, %v5343_v41 }
 0x29b   : > { %v1412_v39 = vpop.f32.mrf.mxu0 }
 0x29c   : > { %v1491_v3 = vadd.f32 %v1421_v17, %v5358_v50  ;;  %v1413_v46 = vadd.f32 %v5473_v28, %v1412_v39  ;;  %3923 = vmatmul.mubr.msk.bf16.gmra.mxu1 %vm1612_vm2, %v1539_v59  ;;  %v1520_v36 = vmax.f32 %v1488_v13, 0.0  ;;  %v1005_v17 = vadd.f32 %v5349_v44, %v5384_v2 }
 0x29d   : > { %v4259_v63 = vpop.f32.mrf.mxu0  ;;  %1733 = vmatprep.mubr.bf16.mxu1 %v4981_v15 }
 0x29e   : > { %v1523_v23 = vmax.f32 %v1491_v3, 0.0  ;;  %v1489_v48 = vadd.f32 %v1413_v46, %v973_v33  ;;  %v1434_v24 = vadd.f32 %v4259_v63, %v5473_v28 }
 0x29f   : > { %v1425_v54 = vpop.f32.mrf.mxu0 }
 0x2a0   : > { %v5550_v12 = vpack.c.bf16 %v1523_v23, %v1522_v37  ;;  %v1521_v51 = vmax.f32 %v1489_v48, 0.0  ;;  %v1494_v50 = vadd.f32 %v1434_v24, %v5363_v53  ;;  %v1426_v8 = vadd.f32 %v5473_v28, %v1425_v54 }
 0x2a1   : > { %v4260_v59 = vpop.f32.mrf.mxu0  ;;  %v1397_v53 = vadd.f32 %v5473_v28, %v1396_v0 }
 0x2a2   : > { %v5554_v38 = vpack.c.bf16 %v1521_v51, %v1520_v36  ;;  %v1492_v25 = vadd.f32 %v1426_v8, %v5366_v55  ;;  %v1437_v19 = vadd.f32 %v4260_v59, %v5473_v28  ;;  %v1526_v9 = vmax.f32 %v1494_v50, 0.0 }
 0x2a3   : > { %v1428_v21 = vpop.f32.mrf.mxu0  ;;  %v1485_v49 = vadd.f32 %v1397_v53, %v957_v30  ;;  %v1021_v50 = vadd.f32 %v5349_v44, %v5399_v11  ;;  %v4551_v44 = vld [vmem:[%s6664_s9] sm:$0xff]  }
 0x2a4   : > { %v1495_v20 = vadd.f32 %v1437_v19, %v5369_v57  ;;  %v1429_v26 = vadd.f32 %v5473_v28, %v1428_v21  ;;  %3924 = vmatmul.mubr.msk.bf16.gmra.mxu1 %vm1612_vm2, %v1540_v31  ;;  %v1394_v57 = vadd.f32 %v5473_v28, %v5519_v6  ;;  %v1524_v58 = vmax.f32 %v1492_v25, 0.0  ;;  %4275 = vmatprep.subr.bf16.mxu0 %v4551_v44  ;;  %v4553_v11 = vld [vmem:[%s6666_s11 + $0x98] ss:$12 sps:$4 sm:$0xff]  }
 0x2a5   : > { %v4263_v27 = vpop.f32.mrf.mxu0  ;;  %1743 = vmatprep.mubr.bf16.mxu1 %v4981_v15  ;;  %v1517_v41 = vmax.f32 %v1485_v49, 0.0  ;;  %4276 = vmatpush3.bf16.msra.mxu0 %v4551_v44 }
 0x2a6   : > { %v1527_v16 = vmax.f32 %v1495_v20, 0.0  ;;  %v1493_v55 = vadd.f32 %v1429_v26, %v989_v34  ;;  %v1450_v40 = vadd.f32 %v4263_v27, %v5473_v28  ;;  %v1484_v13 = vadd.f32 %v1394_v57, %v954_v47  ;;  %v4560_v57 = vld [vmem:[%s6666_s11 + $0xac] ss:$12 sps:$4 sm:$0xff]  }
 0x2a7   : > { %v1441_v29 = vpop.f32.mrf.mxu0  ;;  %2407 = vmatprep.subr.bf16.mxu0 %v4560_v57 }
 0x2a8   : > { %v1547_v42 = vpack.c.bf16 %v1527_v16, %v1526_v9  ;;  %v1525_v18 = vmax.f32 %v1493_v55, 0.0  ;;  %v1498_v0 = vadd.f32 %v1450_v40, %v5374_v60  ;;  %v1442_v32 = vadd.f32 %v5473_v28, %v1441_v29  ;;  %v4554_v16 = vld [vmem:[%s6666_s11 + $0x80] ss:$12 sps:$4 sm:$0xff]   ;;  %v4555_v55 = vld [vmem:[%s6666_s11 + $0x68] ss:$12 sps:$4 sm:$0xff]  }
 0x2a9   : > { %v4264_v4 = vpop.f32.mrf.mxu0  ;;  %v1516_v22 = vmax.f32 %v1484_v13, 0.0 }
 0x2aa   : > { %v1546_v52 = vpack.c.bf16 %v1525_v18, %v1524_v58  ;;  %v1496_v56 = vadd.f32 %v1442_v32, %v5377_v62  ;;  %v1453_v43 = vadd.f32 %v4264_v4, %v5473_v28  ;;  %v1530_v33 = vmax.f32 %v1498_v0, 0.0  ;;  %v4556_v18 = vld [vmem:[%s6666_s11 + $0x50] ss:$12 sps:$4 sm:$0xff]   ;;  %v4557_v4 = vld [vmem:[%s6666_s11 + $0x38] ss:$12 sps:$4 sm:$0xff]  }
 0x2ab   : > { %v1444_v6 = vpop.f32.mrf.mxu0 }
 0x2ac   : > { %v1499_v61 = vadd.f32 %v1453_v43, %v5382_v1  ;;  %v1445_v60 = vadd.f32 %v5473_v28, %v1444_v6  ;;  %3925 = vmatmul.mubr.msk.bf16.gmra.mxu1 %vm1612_vm2, %v5523_v14  ;;  %v1528_v63 = vmax.f32 %v1496_v56, 0.0  ;;  %v1542_v14 = vpack.c.bf16 %v1517_v41, %v1516_v22 }
 0x2ad   : > { %v4267_v39 = vpop.f32.mrf.mxu0  ;;  %1753 = vmatprep.mubr.bf16.mxu1 %v4981_v15 }
 0x2ae   : > { %v1531_v62 = vmax.f32 %v1499_v61, 0.0  ;;  %v1497_v3 = vadd.f32 %v1445_v60, %v1005_v17  ;;  %v1466_v46 = vadd.f32 %v4267_v39, %v5473_v28  ;;  %v4561_v17 = vld [vmem:[%s6666_s11 + $0x20] ss:$12 sps:$4 sm:$0xff]   ;;  %v4558_v60 = vld [vmem:[%s6666_s11 + $0xa8] ss:$12 sps:$4 sm:$0xff]  }
 0x2af   : > { %v1457_v37 = vpop.f32.mrf.mxu0  ;;  %v4564_v39 = vld [vmem:[%s6666_s11 + $0x94] ss:$12 sps:$4 sm:$0xff]  }
 0x2b0   : > { %v1549_v2 = vpack.c.bf16 %v1531_v62, %v1530_v33  ;;  %v1529_v23 = vmax.f32 %v1497_v3, 0.0  ;;  %v1502_v1 = vadd.f32 %v1466_v46, %v5389_v5  ;;  %v1458_v48 = vadd.f32 %v5473_v28, %v1457_v37  ;;  %v4562_v46 = vld [vmem:[%s6666_s11 + $0x90] ss:$12 sps:$4 sm:$0xff]  }
 0x2b1   : > { %v4268_v24 = vpop.f32.mrf.mxu0 }
 0x2b2   : > { %v1548_v35 = vpack.c.bf16 %v1529_v23, %v1528_v63  ;;  %v1500_v36 = vadd.f32 %v1458_v48, %v5392_v7  ;;  %v1469_v54 = vadd.f32 %v4268_v24, %v5473_v28  ;;  %v1534_v5 = vmax.f32 %v1502_v1, 0.0  ;;  %v4567_v63 = vld [vmem:[%s6666_s11 + $0x7c] ss:$12 sps:$4 sm:$0xff]   ;;  %v4565_v48 = vld [vmem:[%s6666_s11 + $0x78] ss:$12 sps:$4 sm:$0xff]  }
 0x2b3   : > { %v1460_v51 = vpop.f32.mrf.mxu0 }
 0x2b4   : > { %v1503_v8 = vadd.f32 %v1469_v54, %v5397_v10  ;;  %v1461_v59 = vadd.f32 %v5473_v28, %v1460_v51  ;;  %3926 = vmatmul.mubr.msk.bf16.gmra.mxu1 %vm1612_vm2, %v1542_v14  ;;  %v1532_v19 = vmax.f32 %v1500_v36, 0.0  ;;  %v4552_v10 = vld [vmem:[%s6666_s11 + $0xb0] ss:$12 sps:$4 sm:$0xff]   ;;  %v6683_v28 = vlaneseq  ;;  %v4568_v51 = vld [vmem:[%s6666_s11 + $0x60] ss:$12 sps:$4 sm:$0xff]  }
 0x2b5   : > { %1763 = vmatprep.mubr.bf16.mxu1 %v4981_v15  ;;  %4309 = vmatprep.subr.bf16.mxu1 %v4552_v10  ;;  %v4570_v14 = vld [vmem:[%s6666_s11 + $0x64] ss:$12 sps:$4 sm:$0xff]  }
 0x2b6   : > { %v1535_v31 = vmax.f32 %v1503_v8, 0.0  ;;  %v1501_v25 = vadd.f32 %v1461_v59, %v1021_v50  ;;  %4310 = vmatpush3.bf16.msra.mxu1 %v4552_v10  ;;  %v4573_v8 = vld [vmem:[%s6666_s11 + $0x4c] ss:$12 sps:$4 sm:$0xff]  }
 0x2b7   : > { %4311 = vmatprep.subr.bf16.mxu1 %v4553_v11 }
 0x2b8   : > { %v1551_v21 = vpack.c.bf16 %v1535_v31, %v1534_v5  ;;  %v1533_v7 = vmax.f32 %v1501_v25, 0.0 }
 0x2ba   : > { %v1550_v34 = vpack.c.bf16 %v1533_v7, %v1532_v19  ;;  %4312 = vmatpush3.bf16.msra.mxu1 %v4553_v11  ;;  %v4571_v19 = vld [vmem:[%s6666_s11 + $0x48] ss:$12 sps:$4 sm:$0xff]  }
 0x2bb   : > { %4313 = vmatprep.subr.bf16.mxu1 %v4554_v16 }
 0x2bc   : > { %3927 = vmatmul.mubr.msk.bf16.gmra.mxu1 %vm1612_vm2, %v5535_v45  ;;  %v5624_v45 = vshrl.u32 %v6683_v28, 7 }
 0x2bd   : > { %1773 = vmatprep.mubr.bf16.mxu1 %v4981_v15 }
 0x2be   : > { %4314 = vmatpush3.bf16.msra.mxu1 %v4554_v16 }
 0x2bf   : > { %4315 = vmatprep.subr.bf16.mxu1 %v4555_v55 }
 0x2c2   : > { %4316 = vmatpush3.bf16.msra.mxu1 %v4555_v55 }
 0x2c3   : > { %4317 = vmatprep.subr.bf16.mxu1 %v4556_v18 }
 0x2c4   : > { %3928 = vmatmul.mubr.msk.bf16.gmra.mxu1 %vm1612_vm2, %v5554_v38  ;;  %v5629_v38 = vld [vmem:[#allocation12] sm:$0x3] }
 0x2c5   : > { %1783 = vmatprep.mubr.bf16.mxu1 %v4981_v15 }
 0x2c6   : > { %4318 = vmatpush3.bf16.msra.mxu1 %v4556_v18 }
 0x2c7   : > { %4319 = vmatprep.subr.bf16.mxu1 %v4557_v4 }
 0x2ca   : > { %4320 = vmatpush3.bf16.msra.mxu1 %v4557_v4 }
 0x2cb   : > { %4321 = vmatprep.subr.bf16.mxu1 %v4561_v17 }
 0x2cc   : > { %3929 = vmatmul.mubr.msk.bf16.gmra.mxu1 %vm1612_vm2, %v5550_v12  ;;  %v5627_v12 = vsub.s32 1, %v5624_v45 }
 0x2cd   : > { %1793 = vmatprep.mubr.bf16.mxu1 %v4981_v15 }
 0x2ce   : > { %v5635_v26 = vrot.slane %v5629_v38, %v5627_v12  ;;  %4322 = vmatpush3.bf16.msra.mxu1 %v4561_v17 }
 0x2d4   : > { %3930 = vmatmul.mubr.msk.bf16.gmra.mxu1 %vm1612_vm2, %v1546_v52 }
 0x2d5   : > { %1803 = vmatprep.mubr.bf16.mxu1 %v4981_v15 }
 0x2dc   : > { %3931 = vmatmul.mubr.msk.bf16.gmra.mxu1 %vm1612_vm2, %v1547_v42 }
 0x2dd   : > { %1813 = vmatprep.mubr.bf16.mxu1 %v4981_v15 }
 0x2e4   : > { %3932 = vmatmul.mubr.msk.bf16.gmra.mxu1 %vm1612_vm2, %v1548_v35 }
 0x2e5   : > { %1823 = vmatprep.mubr.bf16.mxu1 %v4981_v15 }
 0x2ec   : > { %3933 = vmatmul.mubr.msk.bf16.gmra.mxu1 %vm1612_vm2, %v1549_v2 }
 0x2ed   : > { %1833 = vmatprep.mubr.bf16.mxu1 %v4981_v15 }
 0x2f4   : > { %3934 = vmatmul.mubr.msk.bf16.gmra.mxu1 %vm1612_vm2, %v1550_v34 }
 0x2f5   : > { %1843 = vmatprep.mubr.bf16.mxu1 %v4981_v15 }
 0x2fc   : > { %3935 = vmatmul.mubr.msk.bf16.gmra.mxu1 %vm1612_vm2, %v1551_v21 }
 0x344   : > { %v5631_v20 = vpop.f32.mrf.mxu1 }
 0x346   : > { %v1697_v53 = vpop.f32.mrf.mxu1 }
 0x347   : > { %v1698_v9 = vadd.f32 %v1697_v53, %v5635_v26 }
 0x348   : > { %v5637_v27 = vpop.f32.mrf.mxu1 }
 0x349   : > { %v1854_v29 = vmax.f32 %v1698_v9, 0.0 }
 0x34a   : > { %v1701_v40 = vpop.f32.mrf.mxu1 }
 0x34b   : > { %v1702_v30 = vadd.f32 %v1701_v40, %v5635_v26 }
 0x34c   : > { %v5650_v58 = vpop.f32.mrf.mxu1 }
 0x34d   : > { %v1855_v42 = vmax.f32 %v1702_v30, 0.0 }
 0x34e   : > { %v1707_v0 = vpop.f32.mrf.mxu1 }
 0x34f   : > { %v1886_v32 = vpack.c.bf16 %v1855_v42, %v1854_v29  ;;  %v1708_v49 = vadd.f32 %v1707_v0, %v5635_v26 }
 0x350   : > { %v5655_v47 = vpop.f32.mrf.mxu1 }
 0x351   : > { %4277 = vmatprep.mubr.msk.bf16.mxu0 %vm1612_vm2, %v1886_v32  ;;  %v1856_v13 = vmax.f32 %v1708_v49, 0.0 }
 0x352   : > { %v1711_v52 = vpop.f32.mrf.mxu1 }
 0x353   : > { %v1712_v56 = vadd.f32 %v1711_v52, %v5635_v26 }
 0x354   : > { %v5663_v43 = vpop.f32.mrf.mxu1 }
 0x355   : > { %v1857_v6 = vmax.f32 %v1712_v56, 0.0 }
 0x356   : > { %v1717_v61 = vpop.f32.mrf.mxu1 }
 0x357   : > { %v1887_v41 = vpack.c.bf16 %v1857_v6, %v1856_v13  ;;  %v1718_v62 = vadd.f32 %v1717_v61, %v5635_v26 }
 0x358   : > { %v5674_v33 = vpop.f32.mrf.mxu1 }
 0x359   : > { %4278 = vmatmul.mubr.msk.bf16.vlgmr.msra.gmra.mxu0 %vm1612_vm2, %v1887_v41  ;;  %v1858_v2 = vmax.f32 %v1718_v62, 0.0 }
 0x35a   : > { %v1721_v3 = vpop.f32.mrf.mxu1  ;;  %2408 = vmatpush1.bf16.msra.mxu0 %v4558_v60 }
 0x35b   : > { %v1722_v22 = vadd.f32 %v1721_v3, %v5635_v26  ;;  %2409 = vmatprep.subr.bf16.mxu0 %v4564_v39 }
 0x35c   : > { %v5685_v37 = vpop.f32.mrf.mxu1 }
 0x35d   : > { %v1859_v23 = vmax.f32 %v1722_v22, 0.0 }
 0x35e   : > { %v1727_v1 = vpop.f32.mrf.mxu1  ;;  %2410 = vmatpush1.bf16.msra.mxu0 %v4562_v46 }
 0x35f   : > { %v1888_v24 = vpack.c.bf16 %v1859_v23, %v1858_v2  ;;  %2411 = vmatprep.subr.bf16.mxu0 %v4567_v63  ;;  %v1728_v36 = vadd.f32 %v1727_v1, %v5635_v26 }
 0x360   : > { %v5693_v35 = vpop.f32.mrf.mxu1 }
 0x361   : > { %4281 = vmatprep.mubr.msk.bf16.mxu0 %vm1612_vm2, %v1888_v24  ;;  %v1860_v5 = vmax.f32 %v1728_v36, 0.0 }
 0x362   : > { %v1731_v54 = vpop.f32.mrf.mxu1  ;;  %2412 = vmatpush1.bf16.msra.mxu0 %v4565_v48 }
 0x363   : > { %v1732_v50 = vadd.f32 %v1731_v54, %v5635_v26  ;;  %2413 = vmatprep.subr.bf16.mxu0 %v4570_v14 }
 0x364   : > { %v5704_v59 = vpop.f32.mrf.mxu1 }
 0x365   : > { %v1861_v31 = vmax.f32 %v1732_v50, 0.0 }
 0x366   : > { %v1737_v25 = vpop.f32.mrf.mxu1  ;;  %2414 = vmatpush1.bf16.msra.mxu0 %v4568_v51 }
 0x367   : > { %v1889_v21 = vpack.c.bf16 %v1861_v31, %v1860_v5  ;;  %2415 = vmatprep.subr.bf16.mxu0 %v4573_v8  ;;  %v1738_v34 = vadd.f32 %v1737_v25, %v5635_v26 }
 0x368   : > { %v5709_v7 = vpop.f32.mrf.mxu1 }
 0x369   : > { %4282 = vmatmul.mubr.msk.bf16.gmra.mxu0 %vm1612_vm2, %v1889_v21  ;;  %v1862_v53 = vmax.f32 %v1738_v34, 0.0 }
 0x36a   : > { %v1741_v44 = vpop.f32.mrf.mxu1  ;;  %2416 = vmatpush1.bf16.msra.mxu0 %v4571_v19 }
 0x36b   : > { %v1742_v10 = vadd.f32 %v1741_v44, %v5635_v26 }
 0x36c   : > { %v5714_v11 = vpop.f32.mrf.mxu1 }
 0x36d   : > { %v1863_v9 = vmax.f32 %v1742_v10, 0.0 }
 0x36e   : > { %v1747_v16 = vpop.f32.mrf.mxu1 }
 0x36f   : > { %v1890_v55 = vpack.c.bf16 %v1863_v9, %v1862_v53  ;;  %v1748_v30 = vadd.f32 %v1747_v16, %v5635_v26 }
 0x370   : > { %v5716_v40 = vpop.f32.mrf.mxu1 }
 0x371   : > { %4285 = vmatprep.mubr.msk.bf16.mxu0 %vm1612_vm2, %v1890_v55  ;;  %v1864_v18 = vmax.f32 %v1748_v30, 0.0 }
 0x372   : > { %v1751_v57 = vpop.f32.mrf.mxu1 }
 0x373   : > { %v1752_v29 = vadd.f32 %v1751_v57, %v5635_v26  ;;  %v4577_v57 = vld [vmem:[%s6666_s11 + $0x34] ss:$12 sps:$4 sm:$0xff]  }
 0x374   : > { %v5721_v42 = vpop.f32.mrf.mxu1  ;;  %2417 = vmatprep.subr.bf16.mxu0 %v4577_v57 }
 0x375   : > { %v1865_v0 = vmax.f32 %v1752_v29, 0.0 }
 0x376   : > { %v1757_v32 = vpop.f32.mrf.mxu1 }
 0x377   : > { %v1891_v49 = vpack.c.bf16 %v1865_v0, %v1864_v18  ;;  %v1758_v52 = vadd.f32 %v1757_v32, %v5635_v26  ;;  %v4575_v18 = vld [vmem:[%s6666_s11 + $0x30] ss:$12 sps:$4 sm:$0xff]  }
 0x378   : > { %v5723_v4 = vpop.f32.mrf.mxu1  ;;  %2418 = vmatpush1.bf16.msra.mxu0 %v4575_v18 }
 0x379   : > { %4286 = vmatmul.mubr.msk.bf16.gmra.mxu0 %vm1612_vm2, %v1891_v49  ;;  %v1866_v17 = vmax.f32 %v1758_v52, 0.0 }
 0x37a   : > { %v1761_v56 = vpop.f32.mrf.mxu1 }
 0x37b   : > { %v1762_v13 = vadd.f32 %v1761_v56, %v5635_v26  ;;  %v4574_v56 = vld [vmem:[%s6666_s11 + $0x8] ss:$12 sps:$4 sm:$0xff]  }
 0x37c   : > { %v5728_v6 = vpop.f32.mrf.mxu1  ;;  %4323 = vmatprep.subr.bf16.mxu1 %v4574_v56 }
 0x37d   : > { %v1867_v61 = vmax.f32 %v1762_v13, 0.0  ;;  %v4580_v13 = vld [vmem:[%s6666_s11 + $0x1c] ss:$12 sps:$4 sm:$0xff]   ;;  %4324 = vmatpush3.bf16.msra.mxu1 %v4574_v56 }
 0x37e   : > { %v1767_v60 = vpop.f32.mrf.mxu1  ;;  %2419 = vmatprep.subr.bf16.mxu0 %v4580_v13 }
 0x37f   : > { %v1892_v41 = vpack.c.bf16 %v1867_v61, %v1866_v17  ;;  %v1768_v62 = vadd.f32 %v1767_v60, %v5635_v26  ;;  %v4578_v61 = vld [vmem:[%s6666_s11 + $0x18] ss:$12 sps:$4 sm:$0xff]  }
 0x380   : > { %v5730_v39 = vpop.f32.mrf.mxu1  ;;  %2420 = vmatpush1.bf16.msra.mxu0 %v4578_v61 }
 0x381   : > { %4289 = vmatprep.mubr.msk.bf16.mxu0 %vm1612_vm2, %v1892_v41  ;;  %v1868_v63 = vmax.f32 %v1768_v62, 0.0 }
 0x382   : > { %v1771_v3 = vpop.f32.mrf.mxu1 }
 0x383   : > { %v1772_v46 = vadd.f32 %v1771_v3, %v5635_v26  ;;  %v4583_v3 = vld [vmem:[%s6666_s11 + $0x4] ss:$12 sps:$4 sm:$0xff]  }
 0x384   : > { %v5735_v22 = vpop.f32.mrf.mxu1  ;;  %2421 = vmatprep.subr.bf16.mxu0 %v4583_v3 }
 0x385   : > { %v1869_v2 = vmax.f32 %v1772_v46, 0.0 }
 0x386   : > { %v1777_v23 = vpop.f32.mrf.mxu1 }
 0x387   : > { %v1893_v1 = vpack.c.bf16 %v1869_v2, %v1868_v63  ;;  %v1778_v24 = vadd.f32 %v1777_v23, %v5635_v26  ;;  %v4581_v63 = vld [vmem:[%s6666_s11] ss:$12 sps:$4 sm:$0xff]  }
 0x388   : > { %v5737_v48 = vpop.f32.mrf.mxu1  ;;  %2422 = vmatpush1.bf16.msra.mxu0 %v4581_v63 }
 0x389   : > { %4290 = vmatmul.mubr.msk.bf16.gmra.mxu0 %vm1612_vm2, %v1893_v1  ;;  %v1870_v51 = vmax.f32 %v1778_v24, 0.0 }
 0x38a   : > { %v1781_v14 = vpop.f32.mrf.mxu1 }
 0x38b   : > { %v1782_v36 = vadd.f32 %v1781_v14, %v5635_v26 }
 0x38c   : > { %v5742_v54 = vpop.f32.mrf.mxu1 }
 0x38d   : > { %v1871_v50 = vmax.f32 %v1782_v36, 0.0 }
 0x38e   : > { %v1787_v8 = vpop.f32.mrf.mxu1 }
 0x38f   : > { %v1894_v5 = vpack.c.bf16 %v1871_v50, %v1870_v51  ;;  %v1788_v25 = vadd.f32 %v1787_v8, %v5635_v26 }
 0x390   : > { %v5744_v31 = vpop.f32.mrf.mxu1 }
 0x391   : > { %4293 = vmatprep.mubr.msk.bf16.mxu0 %vm1612_vm2, %v1894_v5  ;;  %v1872_v44 = vmax.f32 %v1788_v25, 0.0 }
 0x392   : > { %v1791_v19 = vpop.f32.mrf.mxu1 }
 0x393   : > { %v1792_v21 = vadd.f32 %v1791_v19, %v5635_v26 }
 0x394   : > { %v5749_v34 = vpop.f32.mrf.mxu1 }
 0x395   : > { %v1873_v10 = vmax.f32 %v1792_v21, 0.0 }
 0x396   : > { %v1797_v53 = vpop.f32.mrf.mxu1 }
 0x397   : > { %v1895_v9 = vpack.c.bf16 %v1873_v10, %v1872_v44  ;;  %v1798_v55 = vadd.f32 %v1797_v53, %v5635_v26 }
 0x398   : > { %v5751_v16 = vpop.f32.mrf.mxu1 }
 0x399   : > { %4294 = vmatmul.mubr.msk.bf16.gmra.mxu0 %vm1612_vm2, %v1895_v9  ;;  %v1874_v32 = vmax.f32 %v1798_v55, 0.0 }
 0x39a   : > { %v1801_v30 = vpop.f32.mrf.mxu1 }
 0x39b   : > { %v1802_v29 = vadd.f32 %v1801_v30, %v5635_v26 }
 0x39c   : > { %v5762_v0 = vpop.f32.mrf.mxu1 }
 0x39d   : > { %v1875_v49 = vmax.f32 %v1802_v29, 0.0 }
 0x39e   : > { %v1807_v52 = vpop.f32.mrf.mxu1 }
 0x39f   : > { %v1896_v17 = vpack.c.bf16 %v1875_v49, %v1874_v32  ;;  %v1808_v41 = vadd.f32 %v1807_v52, %v5635_v26 }
 0x3a0   : > { %v5773_v60 = vpop.f32.mrf.mxu1 }
 0x3a1   : > { %4297 = vmatprep.mubr.msk.bf16.mxu0 %vm1612_vm2, %v1896_v17  ;;  %v1876_v23 = vmax.f32 %v1808_v41, 0.0 }
 0x3a2   : > { %v1811_v62 = vpop.f32.mrf.mxu1 }
 0x3a3   : > { %v1812_v46 = vadd.f32 %v1811_v62, %v5635_v26 }
 0x3a4   : > { %v5784_v2 = vpop.f32.mrf.mxu1 }
 0x3a5   : > { %v1877_v1 = vmax.f32 %v1812_v46, 0.0 }
 0x3a6   : > { %v1817_v24 = vpop.f32.mrf.mxu1 }
 0x3a7   : > { %v1897_v14 = vpack.c.bf16 %v1877_v1, %v1876_v23  ;;  %v1818_v51 = vadd.f32 %v1817_v24, %v5635_v26 }
 0x3a8   : > { %v5786_v36 = vpop.f32.mrf.mxu1 }
 0x3a9   : > { %4298 = vmatmul.mubr.msk.bf16.gmra.mxu0 %vm1612_vm2, %v1897_v14  ;;  %v1878_v25 = vmax.f32 %v1818_v51, 0.0 }
 0x3aa   : > { %v1821_v50 = vpop.f32.mrf.mxu1 }
 0x3ab   : > { %v1822_v8 = vadd.f32 %v1821_v50, %v5635_v26  ;;  %v5815_v50 = vsub.s32 0, %v5624_v45 }
 0x3ac   : > { %v5791_v5 = vpop.f32.mrf.mxu1 }
 0x3ad   : > { %v1879_v19 = vmax.f32 %v1822_v8, 0.0  ;;  %v5817_v8 = vld [vmem:[#allocation14] ss:$0 sm:$0xff] }
 0x3ae   : > { %v1827_v21 = vpop.f32.mrf.mxu1 }
 0x3af   : > { %v1898_v44 = vpack.c.bf16 %v1879_v19, %v1878_v25  ;;  %v1828_v53 = vadd.f32 %v1827_v21, %v5635_v26  ;;  %v5821_v19 = vrot.slane %v5629_v38, %v5815_v50 }
 0x3b0   : > { %v5793_v10 = vpop.f32.mrf.mxu1 }
 0x3b1   : > { %4301 = vmatprep.mubr.msk.bf16.mxu0 %vm1612_vm2, %v1898_v44  ;;  %v1880_v57 = vmax.f32 %v1828_v53, 0.0  ;;  %v1706_v44 = vadd.f32 %v5650_v58, %v5821_v19 }
 0x3b2   : > { %v1831_v9 = vpop.f32.mrf.mxu1 }
 0x3b3   : > { %v1832_v55 = vadd.f32 %v1831_v9, %v5635_v26 }
 0x3b4   : > { %v5798_v30 = vpop.f32.mrf.mxu1 }
 0x3b5   : > { %v1881_v29 = vmax.f32 %v1832_v55, 0.0  ;;  %v1696_v55 = vadd.f32 %v5631_v20, %v5821_v19 }
 0x3b6   : > { %v1837_v18 = vpop.f32.mrf.mxu1 }
 0x3b7   : > { %v1899_v32 = vpack.c.bf16 %v1881_v29, %v1880_v57  ;;  %v1838_v52 = vadd.f32 %v1837_v18, %v5635_v26  ;;  %v1710_v57 = vadd.f32 %v5655_v47, %v5821_v19 }
 0x3b8   : > { %v5800_v49 = vpop.f32.mrf.mxu1 }
 0x3b9   : > { %4302 = vmatmul.mubr.msk.bf16.gmra.mxu0 %vm1612_vm2, %v1899_v32  ;;  %v1882_v61 = vmax.f32 %v1838_v52, 0.0  ;;  %v1700_v32 = vadd.f32 %v5637_v27, %v5821_v19 }
 0x3ba   : > { %v1841_v56 = vpop.f32.mrf.mxu1 }
 0x3bb   : > { %v1842_v13 = vadd.f32 %v1841_v56, %v5635_v26 }
 0x3bc   : > { %v5805_v17 = vpop.f32.mrf.mxu1 }
 0x3bd   : > { %v1883_v41 = vmax.f32 %v1842_v13, 0.0  ;;  %v4586_v13 = vld [vmem:[#allocation17 + $0x74] ss:$8 sps:$4 sm:$0xff]  }
 0x3be   : > { %v1847_v62 = vpop.f32.mrf.mxu1  ;;  %2917 = vmatprep.subr.bf16.mxu1 %v4586_v13  ;;  %v4593_v13 = vld [vmem:[#allocation17 + $0x40] ss:$8 sps:$4 sm:$0xff]  }
 0x3bf   : > { %v1900_v3 = vpack.c.bf16 %v1883_v41, %v1882_v61  ;;  %v1848_v63 = vadd.f32 %v1847_v62, %v5635_v26 }
 0x3c0   : > { %v5807_v46 = vpop.f32.mrf.mxu1 }
 0x3c1   : > { %4305 = vmatprep.mubr.msk.bf16.mxu0 %vm1612_vm2, %v1900_v3  ;;  %v1884_v24 = vmax.f32 %v1848_v63, 0.0 }
 0x3c2   : > { %v1851_v23 = vpop.f32.mrf.mxu1 }
 0x3c3   : > { %v1852_v1 = vadd.f32 %v1851_v23, %v5635_v26  ;;  %v4584_v23 = vld [vmem:[#allocation17 + $0x70] ss:$8 sps:$4 sm:$0xff]  }
 0x3c5   : > { %v1885_v14 = vmax.f32 %v1852_v1, 0.0  ;;  %v4589_v1 = vld [vmem:[#allocation17 + $0x64] ss:$8 sps:$4 sm:$0xff]  }
 0x3c7   : > { %v1901_v51 = vpack.c.bf16 %v1885_v14, %v1884_v24  ;;  %v4587_v14 = vld [vmem:[#allocation17 + $0x60] ss:$8 sps:$4 sm:$0xff]  }
 0x3c9   : > { %4306 = vmatmul.mubr.msk.bf16.gmra.mxu0 %vm1612_vm2, %v1901_v51 }
 0x3ca   : > { %2439 = vmatprep.mubr.bf16.mxu0 %v4981_v15 }
 0x419   : > { %v4279_v25 = vpop.f32.mrf.mxu0 }
 0x41a   : > { %v2032_v21 = vadd.f32 %v4279_v25, %v5817_v8  ;;  %v4592_v25 = vld [vmem:[#allocation17 + $0x54] ss:$8 sps:$4 sm:$0xff]  }
 0x41b   : > { %v2023_v26 = vpop.f32.mrf.mxu0 }
 0x41c   : > { %v2024_v53 = vadd.f32 %v5817_v8, %v2023_v26  ;;  %v2152_v29 = vadd.f32 %v2032_v21, %v1706_v44  ;;  %v1726_v21 = vadd.f32 %v5685_v37, %v5821_v19  ;;  %v1720_v37 = vadd.f32 %v5674_v33, %v5821_v19  ;;  %v4596_v33 = vld [vmem:[#allocation17 + $0x30] ss:$8 sps:$4 sm:$0xff]  }
 0x41d   : > { %v4280_v9 = vpop.f32.mrf.mxu0 }
 0x41e   : > { %v2035_v18 = vadd.f32 %v4280_v9, %v5817_v8  ;;  %v2150_v52 = vadd.f32 %v2024_v53, %v1696_v55  ;;  %v2184_v61 = vmax.f32 %v2152_v29, 0.0  ;;  %v1716_v53 = vadd.f32 %v5663_v43, %v5821_v19  ;;  %v4590_v29 = vld [vmem:[#allocation17 + $0x50] ss:$8 sps:$4 sm:$0xff]  }
 0x41f   : > { %v2026_v38 = vpop.f32.mrf.mxu0  ;;  %v1730_v9 = vadd.f32 %v5693_v35, %v5821_v19 }
 0x420   : > { %v2153_v56 = vadd.f32 %v2035_v18, %v1710_v57  ;;  %v2027_v58 = vadd.f32 %v5817_v8, %v2026_v38  ;;  %v2182_v20 = vmax.f32 %v2150_v52, 0.0  ;;  %v4595_v38 = vld [vmem:[#allocation17 + $0x44] ss:$8 sps:$4 sm:$0xff]  }
 0x422   : > { %v2185_v41 = vmax.f32 %v2153_v56, 0.0  ;;  %v2151_v62 = vadd.f32 %v2027_v58, %v1700_v32 }
 0x424   : > { %v2215_v3 = vpack.c.bf16 %v2185_v41, %v2184_v61  ;;  %v2183_v63 = vmax.f32 %v2151_v62, 0.0  ;;  %v4598_v61 = vld [vmem:[#allocation17 + $0x34] ss:$8 sps:$4 sm:$0xff]  }
 0x426   : > { %v2214_v47 = vpack.c.bf16 %v2183_v63, %v2182_v20 }
 0x428   : > { %2440 = vmatmul.mubr.bf16.vlgmr.msra.gmra.mxu0 %v2214_v47  ;;  %4325 = vmatprep.mubr.bf16.mxu1 %v2214_v47  ;;  %v4601_v47 = vld [vmem:[#allocation17 + $0x24] ss:$8 sps:$4 sm:$0xff]  }
 0x429   : > { %v4283_v24 = vpop.f32.mrf.mxu0  ;;  %4326 = vmatmul.mubr.bf16.vlgmr.msra.gmra.mxu1 %v2215_v3  ;;  %2449 = vmatprep.mubr.bf16.mxu0 %v4981_v15 }
 0x42a   : > { %v2048_v27 = vadd.f32 %v4283_v24, %v5817_v8  ;;  %2918 = vmatpush1.bf16.msra.mxu1 %v4584_v23 }
 0x42b   : > { %v2039_v51 = vpop.f32.mrf.mxu0  ;;  %2919 = vmatprep.subr.bf16.mxu1 %v4589_v1  ;;  %v4599_v1 = vld [vmem:[#allocation17 + $0x20] ss:$8 sps:$4 sm:$0xff]  }
 0x42c   : > { %v2040_v26 = vadd.f32 %v5817_v8, %v2039_v51  ;;  %v2156_v55 = vadd.f32 %v2048_v27, %v1726_v21  ;;  %v4604_v27 = vld [vmem:[#allocation17 + $0x14] ss:$8 sps:$4 sm:$0xff]   ;;  %v1736_v21 = vadd.f32 %v5704_v59, %v5821_v19 }
 0x42d   : > { %v4284_v44 = vpop.f32.mrf.mxu0 }
 0x42e   : > { %v2051_v57 = vadd.f32 %v4284_v44, %v5817_v8  ;;  %2920 = vmatpush1.bf16.msra.mxu1 %v4587_v14  ;;  %v2154_v32 = vadd.f32 %v2040_v26, %v1716_v53  ;;  %v2188_v43 = vmax.f32 %v2156_v55, 0.0  ;;  %v1746_v14 = vadd.f32 %v5714_v11, %v5821_v19 }
 0x42f   : > { %v2042_v18 = vpop.f32.mrf.mxu0  ;;  %2921 = vmatprep.subr.bf16.mxu1 %v4592_v25  ;;  %v1750_v26 = vadd.f32 %v5716_v40, %v5821_v19 }
 0x430   : > { %v2157_v52 = vadd.f32 %v2051_v57, %v1730_v9  ;;  %v2043_v56 = vadd.f32 %v5817_v8, %v2042_v18  ;;  %2450 = vmatmul.mubr.bf16.gmra.mxu0 %v2215_v3  ;;  %v2186_v41 = vmax.f32 %v2154_v32, 0.0  ;;  %v4602_v9 = vld [vmem:[#allocation17 + $0x10] ss:$8 sps:$4 sm:$0xff]   ;;  %v1740_v57 = vadd.f32 %v5709_v7, %v5821_v19 }
 0x431   : > { %2459 = vmatprep.mubr.bf16.mxu0 %v4981_v15 }
 0x432   : > { %v2189_v35 = vmax.f32 %v2157_v52, 0.0  ;;  %v2155_v58 = vadd.f32 %v2043_v56, %v1720_v37  ;;  %2922 = vmatpush1.bf16.msra.mxu1 %v4590_v29 }
 0x433   : > { %2923 = vmatprep.subr.bf16.mxu1 %v4595_v38 }
 0x434   : > { %v2187_v62 = vmax.f32 %v2155_v58, 0.0  ;;  %v2217_v20 = vpack.c.bf16 %v2189_v35, %v2188_v43  ;;  %v1766_v58 = vadd.f32 %v5728_v6, %v5821_v19 }
 0x436   : > { %v2216_v63 = vpack.c.bf16 %v2187_v62, %v2186_v41  ;;  %2924 = vmatpush1.bf16.msra.mxu1 %v4593_v13  ;;  %v1756_v41 = vadd.f32 %v5721_v42, %v5821_v19  ;;  %v1770_v62 = vadd.f32 %v5730_v39, %v5821_v19 }
 0x437   : > { %2925 = vmatprep.subr.bf16.mxu1 %v4598_v61 }
 0x438   : > { %2460 = vmatmul.mubr.bf16.gmra.mxu0 %v2216_v63  ;;  %4329 = vmatprep.mubr.bf16.mxu1 %v2216_v63 }
 0x439   : > { %v4287_v3 = vpop.f32.mrf.mxu0  ;;  %4330 = vmatmul.mubr.bf16.gmra.mxu1 %v2217_v20  ;;  %2469 = vmatprep.mubr.bf16.mxu0 %v4981_v15 }
 0x43a   : > { %v2064_v23 = vadd.f32 %v4287_v3, %v5817_v8  ;;  %2926 = vmatpush1.bf16.msra.mxu1 %v4596_v33 }
 0x43b   : > { %v2055_v24 = vpop.f32.mrf.mxu0  ;;  %2927 = vmatprep.subr.bf16.mxu1 %v4601_v47  ;;  %v1760_v47 = vadd.f32 %v5723_v4, %v5821_v19 }
 0x43c   : > { %v2056_v51 = vadd.f32 %v5817_v8, %v2055_v24  ;;  %v2160_v44 = vadd.f32 %v2064_v23, %v1746_v14 }
 0x43d   : > { %v4288_v25 = vpop.f32.mrf.mxu0 }
 0x43e   : > { %v2067_v53 = vadd.f32 %v4288_v25, %v5817_v8  ;;  %2928 = vmatpush1.bf16.msra.mxu1 %v4599_v1  ;;  %v2158_v11 = vadd.f32 %v2056_v51, %v1736_v21  ;;  %v2192_v59 = vmax.f32 %v2160_v44, 0.0 }
 0x43f   : > { %v2058_v55 = vpop.f32.mrf.mxu0  ;;  %2929 = vmatprep.subr.bf16.mxu1 %v4604_v27 }
 0x440   : > { %v2161_v29 = vadd.f32 %v2067_v53, %v1750_v26  ;;  %v2059_v18 = vadd.f32 %v5817_v8, %v2058_v55  ;;  %2470 = vmatmul.mubr.bf16.gmra.mxu0 %v2217_v20  ;;  %v2190_v37 = vmax.f32 %v2158_v11, 0.0  ;;  %v1786_v26 = vadd.f32 %v5742_v54, %v5821_v19 }
 0x441   : > { %2479 = vmatprep.mubr.bf16.mxu0 %v4981_v15  ;;  %v1790_v55 = vadd.f32 %v5744_v31, %v5821_v19 }
 0x442   : > { %v2193_v38 = vmax.f32 %v2161_v29, 0.0  ;;  %v2159_v40 = vadd.f32 %v2059_v18, %v1740_v57  ;;  %2930 = vmatpush1.bf16.msra.mxu1 %v4602_v9  ;;  %v1776_v9 = vadd.f32 %v5735_v22, %v5821_v19  ;;  %v1780_v18 = vadd.f32 %v5737_v48, %v5821_v19 }
 0x444   : > { %v2191_v32 = vmax.f32 %v2159_v40, 0.0  ;;  %v2219_v52 = vpack.c.bf16 %v2193_v38, %v2192_v59 }
 0x446   : > { %v2218_v56 = vpack.c.bf16 %v2191_v32, %v2190_v37 }
 0x448   : > { %2480 = vmatmul.mubr.bf16.gmra.mxu0 %v2218_v56  ;;  %4333 = vmatprep.mubr.bf16.mxu1 %v2218_v56 }
 0x449   : > { %v4291_v43 = vpop.f32.mrf.mxu0  ;;  %4334 = vmatmul.mubr.bf16.gmra.mxu1 %v2219_v52  ;;  %2489 = vmatprep.mubr.bf16.mxu0 %v4981_v15 }
 0x44a   : > { %v2080_v7 = vadd.f32 %v4291_v43, %v5817_v8 }
 0x44b   : > { %v2071_v35 = vpop.f32.mrf.mxu0 }
 0x44c   : > { %v2072_v13 = vadd.f32 %v5817_v8, %v2071_v35  ;;  %v2164_v20 = vadd.f32 %v2080_v7, %v1766_v58  ;;  %v1806_v35 = vadd.f32 %v5762_v0, %v5821_v19 }
 0x44d   : > { %v4292_v61 = vpop.f32.mrf.mxu0 }
 0x44e   : > { %v2083_v63 = vadd.f32 %v4292_v61, %v5817_v8  ;;  %v2162_v3 = vadd.f32 %v2072_v13, %v1756_v41  ;;  %v2196_v1 = vmax.f32 %v2164_v20, 0.0  ;;  %v1796_v61 = vadd.f32 %v5749_v34, %v5821_v19 }
 0x44f   : > { %v2074_v33 = vpop.f32.mrf.mxu0  ;;  %v1810_v41 = vadd.f32 %v5773_v60, %v5821_v19 }
 0x450   : > { %v2165_v23 = vadd.f32 %v2083_v63, %v1770_v62  ;;  %v2075_v6 = vadd.f32 %v5817_v8, %v2074_v33  ;;  %2490 = vmatmul.mubr.bf16.gmra.mxu0 %v2219_v52  ;;  %v2194_v27 = vmax.f32 %v2162_v3, 0.0  ;;  %v1800_v33 = vadd.f32 %v5751_v16, %v5821_v19 }
 0x451   : > { %2499 = vmatprep.mubr.bf16.mxu0 %v4981_v15 }
 0x452   : > { %v2197_v24 = vmax.f32 %v2165_v23, 0.0  ;;  %v2163_v42 = vadd.f32 %v2075_v6, %v1760_v47  ;;  %v4607_v23 = vld [vmem:[#allocation17 + $0x4] ss:$8 sps:$4 sm:$0xff]   ;;  %v4605_v6 = vld [vmem:[#allocation17] ss:$8 sps:$4 sm:$0xff]  }
 0x453   : > { %2931 = vmatprep.subr.bf16.mxu1 %v4607_v23 }
 0x454   : > { %v2195_v14 = vmax.f32 %v2163_v42, 0.0  ;;  %v2221_v39 = vpack.c.bf16 %v2197_v24, %v2196_v1  ;;  %2932 = vmatpush1.bf16.msra.mxu1 %v4605_v6 }
 0x456   : > { %v2220_v51 = vpack.c.bf16 %v2195_v14, %v2194_v27 }
 0x458   : > { %2500 = vmatmul.mubr.bf16.gmra.mxu0 %v2220_v51  ;;  %4337 = vmatprep.mubr.bf16.mxu1 %v2220_v51 }
 0x459   : > { %v4295_v25 = vpop.f32.mrf.mxu0  ;;  %4338 = vmatmul.mubr.bf16.gmra.mxu1 %v2221_v39  ;;  %2509 = vmatprep.mubr.bf16.mxu0 %v4981_v15 }
 0x45a   : > { %v2096_v4 = vadd.f32 %v4295_v25, %v5817_v8  ;;  %v1826_v25 = vadd.f32 %v5791_v5, %v5821_v19 }
 0x45b   : > { %v2087_v21 = vpop.f32.mrf.mxu0 }
 0x45c   : > { %v2088_v44 = vadd.f32 %v5817_v8, %v2087_v21  ;;  %v2168_v57 = vadd.f32 %v2096_v4, %v1786_v26  ;;  %v1816_v26 = vadd.f32 %v5784_v2, %v5821_v19 }
 0x45d   : > { %v4296_v53 = vpop.f32.mrf.mxu0 }
 0x45e   : > { %v2099_v11 = vadd.f32 %v4296_v53, %v5817_v8  ;;  %v2166_v59 = vadd.f32 %v2088_v44, %v1776_v9  ;;  %v2200_v40 = vmax.f32 %v2168_v57, 0.0  ;;  %v1830_v44 = vadd.f32 %v5793_v10, %v5821_v19 }
 0x45f   : > { %v2090_v29 = vpop.f32.mrf.mxu0  ;;  %v1820_v57 = vadd.f32 %v5786_v36, %v5821_v19 }
 0x460   : > { %v2169_v38 = vadd.f32 %v2099_v11, %v1790_v55  ;;  %v2091_v54 = vadd.f32 %v5817_v8, %v2090_v29  ;;  %2510 = vmatmul.mubr.bf16.gmra.mxu0 %v2221_v39  ;;  %v2198_v32 = vmax.f32 %v2166_v59, 0.0 }
 0x461   : > { %2519 = vmatprep.mubr.bf16.mxu0 %v4981_v15 }
 0x462   : > { %v2201_v37 = vmax.f32 %v2169_v38, 0.0  ;;  %v2167_v22 = vadd.f32 %v2091_v54, %v1780_v18 }
 0x464   : > { %v2199_v52 = vmax.f32 %v2167_v22, 0.0  ;;  %v2223_v31 = vpack.c.bf16 %v2201_v37, %v2200_v40 }
 0x466   : > { %v2222_v56 = vpack.c.bf16 %v2199_v52, %v2198_v32  ;;  %v1846_v32 = vadd.f32 %v5805_v17, %v5821_v19 }
 0x468   : > { %2520 = vmatmul.mubr.bf16.gmra.mxu0 %v2222_v56  ;;  %4341 = vmatprep.mubr.bf16.mxu1 %v2222_v56  ;;  %v1836_v56 = vadd.f32 %v5798_v30, %v5821_v19 }
 0x469   : > { %v4299_v43 = vpop.f32.mrf.mxu0  ;;  %4342 = vmatmul.mubr.bf16.gmra.mxu1 %v2223_v31  ;;  %2529 = vmatprep.mubr.bf16.mxu0 %v4981_v15 }
 0x46a   : > { %v2112_v48 = vadd.f32 %v4299_v43, %v5817_v8  ;;  %v1850_v43 = vadd.f32 %v5807_v46, %v5821_v19 }
 0x46b   : > { %v2103_v7 = vpop.f32.mrf.mxu0 }
 0x46c   : > { %v2104_v58 = vadd.f32 %v5817_v8, %v2103_v7  ;;  %v2172_v62 = vadd.f32 %v2112_v48, %v1806_v35 }
 0x46d   : > { %v4300_v13 = vpop.f32.mrf.mxu0 }
 0x46e   : > { %v2115_v20 = vadd.f32 %v4300_v13, %v5817_v8  ;;  %v2170_v47 = vadd.f32 %v2104_v58, %v1796_v61  ;;  %v2204_v34 = vmax.f32 %v2172_v62, 0.0  ;;  %v1840_v58 = vadd.f32 %v5800_v49, %v5821_v19 }
 0x46f   : > { %v2106_v63 = vpop.f32.mrf.mxu0  ;;  %v2274_v49 = vsub.s32 2, %v5624_v45 }
 0x470   : > { %v2173_v3 = vadd.f32 %v2115_v20, %v1810_v41  ;;  %v2107_v0 = vadd.f32 %v5817_v8, %v2106_v63  ;;  %2530 = vmatmul.mubr.bf16.gmra.mxu0 %v2223_v31  ;;  %v2202_v60 = vmax.f32 %v2170_v47, 0.0 }
 0x471   : > { %2539 = vmatprep.mubr.bf16.mxu0 %v4981_v15 }
 0x472   : > { %v2205_v1 = vmax.f32 %v2173_v3, 0.0  ;;  %v2171_v24 = vadd.f32 %v2107_v0, %v1800_v33 }
 0x474   : > { %v2203_v42 = vmax.f32 %v2171_v24, 0.0  ;;  %v2225_v27 = vpack.c.bf16 %v2205_v1, %v2204_v34 }
 0x476   : > { %v2224_v14 = vpack.c.bf16 %v2203_v42, %v2202_v60 }
 0x478   : > { %2540 = vmatmul.mubr.bf16.gmra.mxu0 %v2224_v14  ;;  %4345 = vmatprep.mubr.bf16.mxu1 %v2224_v14 }
 0x479   : > { %v4303_v16 = vpop.f32.mrf.mxu0  ;;  %4346 = vmatmul.mubr.bf16.gmra.mxu1 %v2225_v27  ;;  %2549 = vmatprep.mubr.bf16.mxu0 %v4981_v15 }
 0x47a   : > { %v2128_v39 = vadd.f32 %v4303_v16, %v5817_v8 }
 0x47b   : > { %v2119_v51 = vpop.f32.mrf.mxu0 }
 0x47c   : > { %v2120_v4 = vadd.f32 %v5817_v8, %v2119_v51  ;;  %v2176_v53 = vadd.f32 %v2128_v39, %v1826_v25 }
 0x47d   : > { %v4304_v21 = vpop.f32.mrf.mxu0 }
 0x47e   : > { %v2131_v9 = vadd.f32 %v4304_v21, %v5817_v8  ;;  %v2174_v11 = vadd.f32 %v2120_v4, %v1816_v26  ;;  %v2208_v18 = vmax.f32 %v2176_v53, 0.0 }
 0x47f   : > { %v2122_v55 = vpop.f32.mrf.mxu0 }
 0x480   : > { %v2177_v29 = vadd.f32 %v2131_v9, %v1830_v44  ;;  %v2123_v5 = vadd.f32 %v5817_v8, %v2122_v55  ;;  %2550 = vmatmul.mubr.bf16.gmra.mxu0 %v2225_v27  ;;  %v2206_v38 = vmax.f32 %v2174_v11, 0.0 }
 0x481   : > { %2559 = vmatprep.mubr.bf16.mxu0 %v4981_v15 }
 0x482   : > { %v2209_v59 = vmax.f32 %v2177_v29, 0.0  ;;  %v2175_v2 = vadd.f32 %v2123_v5, %v1820_v57 }
 0x484   : > { %v2207_v54 = vmax.f32 %v2175_v2, 0.0  ;;  %v2227_v10 = vpack.c.bf16 %v2209_v59, %v2208_v18 }
 0x486   : > { %v2226_v40 = vpack.c.bf16 %v2207_v54, %v2206_v38 }
 0x488   : > { %2560 = vmatmul.mubr.bf16.gmra.mxu0 %v2226_v40  ;;  %4349 = vmatprep.mubr.bf16.mxu1 %v2226_v40 }
 0x489   : > { %v4307_v37 = vpop.f32.mrf.mxu0  ;;  %4350 = vmatmul.mubr.bf16.gmra.mxu1 %v2227_v10  ;;  %2569 = vmatprep.mubr.bf16.mxu0 %v4981_v15 }
 0x48a   : > { %v2144_v36 = vadd.f32 %v4307_v37, %v5817_v8 }
 0x48b   : > { %v2135_v22 = vpop.f32.mrf.mxu0 }
 0x48c   : > { %v2136_v52 = vadd.f32 %v5817_v8, %v2135_v22  ;;  %v2180_v48 = vadd.f32 %v2144_v36, %v1846_v32 }
 0x48d   : > { %v4308_v31 = vpop.f32.mrf.mxu0 }
 0x48e   : > { %v2147_v7 = vadd.f32 %v4308_v31, %v5817_v8  ;;  %v2178_v13 = vadd.f32 %v2136_v52, %v1836_v56  ;;  %v2212_v41 = vmax.f32 %v2180_v48, 0.0 }
 0x48f   : > { %v2138_v35 = vpop.f32.mrf.mxu0 }
 0x490   : > { %v2181_v61 = vadd.f32 %v2147_v7, %v1850_v43  ;;  %v2139_v17 = vadd.f32 %v5817_v8, %v2138_v35  ;;  %2570 = vmatmul.mubr.bf16.gmra.mxu0 %v2227_v10  ;;  %v2210_v20 = vmax.f32 %v2178_v13, 0.0  ;;  %v5936_v8 = vld [vmem:[#allocation15] sm:$0x7] }
 0x491   : > { %2579 = vmatprep.mubr.bf16.mxu0 %v4981_v15  ;;  %v5939_v3 = vrot.slane %v5936_v8, %v2274_v49 }
 0x492   : > { %v2213_v62 = vmax.f32 %v2181_v61, 0.0  ;;  %v2179_v30 = vadd.f32 %v2139_v17, %v1840_v58 }
 0x494   : > { %v2211_v63 = vmax.f32 %v2179_v30, 0.0  ;;  %v2229_v46 = vpack.c.bf16 %v2213_v62, %v2212_v41 }
 0x496   : > { %v2228_v33 = vpack.c.bf16 %v2211_v63, %v2210_v20 }
 0x498   : > { %2580 = vmatmul.mubr.bf16.gmra.mxu0 %v2228_v33  ;;  %4353 = vmatprep.mubr.bf16.mxu1 %v2228_v33 }
 0x499   : > { %4354 = vmatmul.mubr.bf16.gmra.mxu1 %v2229_v46  ;;  %2589 = vmatprep.mubr.bf16.mxu0 %v4981_v15 }
 0x49a   : > { %2949 = vmatprep.mubr.bf16.mxu1 %v4981_v15 }
 0x4a0   : > { %2590 = vmatmul.mubr.bf16.gmra.mxu0 %v2229_v46 }
 0x4e9   : > { %v4327_v19 = vpop.f32.mrf.mxu1 }
 0x4ea   : > { %v2643_v27 = vadd.f32 %v4327_v19, %v5939_v3 }
 0x4eb   : > { %v2634_v47 = vpop.f32.mrf.mxu1 }
 0x4ec   : > { %v2635_v23 = vadd.f32 %v2634_v47, %v5939_v3  ;;  %v2763_v39 = vmax.f32 %v2643_v27, 0.0 }
 0x4ed   : > { %v4328_v0 = vpop.f32.mrf.mxu1 }
 0x4ee   : > { %v2761_v1 = vmax.f32 %v2635_v23, 0.0  ;;  %v2646_v60 = vadd.f32 %v4328_v0, %v5939_v3 }
 0x4ef   : > { %v2637_v6 = vpop.f32.mrf.mxu1 }
 0x4f0   : > { %v2638_v34 = vadd.f32 %v2637_v6, %v5939_v3  ;;  %v2764_v14 = vmax.f32 %v2646_v60, 0.0 }
 0x4f2   : > { %v2762_v24 = vmax.f32 %v2638_v34, 0.0  ;;  %v2794_v25 = vpack.c.bf16 %v2764_v14, %v2763_v39 }
 0x4f4   : > { %v2793_v42 = vpack.c.bf16 %v2762_v24, %v2761_v1  ;;  %v5967_v24 = vpop.f32.mrf.mxu0 }
 0x4f6   : > { %2950 = vmatmul.mubr.bf16.vlgmr.msra.gmra.mxu1 %v2793_v42  ;;  %v5972_v14 = vpop.f32.mrf.mxu0 }
 0x4f7   : > { %2959 = vmatprep.mubr.bf16.mxu1 %v4981_v15 }
 0x4f9   : > { %v4331_v16 = vpop.f32.mrf.mxu1 }
 0x4fa   : > { %v2659_v11 = vadd.f32 %v4331_v16, %v5939_v3 }
 0x4fb   : > { %v2650_v51 = vpop.f32.mrf.mxu1 }
 0x4fc   : > { %v2651_v21 = vadd.f32 %v2650_v51, %v5939_v3  ;;  %v2767_v18 = vmax.f32 %v2659_v11, 0.0 }
 0x4fd   : > { %v4332_v4 = vpop.f32.mrf.mxu1 }
 0x4fe   : > { %2960 = vmatmul.mubr.bf16.gmra.mxu1 %v2794_v25  ;;  %v2765_v53 = vmax.f32 %v2651_v21, 0.0  ;;  %v2662_v55 = vadd.f32 %v4332_v4, %v5939_v3  ;;  %v5974_v4 = vpop.f32.mrf.mxu0 }
 0x4ff   : > { %v2653_v26 = vpop.f32.mrf.mxu1  ;;  %2969 = vmatprep.mubr.bf16.mxu1 %v4981_v15 }
 0x500   : > { %v2654_v44 = vadd.f32 %v2653_v26, %v5939_v3  ;;  %v2768_v29 = vmax.f32 %v2662_v55, 0.0 }
 0x502   : > { %v2766_v9 = vmax.f32 %v2654_v44, 0.0  ;;  %v2796_v2 = vpack.c.bf16 %v2768_v29, %v2767_v18 }
 0x504   : > { %v2795_v57 = vpack.c.bf16 %v2766_v9, %v2765_v53  ;;  %v5978_v9 = vpop.f32.mrf.mxu0 }
 0x506   : > { %2970 = vmatmul.mubr.bf16.gmra.mxu1 %v2795_v57  ;;  %v5981_v29 = vpop.f32.mrf.mxu0 }
 0x507   : > { %2979 = vmatprep.mubr.bf16.mxu1 %v4981_v15 }
 0x509   : > { %v4335_v5 = vpop.f32.mrf.mxu1 }
 0x50a   : > { %v2675_v52 = vadd.f32 %v4335_v5, %v5939_v3 }
 0x50b   : > { %v2666_v59 = vpop.f32.mrf.mxu1 }
 0x50c   : > { %v2667_v54 = vadd.f32 %v2666_v59, %v5939_v3  ;;  %v2771_v43 = vmax.f32 %v2675_v52, 0.0 }
 0x50d   : > { %v4336_v38 = vpop.f32.mrf.mxu1 }
 0x50e   : > { %2980 = vmatmul.mubr.bf16.gmra.mxu1 %v2796_v2  ;;  %v2769_v37 = vmax.f32 %v2667_v54, 0.0  ;;  %v2678_v22 = vadd.f32 %v4336_v38, %v5939_v3  ;;  %v5986_v2 = vpop.f32.mrf.mxu0 }
 0x50f   : > { %v2669_v10 = vpop.f32.mrf.mxu1  ;;  %2989 = vmatprep.mubr.bf16.mxu1 %v4981_v15 }
 0x510   : > { %v2670_v40 = vadd.f32 %v2669_v10, %v5939_v3  ;;  %v2772_v31 = vmax.f32 %v2678_v22, 0.0 }
 0x512   : > { %v2770_v36 = vmax.f32 %v2670_v40, 0.0  ;;  %v2798_v7 = vpack.c.bf16 %v2772_v31, %v2771_v43 }
 0x514   : > { %v2797_v32 = vpack.c.bf16 %v2770_v36, %v2769_v37  ;;  %v5988_v37 = vpop.f32.mrf.mxu0 }
 0x516   : > { %2990 = vmatmul.mubr.bf16.gmra.mxu1 %v2797_v32  ;;  %v5992_v31 = vpop.f32.mrf.mxu0 }
 0x517   : > { %2999 = vmatprep.mubr.bf16.mxu1 %v4981_v15 }
 0x519   : > { %v4339_v56 = vpop.f32.mrf.mxu1 }
 0x51a   : > { %v2691_v20 = vadd.f32 %v4339_v56, %v5939_v3 }
 0x51b   : > { %v2682_v48 = vpop.f32.mrf.mxu1 }
 0x51c   : > { %v2683_v58 = vadd.f32 %v2682_v48, %v5939_v3  ;;  %v2775_v33 = vmax.f32 %v2691_v20, 0.0 }
 0x51d   : > { %v4340_v35 = vpop.f32.mrf.mxu1 }
 0x51e   : > { %3000 = vmatmul.mubr.bf16.gmra.mxu1 %v2798_v7  ;;  %v2773_v17 = vmax.f32 %v2683_v58, 0.0  ;;  %v2694_v62 = vadd.f32 %v4340_v35, %v5939_v3  ;;  %v5995_v7 = vpop.f32.mrf.mxu0 }
 0x51f   : > { %v2685_v13 = vpop.f32.mrf.mxu1  ;;  %3009 = vmatprep.mubr.bf16.mxu1 %v4981_v15 }
 0x520   : > { %v2686_v61 = vadd.f32 %v2685_v13, %v5939_v3  ;;  %v2776_v63 = vmax.f32 %v2694_v62, 0.0 }
 0x522   : > { %v2774_v41 = vmax.f32 %v2686_v61, 0.0  ;;  %v2800_v19 = vpack.c.bf16 %v2776_v63, %v2775_v33  ;;  %v6000_v61 = vpop.f32.mrf.mxu0 }
 0x524   : > { %v2799_v30 = vpack.c.bf16 %v2774_v41, %v2773_v17  ;;  %v6002_v20 = vpop.f32.mrf.mxu0 }
 0x526   : > { %3010 = vmatmul.mubr.bf16.gmra.mxu1 %v2799_v30 }
 0x527   : > { %3019 = vmatprep.mubr.bf16.mxu1 %v4981_v15 }
 0x529   : > { %v4343_v46 = vpop.f32.mrf.mxu1 }
 0x52a   : > { %v2707_v27 = vadd.f32 %v4343_v46, %v5939_v3 }
 0x52b   : > { %v2698_v49 = vpop.f32.mrf.mxu1 }
 0x52c   : > { %v2699_v0 = vadd.f32 %v2698_v49, %v5939_v3  ;;  %v2779_v51 = vmax.f32 %v2707_v27, 0.0 }
 0x52d   : > { %v4344_v47 = vpop.f32.mrf.mxu1 }
 0x52e   : > { %3020 = vmatmul.mubr.bf16.gmra.mxu1 %v2800_v19  ;;  %v2777_v34 = vmax.f32 %v2699_v0, 0.0  ;;  %v2710_v60 = vadd.f32 %v4344_v47, %v5939_v3  ;;  %v6006_v19 = vpop.f32.mrf.mxu0 }
 0x52f   : > { %v2701_v23 = vpop.f32.mrf.mxu1  ;;  %3029 = vmatprep.mubr.bf16.mxu1 %v4981_v15 }
 0x530   : > { %v2702_v6 = vadd.f32 %v2701_v23, %v5939_v3  ;;  %v2780_v16 = vmax.f32 %v2710_v60, 0.0 }
 0x532   : > { %v2778_v1 = vmax.f32 %v2702_v6, 0.0  ;;  %v2802_v21 = vpack.c.bf16 %v2780_v16, %v2779_v51  ;;  %v6009_v6 = vpop.f32.mrf.mxu0 }
 0x534   : > { %v2801_v42 = vpack.c.bf16 %v2778_v1, %v2777_v34 }
 0x536   : > { %3030 = vmatmul.mubr.bf16.gmra.mxu1 %v2801_v42  ;;  %v6014_v42 = vpop.f32.mrf.mxu0 }
 0x537   : > { %3039 = vmatprep.mubr.bf16.mxu1 %v4981_v15 }
 0x539   : > { %v4347_v39 = vpop.f32.mrf.mxu1 }
 0x53a   : > { %v2723_v59 = vadd.f32 %v4347_v39, %v5939_v3  ;;  %v6016_v39 = vpop.f32.mrf.mxu0 }
 0x53b   : > { %v2714_v25 = vpop.f32.mrf.mxu1 }
 0x53c   : > { %v2715_v44 = vadd.f32 %v2714_v25, %v5939_v3  ;;  %v2783_v10 = vmax.f32 %v2723_v59, 0.0  ;;  %v6018_v25 = vpop.f32.mrf.mxu0 }
 0x53d   : > { %v4348_v26 = vpop.f32.mrf.mxu1 }
 0x53e   : > { %3040 = vmatmul.mubr.bf16.gmra.mxu1 %v2802_v21  ;;  %v2781_v57 = vmax.f32 %v2715_v44, 0.0  ;;  %v2726_v5 = vadd.f32 %v4348_v26, %v5939_v3  ;;  %v6020_v21 = vpop.f32.mrf.mxu0 }
 0x53f   : > { %v2717_v53 = vpop.f32.mrf.mxu1  ;;  %3049 = vmatprep.mubr.bf16.mxu1 %v4981_v15 }
 0x540   : > { %v2718_v55 = vadd.f32 %v2717_v53, %v5939_v3  ;;  %v2784_v38 = vmax.f32 %v2726_v5, 0.0  ;;  %v6022_v26 = vpop.f32.mrf.mxu0 }
 0x542   : > { %v2782_v11 = vmax.f32 %v2718_v55, 0.0  ;;  %v2804_v36 = vpack.c.bf16 %v2784_v38, %v2783_v10  ;;  %v6024_v44 = vpop.f32.mrf.mxu0 }
 0x544   : > { %v2803_v18 = vpack.c.bf16 %v2782_v11, %v2781_v57 }
 0x546   : > { %3050 = vmatmul.mubr.bf16.gmra.mxu1 %v2803_v18 }
 0x547   : > { %3059 = vmatprep.mubr.bf16.mxu1 %v4981_v15 }
 0x549   : > { %v4351_v54 = vpop.f32.mrf.mxu1 }
 0x54a   : > { %v2739_v13 = vadd.f32 %v4351_v54, %v5939_v3 }
 0x54b   : > { %v2730_v40 = vpop.f32.mrf.mxu1 }
 0x54c   : > { %v2731_v32 = vadd.f32 %v2730_v40, %v5939_v3  ;;  %v2787_v62 = vmax.f32 %v2739_v13, 0.0 }
 0x54d   : > { %v4352_v22 = vpop.f32.mrf.mxu1 }
 0x54e   : > { %3060 = vmatmul.mubr.bf16.gmra.mxu1 %v2804_v36  ;;  %v2785_v43 = vmax.f32 %v2731_v32, 0.0  ;;  %v2742_v35 = vadd.f32 %v4352_v22, %v5939_v3  ;;  %v2825_v36 = vld [vmem:[%s6669_s14] sm:$0x3]  ;;  %v6057_v22 = vrot.slane %v5936_v8, %v5815_v50 }
 0x54f   : > { %v2733_v52 = vpop.f32.mrf.mxu1  ;;  %3069 = vmatprep.mubr.bf16.mxu1 %v4981_v15  ;;  %v6060_v32 = vrot.slane %v2825_v36, %v5815_v50 }
 0x550   : > { %v2734_v56 = vadd.f32 %v2733_v52, %v5939_v3  ;;  %v2788_v17 = vmax.f32 %v2742_v35, 0.0  ;;  %v2442_v35 = vadd.f32 %v5967_v24, %v6057_v22 }
 0x552   : > { %v2786_v48 = vmax.f32 %v2734_v56, 0.0  ;;  %v2806_v63 = vpack.c.bf16 %v2788_v17, %v2787_v62  ;;  %v6066_v56 = vrot.slane %v5936_v8, %v5627_v12  ;;  %v2446_v62 = vadd.f32 %v5974_v4, %v6057_v22 }
 0x554   : > { %v2805_v58 = vpack.c.bf16 %v2786_v48, %v2785_v43  ;;  %v6069_v43 = vrot.slane %v2825_v36, %v5627_v12  ;;  %v2444_v17 = vadd.f32 %v5972_v14, %v6066_v56 }
 0x556   : > { %3070 = vmatmul.mubr.bf16.gmra.mxu1 %v2805_v58 }
 0x557   : > { %3079 = vmatprep.mubr.bf16.mxu1 %v4981_v15 }
 0x559   : > { %v4355_v41 = vpop.f32.mrf.mxu1 }
 0x55a   : > { %v2755_v60 = vadd.f32 %v4355_v41, %v5939_v3 }
 0x55b   : > { %v2746_v30 = vpop.f32.mrf.mxu1 }
 0x55c   : > { %v2747_v33 = vadd.f32 %v2746_v30, %v5939_v3  ;;  %v2791_v16 = vmax.f32 %v2755_v60, 0.0 }
 0x55d   : > { %v4356_v46 = vpop.f32.mrf.mxu1 }
 0x55e   : > { %3080 = vmatmul.mubr.bf16.gmra.mxu1 %v2806_v63  ;;  %v2789_v0 = vmax.f32 %v2747_v33, 0.0  ;;  %v2758_v34 = vadd.f32 %v4356_v46, %v5939_v3  ;;  %v2448_v63 = vadd.f32 %v5978_v9, %v6066_v56 }
 0x55f   : > { %v2749_v49 = vpop.f32.mrf.mxu1  ;;  %3089 = vmatprep.mubr.bf16.mxu1 %v4981_v15 }
 0x560   : > { %v2750_v47 = vadd.f32 %v2749_v49, %v5939_v3  ;;  %v2792_v27 = vmax.f32 %v2758_v34, 0.0  ;;  %v6026_v3 = vpop.f32.mrf.mxu0  ;;  %v2452_v34 = vadd.f32 %v5981_v29, %v6057_v22 }
 0x562   : > { %v2790_v23 = vmax.f32 %v2750_v47, 0.0  ;;  %v2808_v51 = vpack.c.bf16 %v2792_v27, %v2791_v16  ;;  %v6028_v53 = vpop.f32.mrf.mxu0  ;;  %v2454_v27 = vadd.f32 %v5986_v2, %v6066_v56 }
 0x564   : > { %v2807_v1 = vpack.c.bf16 %v2790_v23, %v2789_v0 }
 0x566   : > { %3090 = vmatmul.mubr.bf16.gmra.mxu1 %v2807_v1 }
 0x567   : > { %3099 = vmatprep.mubr.bf16.mxu1 %v4981_v15  ;;  %v6030_v15 = vpop.f32.mrf.mxu0 }
 0x569   : > { %v6032_v55 = vpop.f32.mrf.mxu0 }
 0x56b   : > { %v6034_v57 = vpop.f32.mrf.mxu0 }
 0x56d   : > { %v6036_v11 = vpop.f32.mrf.mxu0 }
 0x56e   : > { %3100 = vmatmul.mubr.bf16.gmra.mxu1 %v2808_v51 }
 0x56f   : > { %v6038_v5 = vpop.f32.mrf.mxu0 }
 0x571   : > { %v6040_v18 = vpop.f32.mrf.mxu0 }
 0x573   : > { %v6042_v59 = vpop.f32.mrf.mxu0 }
 0x575   : > { %v6044_v38 = vpop.f32.mrf.mxu0 }
 0x577   : > { %v6046_v54 = vpop.f32.mrf.mxu0 }
 0x579   : > { %v6048_v10 = vpop.f32.mrf.mxu0 }
 0x57b   : > { %v6050_v40 = vpop.f32.mrf.mxu0 }
 0x57d   : > { %v6062_v52 = vpop.f32.mrf.mxu0 }
 0x57f   : > { %v6074_v13 = vpop.f32.mrf.mxu0 }
 0x581   : > { %v6088_v46 = vpop.f32.mrf.mxu0 }
 0x583   : > { %v6096_v9 = vpop.f32.mrf.mxu0 }
 0x5b6   : > { %v2951_v48 = vpop.f32.mrf.mxu1 }
 0x5b7   : > { %v2952_v58 = vadd.f32 %v2951_v48, %v6060_v32 }
 0x5b8   : > { %v2953_v50 = vpop.f32.mrf.mxu1 }
 0x5b9   : > { %v3110_v8 = vadd.f32 %v2952_v58, %v2442_v35  ;;  %v2954_v41 = vadd.f32 %v2953_v50, %v6069_v43  ;;  %v2456_v35 = vadd.f32 %v5988_v37, %v6057_v22 }
 0x5ba   : > { %v2955_v12 = vpop.f32.mrf.mxu1 }
 0x5bb   : > { %v3111_v24 = vadd.f32 %v2954_v41, %v2444_v17  ;;  %v2956_v30 = vadd.f32 %v2955_v12, %v6060_v32  ;;  %v3174_v49 = vmax.f32 %v3110_v8, 0.0  ;;  %v2458_v41 = vadd.f32 %v5992_v31, %v6066_v56  ;;  %v6107_v12 = vpop.f32.mrf.mxu0 }
 0x5bc   : > { %v2957_v33 = vpop.f32.mrf.mxu1 }
 0x5bd   : > { %v3175_v47 = vmax.f32 %v3111_v24, 0.0  ;;  %v3112_v14 = vadd.f32 %v2956_v30, %v2446_v62  ;;  %v2958_v0 = vadd.f32 %v2957_v33, %v6069_v43 }
 0x5be   : > { %v2961_v23 = vpop.f32.mrf.mxu1 }
 0x5bf   : > { %v4038_v4 = vpack.c.bf16 %v3175_v47, %v3174_v49  ;;  %v3113_v1 = vadd.f32 %v2958_v0, %v2448_v63  ;;  %v2962_v60 = vadd.f32 %v2961_v23, %v6060_v32  ;;  %v3176_v51 = vmax.f32 %v3112_v14, 0.0 }
 0x5c0   : > { %v2963_v16 = vpop.f32.mrf.mxu1 }
 0x5c1   : > { %3430 = vst [vmem:[%s6098_s23] sm:$0xff] %v4038_v4  ;;  %v3177_v36 = vmax.f32 %v3113_v1, 0.0  ;;  %v3114_v48 = vadd.f32 %v2962_v60, %v2452_v34  ;;  %v2964_v29 = vadd.f32 %v2963_v16, %v6069_v43  ;;  %v2462_v4 = vadd.f32 %v5995_v7, %v6057_v22  ;;  %v6113_v1 = vpop.f32.mrf.mxu0 }
 0x5c2   : > { %v2965_v58 = vpop.f32.mrf.mxu1 }
 0x5c3   : > { %v4039_v50 = vpack.c.bf16 %v3177_v36, %v3176_v51  ;;  %v3178_v17 = vmax.f32 %v3114_v48, 0.0  ;;  %v3115_v2 = vadd.f32 %v2964_v29, %v2454_v27  ;;  %v2966_v8 = vadd.f32 %v2965_v58, %v6060_v32 }
 0x5c4   : > { %v2967_v62 = vpop.f32.mrf.mxu1 }
 0x5c5   : > { %3431 = vst [vmem:[%s6098_s23 + $0x8] sm:$0xff] %v4039_v50  ;;  %v3470_v24 = vmax.f32 %v3174_v49, %v3178_v17  ;;  %v3179_v30 = vmax.f32 %v3115_v2, 0.0  ;;  %v3116_v63 = vadd.f32 %v2966_v8, %v2456_v35  ;;  %v2968_v33 = vadd.f32 %v2967_v62, %v6069_v43  ;;  %v6123_v2 = vpop.f32.mrf.mxu0 }
 0x5c6   : > { %v2971_v37 = vpop.f32.mrf.mxu1  ;;  %v2464_v49 = vadd.f32 %v6000_v61, %v6066_v56 }
 0x5c7   : > { %v4040_v14 = vpack.c.bf16 %v3179_v30, %v3178_v17  ;;  %v3501_v0 = vmax.f32 %v3175_v47, %v3179_v30  ;;  %v3180_v23 = vmax.f32 %v3116_v63, 0.0  ;;  %v3117_v34 = vadd.f32 %v2968_v33, %v2458_v41 }
 0x5c8   : > { %v2972_v31 = vadd.f32 %v2971_v37, %v6060_v32  ;;  %v2973_v60 = vpop.f32.mrf.mxu1  ;;  %v2466_v47 = vadd.f32 %v6002_v20, %v6057_v22 }
 0x5c9   : > { %3432 = vst [vmem:[%s6098_s23 + $0x10] sm:$0xff] %v4040_v14  ;;  %v3471_v27 = vmax.f32 %v3176_v51, %v3180_v23  ;;  %v3181_v16 = vmax.f32 %v3117_v34, 0.0  ;;  %v2974_v48 = vadd.f32 %v2973_v60, %v6069_v43  ;;  %v2468_v51 = vadd.f32 %v6006_v19, %v6066_v56  ;;  %v6131_v34 = vpop.f32.mrf.mxu0 }
 0x5ca   : > { %v3118_v29 = vadd.f32 %v2972_v31, %v2462_v4  ;;  %v2975_v35 = vpop.f32.mrf.mxu1  ;;  %v2474_v31 = vadd.f32 %v6014_v42, %v6066_v56 }
 0x5cb   : > { %v4041_v7 = vpack.c.bf16 %v3181_v16, %v3180_v23  ;;  %v3502_v58 = vmax.f32 %v3177_v36, %v3181_v16  ;;  %v3119_v50 = vadd.f32 %v2974_v48, %v2464_v49  ;;  %v2976_v17 = vadd.f32 %v2975_v35, %v6060_v32 }
 0x5cc   : > { %v3182_v8 = vmax.f32 %v3118_v29, 0.0  ;;  %v2977_v61 = vpop.f32.mrf.mxu1  ;;  %v2472_v23 = vadd.f32 %v6009_v6, %v6057_v22 }
 0x5cd   : > { %3433 = vst [vmem:[%s6098_s23 + $0x18] sm:$0xff] %v4041_v7  ;;  %v3183_v41 = vmax.f32 %v3119_v50, 0.0  ;;  %v3120_v62 = vadd.f32 %v2976_v17, %v2466_v47  ;;  %v2978_v20 = vadd.f32 %v2977_v61, %v6069_v43  ;;  %v6141_v7 = vpop.f32.mrf.mxu0 }
 0x5ce   : > { %v3472_v30 = vmax.f32 %v3470_v24, %v3182_v8  ;;  %v2981_v63 = vpop.f32.mrf.mxu1 }
 0x5cf   : > { %v4042_v33 = vpack.c.bf16 %v3183_v41, %v3182_v8  ;;  %v3503_v36 = vmax.f32 %v3501_v0, %v3183_v41  ;;  %v3184_v37 = vmax.f32 %v3120_v62, 0.0  ;;  %v3121_v14 = vadd.f32 %v2978_v20, %v2468_v51 }
 0x5d0   : > { %v2982_v4 = vadd.f32 %v2981_v63, %v6060_v32  ;;  %v2983_v19 = vpop.f32.mrf.mxu1  ;;  %v2476_v0 = vadd.f32 %v6016_v39, %v6057_v22  ;;  %v2482_v63 = vadd.f32 %v6020_v21, %v6057_v22 }
 0x5d1   : > { %3434 = vst [vmem:[%s6098_s23 + $0x20] sm:$0xff] %v4042_v33  ;;  %v3473_v60 = vmax.f32 %v3471_v27, %v3184_v37  ;;  %v3185_v24 = vmax.f32 %v3121_v14, 0.0  ;;  %v2984_v49 = vadd.f32 %v2983_v19, %v6069_v43  ;;  %v2478_v27 = vadd.f32 %v6018_v25, %v6066_v56  ;;  %v6149_v33 = vpop.f32.mrf.mxu0 }
 0x5d2   : > { %v3122_v16 = vadd.f32 %v2982_v4, %v2472_v23  ;;  %v2985_v48 = vpop.f32.mrf.mxu1  ;;  %v2484_v14 = vadd.f32 %v6022_v26, %v6066_v56 }
 0x5d3   : > { %v4043_v6 = vpack.c.bf16 %v3185_v24, %v3184_v37  ;;  %v3504_v47 = vmax.f32 %v3502_v58, %v3185_v24  ;;  %v3123_v29 = vadd.f32 %v2984_v49, %v2474_v31  ;;  %v2986_v35 = vadd.f32 %v2985_v48, %v6060_v32 }
 0x5d4   : > { %v3186_v50 = vmax.f32 %v3122_v16, 0.0  ;;  %v2987_v42 = vpop.f32.mrf.mxu1  ;;  %v6159_v16 = vpop.f32.mrf.mxu0 }
 0x5d5   : > { %3435 = vst [vmem:[%s6098_s23 + $0x28] sm:$0xff] %v4043_v6  ;;  %v3187_v17 = vmax.f32 %v3123_v29, 0.0  ;;  %v3124_v8 = vadd.f32 %v2986_v35, %v2476_v0  ;;  %v2988_v39 = vadd.f32 %v2987_v42, %v6069_v43 }
 0x5d6   : > { %v3474_v61 = vmax.f32 %v3472_v30, %v3186_v50  ;;  %v2991_v51 = vpop.f32.mrf.mxu1 }
 0x5d7   : > { %v4044_v41 = vpack.c.bf16 %v3187_v17, %v3186_v50  ;;  %v3505_v58 = vmax.f32 %v3503_v36, %v3187_v17  ;;  %v3188_v62 = vmax.f32 %v3124_v8, 0.0  ;;  %v3125_v20 = vadd.f32 %v2988_v39, %v2478_v27  ;;  %v6167_v39 = vpop.f32.mrf.mxu0 }
 0x5d8   : > { %v2992_v37 = vadd.f32 %v2991_v51, %v6060_v32  ;;  %v2993_v25 = vpop.f32.mrf.mxu1  ;;  %v2486_v36 = vadd.f32 %v6024_v44, %v6057_v22  ;;  %v2492_v8 = vadd.f32 %v6028_v53, %v6057_v22 }
 0x5d9   : > { %3436 = vst [vmem:[%s6098_s23 + $0x30] sm:$0xff] %v4044_v41  ;;  %v3475_v23 = vmax.f32 %v3473_v60, %v3188_v62  ;;  %v3189_v30 = vmax.f32 %v3125_v20, 0.0  ;;  %v2994_v4 = vadd.f32 %v2993_v25, %v6069_v43  ;;  %v2488_v60 = vadd.f32 %v6026_v3, %v6066_v56 }
 0x5da   : > { %v3126_v19 = vadd.f32 %v2992_v37, %v2482_v63  ;;  %v2995_v31 = vpop.f32.mrf.mxu1  ;;  %v2494_v41 = vadd.f32 %v6030_v15, %v6066_v56  ;;  %v2496_v20 = vadd.f32 %v6032_v55, %v6057_v22 }
 0x5db   : > { %v4045_v21 = vpack.c.bf16 %v3189_v30, %v3188_v62  ;;  %v3506_v24 = vmax.f32 %v3504_v47, %v3189_v30  ;;  %v3127_v49 = vadd.f32 %v2994_v4, %v2484_v14  ;;  %v2996_v0 = vadd.f32 %v2995_v31, %v6060_v32  ;;  %v6181_v4 = vpop.f32.mrf.mxu0 }
 0x5dc   : > { %v3190_v48 = vmax.f32 %v3126_v19, 0.0  ;;  %v2997_v26 = vpop.f32.mrf.mxu1 }
 0x5dd   : > { %3437 = vst [vmem:[%s6098_s23 + $0x38] sm:$0xff] %v4045_v21  ;;  %v3191_v6 = vmax.f32 %v3127_v49, 0.0  ;;  %v3128_v29 = vadd.f32 %v2996_v0, %v2486_v36  ;;  %v2998_v44 = vadd.f32 %v2997_v26, %v6069_v43  ;;  %v2502_v26 = vadd.f32 %v6036_v11, %v6057_v22 }
 0x5de   : > { %v3476_v35 = vmax.f32 %v3474_v61, %v3190_v48  ;;  %v3001_v50 = vpop.f32.mrf.mxu1  ;;  %v2506_v11 = vadd.f32 %v6040_v18, %v6057_v22 }
 0x5df   : > { %v4046_v42 = vpack.c.bf16 %v3191_v6, %v3190_v48  ;;  %v3507_v47 = vmax.f32 %v3505_v58, %v3191_v6  ;;  %v3192_v27 = vmax.f32 %v3128_v29, 0.0  ;;  %v3129_v17 = vadd.f32 %v2998_v44, %v2488_v60  ;;  %v6197_v60 = vpop.f32.mrf.mxu0 }
 0x5e0   : > { %v3002_v51 = vadd.f32 %v3001_v50, %v6060_v32  ;;  %v3003_v3 = vpop.f32.mrf.mxu1  ;;  %v2504_v29 = vadd.f32 %v6038_v5, %v6066_v56 }
 0x5e1   : > { %3438 = vst [vmem:[%s6098_s23 + $0x40] sm:$0xff] %v4046_v42  ;;  %v6173_v62 = vmax.f32 %v3475_v23, %v3192_v27  ;;  %v3193_v61 = vmax.f32 %v3129_v17, 0.0  ;;  %v3004_v58 = vadd.f32 %v3003_v3, %v6069_v43  ;;  %v2498_v23 = vadd.f32 %v6034_v57, %v6066_v56 }
 0x5e2   : > { %v3130_v63 = vadd.f32 %v3002_v51, %v2492_v8  ;;  %v3005_v53 = vpop.f32.mrf.mxu1  ;;  %v2508_v8 = vadd.f32 %v6042_v59, %v6066_v56  ;;  %v6219_v51 = vpop.f32.mrf.mxu0 }
 0x5e3   : > { %v4047_v37 = vpack.c.bf16 %v3193_v61, %v3192_v27  ;;  %v6178_v25 = vmax.f32 %v3506_v24, %v3193_v61  ;;  %v3131_v14 = vadd.f32 %v3004_v58, %v2494_v41  ;;  %v3006_v30 = vadd.f32 %v3005_v53, %v6060_v32 }
 0x5e4   : > { %v3194_v15 = vmax.f32 %v3130_v63, 0.0  ;;  %v3007_v36 = vpop.f32.mrf.mxu1  ;;  %v2512_v53 = vadd.f32 %v6044_v38, %v6057_v22  ;;  %v2516_v38 = vadd.f32 %v6048_v10, %v6057_v22 }
 0x5e5   : > { %3439 = vst [vmem:[%s6098_s23 + $0x48] sm:$0xff] %v4047_v37  ;;  %v3195_v19 = vmax.f32 %v3131_v14, 0.0  ;;  %v6186_v31 = vadd.f32 %v3006_v30, %v2496_v20  ;;  %v3008_v55 = vadd.f32 %v3007_v36, %v6069_v43  ;;  %v6235_v37 = vpop.f32.mrf.mxu0 }
 0x5e6   : > { %v6189_v21 = vmax.f32 %v3476_v35, %v3194_v15  ;;  %v3011_v24 = vpop.f32.mrf.mxu1 }
 0x5e7   : > { %v4048_v49 = vpack.c.bf16 %v3195_v19, %v3194_v15  ;;  %v6191_v0 = vmax.f32 %v3507_v47, %v3195_v19  ;;  %v6193_v48 = vadd.f32 %v3008_v55, %v2498_v23  ;;  %v3012_v57 = vadd.f32 %v3011_v24, %v6060_v32 }
 0x5e8   : > { %v3013_v6 = vpop.f32.mrf.mxu1  ;;  %v3196_v44 = vmax.f32 %v6186_v31, 0.0  ;;  %v2514_v15 = vadd.f32 %v6046_v54, %v6066_v56 }
 0x5e9   : > { %3440 = vst [vmem:[%s6098_s23 + $0x50] sm:$0xff] %v4048_v49  ;;  %v3197_v35 = vmax.f32 %v6193_v48, 0.0  ;;  %v3014_v50 = vadd.f32 %v3013_v6, %v6069_v43  ;;  %v6206_v42 = vadd.f32 %v3012_v57, %v2502_v26  ;;  %v2518_v57 = vadd.f32 %v6050_v40, %v6066_v56  ;;  %v6257_v6 = vpop.f32.mrf.mxu0 }
 0x5ea   : > { %v3015_v47 = vpop.f32.mrf.mxu1 }
 0x5eb   : > { %v4049_v27 = vpack.c.bf16 %v3197_v35, %v3196_v44  ;;  %v6214_v17 = vadd.f32 %v3014_v50, %v2504_v29  ;;  %v3016_v5 = vadd.f32 %v3015_v47, %v6060_v32  ;;  %v3198_v41 = vmax.f32 %v6206_v42, 0.0 }
 0x5ec   : > { %v3017_v3 = vpop.f32.mrf.mxu1 }
 0x5ed   : > { %3441 = vst [vmem:[%s6098_s23 + $0x58] sm:$0xff] %v4049_v27  ;;  %v3199_v18 = vmax.f32 %v6214_v17, 0.0  ;;  %v6224_v61 = vadd.f32 %v3016_v5, %v2506_v11  ;;  %v3018_v58 = vadd.f32 %v3017_v3, %v6069_v43  ;;  %v6273_v3 = vpop.f32.mrf.mxu0 }
 0x5ee   : > { %v3021_v20 = vpop.f32.mrf.mxu1 }
 0x5ef   : > { %v4050_v63 = vpack.c.bf16 %v3199_v18, %v3198_v41  ;;  %v6231_v59 = vadd.f32 %v3018_v58, %v2508_v8  ;;  %v3022_v14 = vadd.f32 %v3021_v20, %v6060_v32  ;;  %v6707_v36 = vmax.f32 %v6224_v61, 0.0 }
 0x5f0   : > { %v3023_v30 = vpop.f32.mrf.mxu1  ;;  %v2522_v8 = vadd.f32 %v6062_v52, %v6057_v22  ;;  %v2526_v52 = vadd.f32 %v6088_v46, %v6057_v22  ;;  %v6729_v31 = vmax.f32 %v6224_v61, 0.0 }
 0x5f1   : > { %3442 = vst [vmem:[%s6098_s23 + $0x60] sm:$0xff] %v4050_v63  ;;  %v6702_v23 = vmax.f32 %v6231_v59, 0.0  ;;  %v3024_v19 = vadd.f32 %v3023_v30, %v6069_v43  ;;  %v6244_v55 = vadd.f32 %v3022_v14, %v2512_v53  ;;  %v2524_v63 = vadd.f32 %v6074_v13, %v6066_v56 }
 0x5f2   : > { %v3025_v24 = vpop.f32.mrf.mxu1 }
 0x5f3   : > { %v4051_v49 = vpack.c.bf16 %v6702_v23, %v6707_v36  ;;  %v6252_v26 = vadd.f32 %v3024_v19, %v2514_v15  ;;  %v3026_v54 = vadd.f32 %v3025_v24, %v6060_v32  ;;  %v6701_v50 = vmax.f32 %v6244_v55, 0.0 }
 0x5f4   : > { %v3027_v29 = vpop.f32.mrf.mxu1  ;;  %v6731_v17 = vmax.f32 %v6244_v55, 0.0 }
 0x5f5   : > { %3443 = vst [vmem:[%s6098_s23 + $0x68] sm:$0xff] %v4051_v49  ;;  %v6696_v10 = vmax.f32 %v6252_v26, 0.0  ;;  %v6262_v47 = vadd.f32 %v3026_v54, %v2516_v38  ;;  %v3028_v11 = vadd.f32 %v3027_v29, %v6069_v43  ;;  %v2528_v49 = vadd.f32 %v6096_v9, %v6066_v56  ;;  %v6295_v54 = vpop.f32.mrf.mxu0 }
 0x5f6   : > { %v3031_v27 = vpop.f32.mrf.mxu1 }
 0x5f7   : > { %v4052_v5 = vpack.c.bf16 %v6696_v10, %v6701_v50  ;;  %v6269_v40 = vadd.f32 %v3028_v11, %v2518_v57  ;;  %v3032_v58 = vadd.f32 %v3031_v27, %v6060_v32  ;;  %v6695_v53 = vmax.f32 %v6262_v47, 0.0 }
 0x5f8   : > { %v3033_v20 = vpop.f32.mrf.mxu1  ;;  %v6733_v61 = vmax.f32 %v6262_v47, 0.0 }
 0x5f9   : > { %3444 = vst [vmem:[%s6098_s23 + $0x70] sm:$0xff] %v4052_v5  ;;  %v6692_v14 = vmax.f32 %v6269_v40, 0.0  ;;  %v3034_v30 = vadd.f32 %v3033_v20, %v6069_v43  ;;  %v6282_v15 = vadd.f32 %v3032_v58, %v2522_v8  ;;  %v2532_v58 = vadd.f32 %v6107_v12, %v6057_v22  ;;  %v6311_v20 = vpop.f32.mrf.mxu0 }
 0x5fa   : > { %v3035_v19 = vpop.f32.mrf.mxu1  ;;  %v2536_v12 = vadd.f32 %v6123_v2, %v6057_v22 }
 0x5fb   : > { %v4053_v24 = vpack.c.bf16 %v6692_v14, %v6695_v53  ;;  %v6290_v38 = vadd.f32 %v3034_v30, %v2524_v63  ;;  %v3036_v13 = vadd.f32 %v3035_v19, %v6060_v32  ;;  %v6689_v29 = vmax.f32 %v6282_v15, 0.0 }
 0x5fc   : > { %v3037_v57 = vpop.f32.mrf.mxu1  ;;  %v2534_v19 = vadd.f32 %v6113_v1, %v6066_v56 }
 0x5fd   : > { %3445 = vst [vmem:[%s6098_s23 + $0x78] sm:$0xff] %v4053_v24  ;;  %v6686_v46 = vmax.f32 %v6290_v38, 0.0  ;;  %v6300_v11 = vadd.f32 %v3036_v13, %v2526_v52  ;;  %v3038_v27 = vadd.f32 %v3037_v57, %v6069_v43  ;;  %v6736_v47 = vmax.f32 %v6290_v38, 0.0 }
 0x5fe   : > { %v3041_v5 = vpop.f32.mrf.mxu1 }
 0x5ff   : > { %v4054_v8 = vpack.c.bf16 %v6686_v46, %v6689_v29  ;;  %v6307_v9 = vadd.f32 %v3038_v27, %v2528_v49  ;;  %v3042_v63 = vadd.f32 %v3041_v5, %v6060_v32  ;;  %v6685_v52 = vmax.f32 %v6300_v11, 0.0 }
 0x600   : > { %v3043_v30 = vpop.f32.mrf.mxu1 }
 0x601   : > { %3446 = vst [vmem:[%s6098_s23 + $0x80] sm:$0xff] %v4054_v8  ;;  %v6684_v24 = vmax.f32 %v6307_v9, 0.0  ;;  %v3044_v13 = vadd.f32 %v3043_v30, %v6069_v43  ;;  %v6320_v49 = vadd.f32 %v3042_v63, %v2532_v58  ;;  %v2538_v8 = vadd.f32 %v6131_v34, %v6066_v56  ;;  %v6333_v30 = vpop.f32.mrf.mxu0 }
 0x602   : > { %v3045_v57 = vpop.f32.mrf.mxu1 }
 0x603   : > { %v4055_v27 = vpack.c.bf16 %v6684_v24, %v6685_v52  ;;  %v6328_v5 = vadd.f32 %v3044_v13, %v2534_v19  ;;  %v3046_v1 = vadd.f32 %v3045_v57, %v6060_v32  ;;  %v6688_v63 = vmax.f32 %v6320_v49, 0.0 }
 0x604   : > { %v3047_v58 = vpop.f32.mrf.mxu1  ;;  %v2542_v57 = vadd.f32 %v6141_v7, %v6057_v22  ;;  %v2546_v7 = vadd.f32 %v6159_v16, %v6057_v22 }
 0x605   : > { %3447 = vst [vmem:[%s6098_s23 + $0x88] sm:$0xff] %v4055_v27  ;;  %v6687_v2 = vmax.f32 %v6328_v5, 0.0  ;;  %v6338_v28 = vadd.f32 %v3046_v1, %v2536_v12  ;;  %v3048_v24 = vadd.f32 %v3047_v58, %v6069_v43  ;;  %v6349_v27 = vpop.f32.mrf.mxu0  ;;  %v2544_v1 = vadd.f32 %v6149_v33, %v6066_v56 }
 0x606   : > { %v3051_v19 = vpop.f32.mrf.mxu1  ;;  %v6740_v38 = vmax.f32 %v6328_v5, 0.0 }
 0x607   : > { %v4056_v13 = vpack.c.bf16 %v6687_v2, %v6688_v63  ;;  %v6345_v34 = vadd.f32 %v3048_v24, %v2538_v8  ;;  %v3052_v52 = vadd.f32 %v3051_v19, %v6060_v32  ;;  %v6691_v58 = vmax.f32 %v6338_v28, 0.0 }
 0x608   : > { %v3053_v12 = vpop.f32.mrf.mxu1 }
 0x609   : > { %3448 = vst [vmem:[%s6098_s23 + $0x90] sm:$0xff] %v4056_v13  ;;  %v6690_v46 = vmax.f32 %v6345_v34, 0.0  ;;  %v3054_v24 = vadd.f32 %v3053_v12, %v6069_v43  ;;  %v6358_v8 = vadd.f32 %v3052_v52, %v2542_v57  ;;  %v2548_v13 = vadd.f32 %v6167_v39, %v6066_v56  ;;  %v6371_v12 = vpop.f32.mrf.mxu0 }
 0x60a   : > { %v3055_v2 = vpop.f32.mrf.mxu1 }
 0x60b   : > { %v4057_v19 = vpack.c.bf16 %v6690_v46, %v6691_v58  ;;  %v6366_v63 = vadd.f32 %v3054_v24, %v2544_v1  ;;  %v3056_v33 = vadd.f32 %v3055_v2, %v6060_v32  ;;  %v6694_v57 = vmax.f32 %v6358_v8, 0.0 }
 0x60c   : > { %v3057_v52 = vpop.f32.mrf.mxu1  ;;  %v2552_v24 = vadd.f32 %v6181_v4, %v6057_v22  ;;  %v2556_v4 = vadd.f32 %v6219_v51, %v6057_v22 }
 0x60d   : > { %3449 = vst [vmem:[%s6098_s23 + $0x98] sm:$0xff] %v4057_v19  ;;  %v6693_v16 = vmax.f32 %v6366_v63, 0.0  ;;  %v6376_v29 = vadd.f32 %v3056_v33, %v2546_v7  ;;  %v3058_v46 = vadd.f32 %v3057_v52, %v6069_v43  ;;  %v6387_v19 = vpop.f32.mrf.mxu0  ;;  %v2554_v33 = vadd.f32 %v6197_v60, %v6066_v56 }
 0x60e   : > { %v3061_v1 = vpop.f32.mrf.mxu1 }
 0x60f   : > { %v4058_v2 = vpack.c.bf16 %v6693_v16, %v6694_v57  ;;  %v6383_v39 = vadd.f32 %v3058_v46, %v2548_v13  ;;  %v3062_v58 = vadd.f32 %v3061_v1, %v6060_v32  ;;  %v6698_v52 = vmax.f32 %v6376_v29, 0.0 }
 0x610   : > { %v3063_v7 = vpop.f32.mrf.mxu1 }
 0x611   : > { %3450 = vst [vmem:[%s6098_s23 + $0xa0] sm:$0xff] %v4058_v2  ;;  %v6697_v14 = vmax.f32 %v6383_v39, 0.0  ;;  %v3064_v46 = vadd.f32 %v3063_v7, %v6069_v43  ;;  %v6396_v13 = vadd.f32 %v3062_v58, %v2552_v24  ;;  %v2558_v2 = vadd.f32 %v6235_v37, %v6066_v56  ;;  %v2581_v7 = vpop.f32.mrf.mxu0 }
 0x612   : > { %v3065_v16 = vpop.f32.mrf.mxu1  ;;  %v2562_v37 = vadd.f32 %v6257_v6, %v6057_v22  ;;  %v2566_v6 = vadd.f32 %v6295_v54, %v6057_v22 }
 0x613   : > { %v4059_v1 = vpack.c.bf16 %v6697_v14, %v6698_v52  ;;  %v6404_v57 = vadd.f32 %v3064_v46, %v2554_v33  ;;  %v3066_v60 = vadd.f32 %v3065_v16, %v6060_v32  ;;  %v6700_v24 = vmax.f32 %v6396_v13, 0.0  ;;  %v2583_v46 = vpop.f32.mrf.mxu0 }
 0x614   : > { %v3067_v58 = vpop.f32.mrf.mxu1  ;;  %v2584_v36 = vadd.f32 %v2583_v46, %v6066_v56 }
 0x615   : > { %3451 = vst [vmem:[%s6098_s23 + $0xa8] sm:$0xff] %v4059_v1  ;;  %v6699_v51 = vmax.f32 %v6404_v57, 0.0  ;;  %v6412_v53 = vadd.f32 %v3066_v60, %v2556_v4  ;;  %v3068_v10 = vadd.f32 %v3067_v58, %v6069_v43  ;;  %v2564_v4 = vadd.f32 %v6273_v3, %v6066_v56 }
 0x616   : > { %v3071_v14 = vpop.f32.mrf.mxu1 }
 0x617   : > { %v4060_v16 = vpack.c.bf16 %v6699_v51, %v6700_v24  ;;  %v6419_v33 = vadd.f32 %v3068_v10, %v2558_v2  ;;  %v3072_v1 = vadd.f32 %v3071_v14, %v6060_v32  ;;  %v6704_v60 = vmax.f32 %v6412_v53, 0.0 }
 0x618   : > { %v3073_v52 = vpop.f32.mrf.mxu1 }
 0x619   : > { %3452 = vst [vmem:[%s6098_s23 + $0xb0] sm:$0xff] %v4060_v16  ;;  %v6703_v58 = vmax.f32 %v6419_v33, 0.0  ;;  %v3074_v51 = vadd.f32 %v3073_v52, %v6069_v43  ;;  %v6430_v10 = vadd.f32 %v3072_v1, %v2562_v37  ;;  %v2568_v16 = vadd.f32 %v6311_v20, %v6066_v56  ;;  %v2585_v52 = vpop.f32.mrf.mxu0 }
 0x61a   : > { %v3075_v2 = vpop.f32.mrf.mxu1  ;;  %v2572_v20 = vadd.f32 %v6333_v30, %v6057_v22  ;;  %v2586_v46 = vadd.f32 %v2585_v52, %v6057_v22 }
 0x61b   : > { %v4061_v14 = vpack.c.bf16 %v6703_v58, %v6704_v60  ;;  %v6438_v24 = vadd.f32 %v3074_v51, %v2564_v4  ;;  %v3076_v3 = vadd.f32 %v3075_v2, %v6060_v32  ;;  %v6706_v1 = vmax.f32 %v6430_v10, 0.0  ;;  %v2587_v2 = vpop.f32.mrf.mxu0 }
 0x61c   : > { %v3077_v37 = vpop.f32.mrf.mxu1 }
 0x61d   : > { %3453 = vst [vmem:[%s6098_s23 + $0xb8] sm:$0xff] %v4061_v14  ;;  %v6705_v54 = vmax.f32 %v6438_v24, 0.0  ;;  %v6446_v50 = vadd.f32 %v3076_v3, %v2566_v6  ;;  %v3078_v23 = vadd.f32 %v3077_v37, %v6069_v43  ;;  %v2574_v6 = vadd.f32 %v6349_v27, %v6066_v56 }
 0x61e   : > { %v3081_v58 = vpop.f32.mrf.mxu1 }
 0x61f   : > { %v4062_v51 = vpack.c.bf16 %v6705_v54, %v6706_v1  ;;  %v6453_v4 = vadd.f32 %v3078_v23, %v2568_v16  ;;  %v3082_v14 = vadd.f32 %v3081_v58, %v6060_v32  ;;  %v3224_v3 = vmax.f32 %v6446_v50, 0.0 }
 0x620   : > { %v3083_v60 = vpop.f32.mrf.mxu1  ;;  %v2576_v23 = vadd.f32 %v6371_v12, %v6057_v22  ;;  %v2578_v58 = vadd.f32 %v6387_v19, %v6066_v56  ;;  %v2591_v12 = vpop.f32.mrf.mxu0  ;;  %v3510_v19 = vmax.f32 %v6178_v25, %v3197_v35  ;;  %v3511_v25 = vmax.f32 %v6191_v0, %v3199_v18 }
 0x621   : > { %3454 = vst [vmem:[%s6098_s23 + $0xc0] sm:$0xff] %v4062_v51  ;;  %v3225_v37 = vmax.f32 %v6453_v4, 0.0  ;;  %v3084_v54 = vadd.f32 %v3083_v60, %v6069_v43  ;;  %v6466_v16 = vadd.f32 %v3082_v14, %v2572_v20  ;;  %v2582_v60 = vadd.f32 %v2581_v7, %v6057_v22 }
 0x622   : > { %v3085_v30 = vpop.f32.mrf.mxu1  ;;  %v3479_v20 = vmax.f32 %v6173_v62, %v3196_v44  ;;  %v3480_v62 = vmax.f32 %v6189_v21, %v3198_v41  ;;  %v2588_v35 = vadd.f32 %v2587_v2, %v6066_v56  ;;  %v2593_v21 = vpop.f32.mrf.mxu0  ;;  %v6732_v41 = vmax.f32 %v6252_v26, 0.0 }
 0x623   : > { %v4063_v27 = vpack.c.bf16 %v3225_v37, %v3224_v3  ;;  %v6474_v51 = vadd.f32 %v3084_v54, %v2574_v6  ;;  %v3086_v1 = vadd.f32 %v3085_v30, %v6060_v32  ;;  %v3226_v54 = vmax.f32 %v6466_v16, 0.0 }
 0x624   : > { %v3087_v14 = vpop.f32.mrf.mxu1  ;;  %v3481_v48 = vmax.f32 %v3479_v20, %v6729_v31  ;;  %v3482_v0 = vmax.f32 %v3480_v62, %v6731_v17  ;;  %v3513_v18 = vmax.f32 %v3511_v25, %v6732_v41  ;;  %v6734_v20 = vmax.f32 %v6269_v40, 0.0 }
 0x625   : > { %3455 = vst [vmem:[%s6098_s23 + $0xc8] sm:$0xff] %v4063_v27  ;;  %v3227_v6 = vmax.f32 %v6474_v51, 0.0  ;;  %v6488_v30 = vadd.f32 %v3086_v1, %v2576_v23  ;;  %v3088_v7 = vadd.f32 %v3087_v14, %v6069_v43  ;;  %v6730_v1 = vmax.f32 %v6231_v59, 0.0 }
 0x626   : > { %v3091_v44 = vpop.f32.mrf.mxu1  ;;  %v3483_v2 = vmax.f32 %v3481_v48, %v6733_v61  ;;  %v3515_v62 = vmax.f32 %v3513_v18, %v6736_v47  ;;  %v6737_v25 = vmax.f32 %v6300_v11, 0.0  ;;  %v6739_v17 = vmax.f32 %v6320_v49, 0.0 }
 0x627   : > { %v3512_v23 = vmax.f32 %v3510_v19, %v6730_v1  ;;  %v4064_v42 = vpack.c.bf16 %v3227_v6, %v3226_v54  ;;  %v6507_v52 = vadd.f32 %v3088_v7, %v2578_v58  ;;  %v3092_v59 = vadd.f32 %v3091_v44, %v6060_v32 }
 0x628   : > { %v3093_v27 = vpop.f32.mrf.mxu1  ;;  %v3228_v58 = vmax.f32 %v6488_v30, 0.0  ;;  %v6735_v7 = vmax.f32 %v6282_v15, 0.0  ;;  %v3485_v31 = vmax.f32 %v3483_v2, %v6737_v25  ;;  %v2592_v44 = vadd.f32 %v2591_v12, %v6057_v22 }
 0x629   : > { %v3514_v19 = vmax.f32 %v3512_v23, %v6734_v20  ;;  %3456 = vst [vmem:[%s6098_s23 + $0xd0] sm:$0xff] %v4064_v42  ;;  %v3229_v14 = vmax.f32 %v6507_v52, 0.0  ;;  %v3094_v55 = vadd.f32 %v3093_v27, %v6069_v43  ;;  %v3166_v48 = vadd.f32 %v3092_v59, %v2582_v60  ;;  %v2595_v42 = vpop.f32.mrf.mxu0 }
 0x62a   : > { %v3484_v26 = vmax.f32 %v3482_v0, %v6735_v7  ;;  %v3095_v40 = vpop.f32.mrf.mxu1  ;;  %v6738_v52 = vmax.f32 %v6307_v9, 0.0  ;;  %v3517_v41 = vmax.f32 %v3515_v62, %v6740_v38  ;;  %v6741_v11 = vmax.f32 %v6338_v28, 0.0 }
 0x62b   : > { %v4065_v1 = vpack.c.bf16 %v3229_v14, %v3228_v58  ;;  %v3167_v30 = vadd.f32 %v3094_v55, %v2584_v36  ;;  %v3096_v23 = vadd.f32 %v3095_v40, %v6060_v32  ;;  %v3230_v12 = vmax.f32 %v3166_v48, 0.0  ;;  %v2597_v62 = vpop.f32.mrf.mxu0 }
 0x62c   : > { %v3516_v15 = vmax.f32 %v3514_v19, %v6738_v52  ;;  %v3486_v0 = vmax.f32 %v3484_v26, %v6739_v17  ;;  %v3487_v60 = vmax.f32 %v3485_v31, %v6741_v11  ;;  %v3097_v18 = vpop.f32.mrf.mxu1  ;;  %v2594_v59 = vadd.f32 %v2593_v21, %v6066_v56 }
 0x62d   : > { %3457 = vst [vmem:[%s6098_s23 + $0xd8] sm:$0xff] %v4065_v1  ;;  %v3231_v61 = vmax.f32 %v3167_v30, 0.0  ;;  %v3168_v36 = vadd.f32 %v3096_v23, %v2586_v46  ;;  %v3098_v2 = vadd.f32 %v3097_v18, %v6069_v43  ;;  %v6742_v9 = vmax.f32 %v6345_v34, 0.0 }
 0x62e   : > { %v6743_v27 = vmax.f32 %v6358_v8, 0.0  ;;  %v6744_v20 = vmax.f32 %v6376_v29, 0.0  ;;  %v3101_v19 = vpop.f32.mrf.mxu1  ;;  %v2596_v55 = vadd.f32 %v2595_v42, %v6057_v22  ;;  %v6745_v7 = vmax.f32 %v6366_v63, 0.0 }
 0x62f   : > { %v3518_v49 = vmax.f32 %v3516_v15, %v6742_v9  ;;  %v4066_v26 = vpack.c.bf16 %v3231_v61, %v3230_v12  ;;  %v3169_v47 = vadd.f32 %v3098_v2, %v2588_v35  ;;  %v6746_v21 = vmax.f32 %v6383_v39, 0.0 }
 0x630   : > { %v3488_v5 = vmax.f32 %v3486_v0, %v6743_v27  ;;  %v3489_v28 = vmax.f32 %v3487_v60, %v6744_v20  ;;  %v3519_v46 = vmax.f32 %v3517_v41, %v6745_v7  ;;  %v6747_v25 = vmax.f32 %v6396_v13, 0.0  ;;  %v3103_v40 = vpop.f32.mrf.mxu1 }
 0x631   : > { %v3520_v34 = vmax.f32 %v3518_v49, %v6746_v21  ;;  %v6748_v8 = vmax.f32 %v6412_v53, 0.0  ;;  %v3102_v29 = vadd.f32 %v3101_v19, %v6060_v32  ;;  %v6749_v22 = vmax.f32 %v6404_v57, 0.0  ;;  %3458 = vst [vmem:[%s6098_s23 + $0xe0] sm:$0xff] %v4066_v26 }
 0x632   : > { %v3490_v31 = vmax.f32 %v3488_v5, %v6747_v25  ;;  %v3232_v63 = vmax.f32 %v3168_v36, 0.0  ;;  %v3233_v30 = vmax.f32 %v3169_v47, 0.0  ;;  %v3104_v35 = vadd.f32 %v3103_v40, %v6069_v43  ;;  %v3105_v15 = vpop.f32.mrf.mxu1 }
 0x633   : > { %v3491_v48 = vmax.f32 %v3489_v28, %v6748_v8  ;;  %v3521_v1 = vmax.f32 %v3519_v46, %v6749_v22  ;;  %v6750_v39 = vmax.f32 %v6419_v33, 0.0  ;;  %v6751_v13 = vmax.f32 %v6430_v10, 0.0 }
 0x634   : > { %v3170_v52 = vadd.f32 %v3102_v29, %v2592_v44  ;;  %v2598_v57 = vadd.f32 %v2597_v62, %v6066_v56  ;;  %v4067_v17 = vpack.c.bf16 %v3233_v30, %v3232_v63  ;;  %v3171_v0 = vadd.f32 %v3104_v35, %v2594_v59 }
 0x635   : > { %v3522_v23 = vmax.f32 %v3520_v34, %v6750_v39  ;;  %v3492_v42 = vmax.f32 %v3490_v31, %v6751_v13  ;;  %v3493_v53 = vmax.f32 %v3491_v48, %v3224_v3  ;;  %v3106_v38 = vadd.f32 %v3105_v15, %v6060_v32  ;;  %v3107_v3 = vpop.f32.mrf.mxu1 }
 0x636   : > { %v6752_v41 = vmax.f32 %v6438_v24, 0.0  ;;  %3459 = vst [vmem:[%s6098_s23 + $0xe8] sm:$0xff] %v4067_v17  ;;  %v3234_v44 = vmax.f32 %v3170_v52, 0.0  ;;  %v3235_v56 = vmax.f32 %v3171_v0, 0.0  ;;  %v3108_v32 = vadd.f32 %v3107_v3, %v6069_v43 }
 0x637   : > { %v3524_v33 = vmax.f32 %v3522_v23, %v3225_v37  ;;  %v3494_v10 = vmax.f32 %v3492_v42, %v3226_v54  ;;  %v3495_v50 = vmax.f32 %v3493_v53, %v3228_v58  ;;  %v3172_v60 = vadd.f32 %v3106_v38, %v2596_v55 }
 0x638   : > { %v3523_v11 = vmax.f32 %v3521_v1, %v6752_v41  ;;  %v4068_v36 = vpack.c.bf16 %v3235_v56, %v3234_v44  ;;  %v3173_v2 = vadd.f32 %v3108_v32, %v2598_v57 }
 0x639   : > { %v3526_v18 = vmax.f32 %v3524_v33, %v3229_v14  ;;  %v3496_v4 = vmax.f32 %v3494_v10, %v3230_v12  ;;  %v3497_v37 = vmax.f32 %v3495_v50, %v3232_v63  ;;  %v3236_v16 = vmax.f32 %v3172_v60, 0.0 }
 0x63a   : > { %v3525_v24 = vmax.f32 %v3523_v11, %v3227_v6  ;;  %3460 = vst [vmem:[%s6098_s23 + $0xf0] sm:$0xff] %v4068_v36  ;;  %v3237_v43 = vmax.f32 %v3173_v2, 0.0 }
 0x63b   : > { %v3528_v58 = vmax.f32 %v3526_v18, %v3233_v30  ;;  %v3498_v59 = vmax.f32 %v3496_v4, %v3234_v44  ;;  %v3499_v9 = vmax.f32 %v3497_v37, %v3236_v16 }
 0x63c   : > { %v3527_v54 = vmax.f32 %v3525_v24, %v3231_v61  ;;  %v4069_v14 = vpack.c.bf16 %v3237_v43, %v3236_v16 }
 0x63d   : > { %v3500_v6 = vmax.f32 %v3498_v59, %v3499_v9  ;;  %v3530_v12 = vmax.f32 %v3528_v58, %v3237_v43 }
 0x63e   : > { %v3529_v51 = vmax.f32 %v3527_v54, %v3235_v56  ;;  %3461 = vst [vmem:[%s6098_s23 + $0xf8] sm:$0xff] %v4069_v14 }
 0x63f   : > { %v3541_v61 = vrot.slane %v3500_v6, 4 }
 0x640   : > { %v3531_v49 = vmax.f32 %v3529_v51, %v3530_v12 }
 0x641   : > { %4855 = shalt.err (!%p4852_p12)
}
 0x642   : > { %s4856_s28 = scalar_lea.hbm %s6585_s25, 4096  ;;  %s4860_s20 = scalar_lea.hbm %s6670_s15, 8192 }
 0x643   : > { %p4857_p1 = scmp.ne.s32.totalorder %s6585_s25, %s4856_s28  ;;  %p4861_p5 = scmp.lt.s32.totalorder %s6585_s25, %s6670_s15 }
 0x644   : > { %p4862_p8 = scmp.lt.s32.totalorder %s4860_s20, %s4856_s28 }
 0x645   : > { %p4858_p2 = pnand %p4857_p1, %p6753_p6 }
 0x646   : > { %p4863_p13 = por %p4862_p8, %p4861_p5 }
 0x647   : > { %p4859_p3 = pneg %p4858_p2 }
 0x649   : > { %p4864_p0 = pnand %p4863_p13, %p4859_p3 }
 0x64b   : > { %4867 = shalt.err (!%p4864_p0)
}
 0x64c   : > { %s4983_s17 = smov 128   ;;  %s4984_s21 = smov 8   ;;  %v3542_v27 = vmax.f32 %v3500_v6, %v3541_v61  ;;  %v3547_v5 = vrot.slane %v3531_v49, 4  ;;  %v4985_v19 = vmov 1966171168   ;;  %v6754_v29 = vlaneseq }
 0x64d   : > { %4399 = dma.vmem_to_hbm [thread:$0]  (%p6753_p6), %s6587_s30, 4096, %s6585_s25, %s3577_s19, %s4983_s17, %s4983_s17, %s4984_s21   ;;  %v3557_v55 = vunpack.c.l.s4 %v4985_v19 }
 0x64e   : > { %v3543_v20 = vrot.slane %v3542_v27, 2  ;;  %v3548_v28 = vmax.f32 %v3531_v49, %v3547_v5  ;;  %s3842_s18 = sshll.u32 %s6077_s5, 1  ;;  %s4071_s30 = sshll.u32 %s4960_s24, 5  ;;  %vm3573_vm3 = vcmp.lt.s32.totalorder %v6754_v29, 256 }
 0x64f   : > { %v3558_v62 = vunpack.c.0.s8 %v3557_v55  ;;  %s681_s25 = scalar_lea.vmem [#allocation19], %s3842_s18  ;;  %s3615_s3 = scalar_lea.hbm %s6671_s16, %s4071_s30 }
 0x650   : > { %v3544_v7 = vmax.f32 %v3542_v27, %v3543_v20  ;;  %v3549_v46 = vrot.slane %v3548_v28, 2  ;;  %s3617_s19 = sshll.u32 %s681_s25, 4  ;;  %s3582_s23 = scalar_lea.sflag [#allocation20], %s6077_s5  ;;  %s3618_s19 = int_to_ptr.vmem [resolvable:$true] %s3617_s19 }
 0x651   : > { %v3561_v31 = vsub.s32 %v3558_v62, %v5624_v45  ;;  %s4868_s20 = scalar_lea.vmem %s3618_s19, 32  ;;  %s4986_s26 = smov [#allocation19]  }
 0x652   : > { %v3545_v26 = vrot.slane %v3544_v7, 1  ;;  %v3550_v47 = vmax.f32 %v3548_v28, %v3549_v46  ;;  %p4869_p7 = scmp.ne.s32.totalorder %s3618_s19, %s4868_s20  ;;  %s4872_s24 = sshll.u32 %s4986_s26, 4  ;;  %s4873_s24 = int_to_ptr.vmem [resolvable:$false] %s4872_s24 }
 0x653   : > { %s4874_s27 = scalar_lea.vmem %s4873_s24, 64  ;;  %p4875_p10 = scmp.lt.s32.totalorder %s3618_s19, %s4873_s24 }
 0x654   : > { %v3551_v21 = vrot.slane %v3550_v47, 1  ;;  %v3546_v34 = vmax.f32 %v3544_v7, %v3545_v26  ;;  %p4870_p11 = pnand %p4869_p7, %p6753_p6  ;;  %p4876_p9 = scmp.lt.s32.totalorder %s4874_s27, %s4868_s20 }
 0x656   : > { %v3552_v25 = vmax.f32 %v3550_v47, %v3551_v21  ;;  %p4871_p4 = pneg %p4870_p11  ;;  %p4877_p12 = por %p4876_p9, %p4875_p10 }
 0x658   : > { %v3555_v8 = vcombine.low %v3546_v34, %v3552_v25  ;;  %p4878_p1 = pnand %p4877_p12, %p4871_p4 }
 0x65a   : > { %v3562_v48 = vrot.slane %v3555_v8, %v3561_v31 }
 0x65c   : > { %v3569_v40 = vrot.slane %v3562_v48, %v3561_v31 }
 0x65e   : > { %3575 = vst.msk [vmem:[%s681_s25] sm:$0x3] %vm3573_vm3, %v3569_v40 }
 0x65f   : > { %4881 = shalt.err (!%p4878_p1)
}
 0x660   : > { %s4882_s17 = scalar_lea.hbm %s3615_s3, 32  ;;  %s4886_s18 = scalar_lea.hbm %s6671_s16, 64 }
 0x661   : > { %p4883_p2 = scmp.ne.s32.totalorder %s3615_s3, %s4882_s17  ;;  %p4887_p8 = scmp.lt.s32.totalorder %s3615_s3, %s6671_s16 }
 0x662   : > { %p4888_p13 = scmp.lt.s32.totalorder %s4886_s18, %s4882_s17 }
 0x663   : > { %p4884_p3 = pnand %p4883_p2, %p6753_p6 }
 0x664   : > { %p4889_p0 = por %p4888_p13, %p4887_p8 }
 0x665   : > { %p4885_p5 = pneg %p4884_p3 }
 0x667   : > { %p4890_p7 = pnand %p4889_p0, %p4885_p5 }
 0x669   : > { %4893 = shalt.err (!%p4890_p7)
}
 0x66a   : > { %4400 = dma.vmem_to_hbm [thread:$0]  (%p6753_p6), %s3618_s19, 32, %s3615_s3, %s3582_s23  }
 0x66b PF: > { %s6755_s29 = sld [smem:[#allocation31_spill]] }
 0x66c   : > { %s6756_s28 = sld [smem:[#allocation28_spill]] }
 0x66d   : > { %s6757_s20 = sld [smem:[#allocation33_spill]] }
 0x671   : > { %p4456_p11 = scmp.ge.s32.totalorder %s6755_s29, 2 }
 0x672   : > { %s3629_s26 = sand.u32 1, %s6756_s28  }
 0x673   : > { %p6758_p4 = scmp.ne.s32.totalorder %s6757_s20, 0  ;;  %s3630_s24 = scalar_lea.sflag [#allocation5], %s3629_s26 }
 0x675   : > { %p4432_p10 = pnand %p4456_p11, %p6758_p4 }
 0x677   : > { %p4433_p9 = pneg %p4432_p10 }
 0x679   : > { %4939 = dma.done.wait (%p4433_p9), %s3630_s24, 4096  }
 0x67a   : > { %4941 = vsyncadd (%p4433_p9), %s3630_s24, 4294963200  ;;  %s3639_s27 = scalar_lea.sflag [#allocation20], %s3629_s26 }
 0x67b   : > { %4943 = dma.done.wait (%p4433_p9), %s3639_s27, 32  }
 0x67c   : > { %4945 = vsyncadd (%p4433_p9), %s3639_s27, 4294967264  ;;  %s38_s26 = sadd.s32 1, %s6755_s29   ;;  %s6759_s0 = sld [smem:[#allocation29_spill]] }
 0x67d   : > { %p35_p12 = scmp.ge.s32.totalorder %s38_s26, 4   ;;  %s6760_s23 = sld [smem:[#allocation34_spill]] }
 0x67e   : > { %s6761_s24 = sld [smem:[#allocation30_spill]]  ;;  %s6763_s21 = smov %s4952_s22 }
 0x67f   : > { %s6762_s25 = sld [smem:[#allocation32_spill]]  ;;  %37 = sbr.rel (!%p35_p12) target bundleno = 15 (0xf), region = 177 }
 0x682   : > { %s6764_s22 = smov %s6759_s0 }
 0x684   :  { %3644 = vsyncpa [#allocation4], 1 }
 0x685   :  { %3646 = vsyncpa [#allocation4 + $0x1], 1 }
 0x686   :  { %3647 = vsyncpa [#allocation7], 1 }
 0x687   :  { %3648 = vsyncpa [#allocation10], 1 }
 0x688   :  { %3649 = vsyncpa [#allocation13], 1 }
 0x689   :  { %3650 = vsyncpa [#allocation16], 1 }
 0x68a   :  { %3651 = vsyncpa [#allocation5], 1 }
 0x68b   :  { %3653 = vsyncpa [#allocation5 + $0x1], 1 }
 0x68c   :  { %3654 = vsyncpa [#allocation20], 1 }
 0x68d   :  { %3656 = vsyncpa [#allocation20 + $0x1], 1 }

</bundles_post_ra>
